<compile_context>
chip_gen: v7x
topology: tpu7x:2x2x1
jax: 0.10.0
libtpu: 0.0.40
codegen_flags: <defaults>
</compile_context>

<pallas_src>
import jax
import jax.numpy as jnp
from jax.experimental import pallas as pl
from jax.experimental.pallas import tpu as pltpu

F32 = jnp.float32
BF16 = jnp.bfloat16
LANES = 128


def _round_up(v, m):
    return (v + m - 1) // m * m


# ----------------------------------------------------------------------------
# Parameter-slab layouts (static, shared between the packer and the kernel).
# ----------------------------------------------------------------------------
# Weight slab: bf16, each weight padded to 128 lanes, row offsets aligned to 16
# (bf16 sublane-packing granularity) so in-kernel static slices start on tile
# boundaries.
_W_LAYOUT = (
    ("wg1", 8, 16),
    ("wg3", 16, 32),
    ("wmg1", 32, 64),
    ("wmg2", 64, 128),
    ("wmf1_feat", 32, 128),
    ("wmf1_glob", 128, 128),
    ("wmf2", 128, 32),
    ("wmd1", 32, 32),
    ("wmd2", 32, 32),
    ("wma2", 32, 32),
    ("wma3", 32, 1),
    ("wg5", 32, 32),
    ("w_tail", 32, 8),          # = wg6 @ wfc1 @ wfc2, padded 3 -> 8 lanes
)


def _build_w_offsets():
    offs, off = {}, 0
    for name, r, _ in _W_LAYOUT:
        offs[name] = off
        off = _round_up(off + r, 16)
    return offs, off


_W_OFFSETS, _W_ROWS = _build_w_offsets()
_W_DIMS = {n: (r, c) for n, r, c in _W_LAYOUT}

# Bias / pointwise-vector slab: f32, one row per entry, padded to 128 lanes.
_B_LAYOUT = (
    ("bg1", 16), ("bg3", 32), ("bmg1", 64), ("bmg2", 128), ("bmf1", 128),
    ("bmf2", 32), ("bmd1", 32), ("bmd2", 32),
    ("wma1_max", 32), ("wma1_mean", 32),
    ("bma1", 32), ("bma2", 32), ("bma3", 1),
    ("bg5", 32), ("b_tail", 8),
)
_B_INDEX = {n: i for i, (n, _) in enumerate(_B_LAYOUT)}
_B_COLS = {n: c for n, c in _B_LAYOUT}
_B_ROWS = _round_up(len(_B_LAYOUT), 8)


# ----------------------------------------------------------------------------
# Pallas kernel: the entire forward pass
# ----------------------------------------------------------------------------
def facet_attention_gnn_kernel(a_ref, x_ref, w_ref, b_ref, out_ref):
    relu = lambda v: jnp.maximum(v, 0.0)

    def W(name):                                   # static slice of bf16 slab
        r, c = _W_DIMS[name]
        off = _W_OFFSETS[name]
        return w_ref[off:off + r, 0:c]             # (r, c) bf16

    def B(name):                                   # static slice of f32 slab
        i = _B_INDEX[name]
        return b_ref[i:i + 1, 0:_B_COLS[name]]     # (1, c) f32

    def mm(h, w):                                  # MXU: bf16 in, f32 accumulate
        return jnp.dot(h.astype(BF16), w, preferred_element_type=F32)

    A = a_ref[...]                                 # (N, N) bf16 normalized adjacency

    def agg(h):                                    # A_hat @ h  (K = N contraction)
        return jnp.dot(A, h.astype(BF16), preferred_element_type=F32)

    x = x_ref[...]                                 # (N, 8) f32 (3 real features + zeros)

    # ---- GCN stem, reordered as (A @ h) @ W  (F_in < F_out) -----------------
    feat = relu(mm(agg(x), W("wg1")) + B("bg1"))       # (N, 16)
    feat = relu(mm(agg(feat), W("wg3")) + B("bg3"))    # (N, 32)

    # ---- mlp_global (BN folded, eval mode) -----------------------------------
    g = relu(mm(feat, W("wmg1")) + B("bmg1"))          # (N, 64)
    g = relu(mm(g, W("wmg2")) + B("bmg2"))             # (N, 128)
    g_max = jnp.max(g, axis=0, keepdims=True)          # (1, 128) global max-pool

    # ---- mlp_feat on concat([feat, feat_global]) -----------------------------
    # feat_global rows are all identical -> rank-1 contribution, broadcast add.
    fa = mm(feat, W("wmf1_feat")) + mm(g_max, W("wmf1_glob"))
    fa = relu(fa + B("bmf1"))                          # (N, 128)
    fa = relu(mm(fa, W("wmf2")) + B("bmf2"))           # (N, 32)

    # ---- mlp_diff -------------------------------------------------------------
    fd = feat - fa
    fd = relu(mm(fd, W("wmd1")) + B("bmd1"))
    fd = relu(mm(fd, W("wmd2")) + B("bmd2"))           # (N, 32)

    # ---- channel attention: [max, mean] -> mlp_atten --------------------------
    fd_max = jnp.max(fd, axis=1, keepdims=True)        # (N, 1)
    fd_mean = jnp.mean(fd, axis=1, keepdims=True)      # (N, 1)
    # Linear(2, 32) without materializing the (N, 2) concat (pointwise, f32):
    at = relu(fd_max * B("wma1_max") + fd_mean * B("wma1_mean") + B("bma1"))
    at = relu(mm(at, W("wma2")) + B("bma2"))           # (N, 32)
    at = jax.nn.sigmoid(mm(at, W("wma3")) + B("bma3")) # (N, 1)
    fa = fa * at                                       # (N, 32)

    # ---- GCN head + folded linear tail (gcn6 -> fc1 -> fc2 == w_tail) ---------
    fa = agg(mm(fa, W("wg5"))) + B("bg5")              # (N, 32)   gcn5
    fa = agg(mm(fa, W("w_tail"))) + B("b_tail")        # (N, 8)    3 real + 5 zero lanes

    # F.normalize(dim=1): padded lanes are exactly zero -> norm unaffected.
    nrm = jnp.sqrt(jnp.sum(fa * fa, axis=1, keepdims=True))
    out_ref[...] = fa / jnp.maximum(nrm, 1e-12)


# ----------------------------------------------------------------------------
# Glue: adjacency normalization, tail folding, parameter packing (plain JAX)
# ----------------------------------------------------------------------------
def build_gcn_adj(edge_index, n):
    """Dense symmetric GCN normalization of (A + I) from edge_index (2, E)."""
    src, dst = edge_index[0], edge_index[1]
    A = jnp.zeros((n, n), F32).at[dst, src].add(1.0)
    A = A + jnp.eye(n, dtype=F32)                      # add_self_loops
    deg = jnp.sum(A, axis=1)
    dinv = jnp.where(deg > 0, jax.lax.rsqrt(deg), 0.0)
    return dinv[:, None] * A * dinv[None, :]


def _fold_tail(P):
    """gcn6 -> fc1 -> fc2 has no nonlinearity: fold into one (32,3) projection."""
    w_tail3 = P["wg6"] @ P["wfc1"] @ P["wfc2"]                               # (32, 3)
    b_tail3 = (P["bg6"] @ P["wfc1"] @ P["wfc2"]
               + P["bfc1"] @ P["wfc2"] + P["bfc2"])                          # (1, 3)
    w_tail = jnp.zeros((32, 8), F32).at[:, :3].set(w_tail3)
    b_tail = jnp.zeros((1, 8), F32).at[:, :3].set(b_tail3)
    return w_tail, b_tail


def pack_params(P):
    tensors = dict(P)
    tensors["w_tail"], tensors["b_tail"] = _fold_tail(P)

    w_slab = jnp.zeros((_W_ROWS, LANES), BF16)
    for name, r, c in _W_LAYOUT:
        off = _W_OFFSETS[name]
        w_slab = w_slab.at[off:off + r, :c].set(tensors[name].astype(BF16))

    b_slab = jnp.zeros((_B_ROWS, LANES), F32)
    for name, c in _B_LAYOUT:
        b_slab = b_slab.at[_B_INDEX[name], :c].set(
            tensors[name].reshape(-1).astype(F32))
    return w_slab, b_slab


def facet_attention_gnn(x_full, edge_index, params):
    """x_full: (N, 6) node features (mimics data.x); edge_index: (2, E) int32."""
    n = x_full.shape[0]
    x3 = x_full[:, 3:]                                  # x = x[:, 3:]  -> (N, 3)
    x_pad = jnp.zeros((n, 8), F32).at[:, :3].set(x3)
    a_hat = build_gcn_adj(edge_index, n).astype(BF16)   # bf16 adjacency for the MXU
    w_slab, b_slab = pack_params(params)

    vmem = pl.BlockSpec(memory_space=pltpu.MemorySpace.VMEM)
    out8 = pl.pallas_call(
        facet_attention_gnn_kernel,
        out_shape=jax.ShapeDtypeStruct((n, 8), F32),
        in_specs=[vmem, vmem, vmem, vmem],
        out_specs=vmem,
        compiler_params=pltpu.CompilerParams(vmem_limit_bytes=32 * 1024 * 1024),
    )(a_hat, x_pad, w_slab, b_slab)
    return out8[:, :3]


# ----------------------------------------------------------------------------
# Parameter initialization (BN folded in eval mode)
# ----------------------------------------------------------------------------
def _make_linear(key, fan_in, fan_out):
    k1, k2 = jax.random.split(key)
    w = jax.random.normal(k1, (fan_in, fan_out), F32) / jnp.sqrt(float(fan_in))
    b = 0.05 * jax.random.normal(k2, (1, fan_out), F32)
    return w, b


def _make_bn(key, dim, eps=1e-5):
    k1, k2, k3 = jax.random.split(key, 3)
    gamma = 1.0 + 0.1 * jax.random.normal(k1, (dim,), F32)
    beta = 0.05 * jax.random.normal(k2, (dim,), F32)
    rmean = 0.05 * jax.random.normal(k3, (dim,), F32)
    rvar = jnp.ones((dim,), F32)
    scale = gamma / jnp.sqrt(rvar + eps)
    shift = beta - rmean * scale
    return scale, shift


def _fold_bn(w, b, scale, shift):
    return w * scale[None, :], b * scale[None, :] + shift[None, :]


def _linear_bn(key, fi, fo):
    k1, k2 = jax.random.split(key)
    w, b = _make_linear(k1, fi, fo)
    s, sh = _make_bn(k2, fo)
    return _fold_bn(w, b, s, sh)


def init_params(key):
    ks = iter(jax.random.split(key, 32))
    P = {}
    # GCN layers (weight + post-aggregation bias)
    wg1, P["bg1"] = _make_linear(next(ks), 3, 16)
    P["wg1"] = jnp.zeros((8, 16), F32).at[:3].set(wg1)   # pad K: 3 -> 8
    P["wg3"], P["bg3"] = _make_linear(next(ks), 16, 32)
    # mlp_global
    P["wmg1"], P["bmg1"] = _linear_bn(next(ks), 32, 64)
    P["wmg2"], P["bmg2"] = _linear_bn(next(ks), 64, 128)
    # mlp_feat (input 160 = 32 feat + 128 global, split into two weight blocks)
    wmf1, P["bmf1"] = _linear_bn(next(ks), 160, 128)
    P["wmf1_feat"], P["wmf1_glob"] = wmf1[:32], wmf1[32:]
    P["wmf2"], P["bmf2"] = _linear_bn(next(ks), 128, 32)
    # mlp_diff
    P["wmd1"], P["bmd1"] = _linear_bn(next(ks), 32, 32)
    P["wmd2"], P["bmd2"] = _linear_bn(next(ks), 32, 32)
    # mlp_atten
    wma1, P["bma1"] = _linear_bn(next(ks), 2, 32)
    P["wma1_max"], P["wma1_mean"] = wma1[0:1], wma1[1:2]
    P["wma2"], P["bma2"] = _linear_bn(next(ks), 32, 32)
    P["wma3"], P["bma3"] = _linear_bn(next(ks), 32, 1)
    # GCN head + FCs
    P["wg5"], P["bg5"] = _make_linear(next(ks), 32, 32)
    P["wg6"], P["bg6"] = _make_linear(next(ks), 32, 128)
    P["wfc1"], P["bfc1"] = _make_linear(next(ks), 128, 32)
    P["wfc2"], P["bfc2"] = _make_linear(next(ks), 32, 3)
    return P


# ----------------------------------------------------------------------------
# Pure-JAX f32 reference (mirrors the torch forward, incl. explicit concats,
# no reorder / no tail fold) — ground truth for the numerics check.
# ----------------------------------------------------------------------------
def reference_forward(x_full, edge_index, P):
    n = x_full.shape[0]
    a_hat = build_gcn_adj(edge_index, n)
    xp = jnp.zeros((n, 8), F32).at[:, :3].set(x_full[:, 3:])
    relu = jax.nn.relu
    gcn = lambda h, w, b: a_hat @ (h @ w) + b

    feat = relu(gcn(xp, P["wg1"], P["bg1"]))
    feat = relu(gcn(feat, P["wg3"], P["bg3"]))
    g = relu(feat @ P["wmg1"] + P["bmg1"])
    g = relu(g @ P["wmg2"] + P["bmg2"])
    feat_global = jnp.broadcast_to(jnp.max(g, axis=0)[None, :], (n, 128))
    feat_aug = jnp.concatenate([feat, feat_global], axis=1)
    wmf1 = jnp.concatenate([P["wmf1_feat"], P["wmf1_glob"]], axis=0)
    fa = relu(feat_aug @ wmf1 + P["bmf1"])
    fa = relu(fa @ P["wmf2"] + P["bmf2"])
    fd = feat - fa
    fd = relu(fd @ P["wmd1"] + P["bmd1"])
    fd = relu(fd @ P["wmd2"] + P["bmd2"])
    channel = jnp.concatenate(
        [fd.max(axis=1, keepdims=True), fd.mean(axis=1, keepdims=True)], axis=1)
    wma1 = jnp.concatenate([P["wma1_max"], P["wma1_mean"]], axis=0)
    at = relu(channel @ wma1 + P["bma1"])
    at = relu(at @ P["wma2"] + P["bma2"])
    at = jax.nn.sigmoid(at @ P["wma3"] + P["bma3"])
    fa = fa * at
    fa = gcn(fa, P["wg5"], P["bg5"])
    fa = gcn(fa, P["wg6"], P["bg6"])
    fa = fa @ P["wfc1"] + P["bfc1"]
    fa = fa @ P["wfc2"] + P["bfc2"]
    nrm = jnp.sqrt(jnp.sum(fa * fa, axis=1, keepdims=True))
    return fa / jnp.maximum(nrm, 1e-12)


if __name__ == "__main__":
    N = 128
    key = jax.random.PRNGKey(0)
    kx, kp = jax.random.split(key)

    # data.x : (N, 6) node features (first 3 cols dropped by the forward pass)
    x_full = jax.random.normal(kx, (N, 6), F32)
    # edge_index : bidirectional ring graph (2, 2N)
    src = jnp.arange(N, dtype=jnp.int32)
    dst = (src + 1) % N
    edge_index = jnp.stack(
        [jnp.concatenate([src, dst]), jnp.concatenate([dst, src])], axis=0)

    params = init_params(kp)

    out = facet_attention_gnn(x_full, edge_index, params)
    out = jax.block_until_ready(out)

    ref = reference_forward(x_full, edge_index, params)
    assert out.shape == (N, 3) and out.dtype == F32
    # bf16-matmul kernel vs. f32 reference on unit-normalized outputs.
    assert bool(jnp.allclose(out, ref, rtol=5e-2, atol=5e-2)), "mismatch vs reference"
    print("KERNEL_OK")
</pallas_src>

<mosaic_0001>
module attributes {stable_mosaic.version = 11 : i64} {
  func.func @facet_attention_gnn_kernel(%arg0: memref<128x128xbf16, #tpu.memory_space<vmem>>, %arg1: memref<128x8xf32, #tpu.memory_space<vmem>>, %arg2: memref<608x128xbf16, #tpu.memory_space<vmem>>, %arg3: memref<16x128xf32, #tpu.memory_space<vmem>>, %arg4: memref<128x8xf32, #tpu.memory_space<vmem>>) attributes {dimension_semantics = [], scalar_prefetch = 0 : i64, scratch_operands = 0 : i64, tpu.core_type = #tpu.core_type<tc>} {
    %c0 = arith.constant 0 : index
    %c0_0 = arith.constant 0 : index
    %0 = vector.load %arg0[%c0, %c0_0] : memref<128x128xbf16, #tpu.memory_space<vmem>>, vector<128x128xbf16>
    %c0_1 = arith.constant 0 : index
    %c0_2 = arith.constant 0 : index
    %1 = vector.load %arg1[%c0_1, %c0_2] : memref<128x8xf32, #tpu.memory_space<vmem>>, vector<128x8xf32>
    %2 = arith.truncf %1 : vector<128x8xf32> to vector<128x8xbf16>
    %cst = arith.constant dense<0.000000e+00> : vector<128x8xf32>
    %3 = tpu.matmul %0, %2, %cst {dimension_numbers = #tpu.dot_dimension_numbers<[1], [0], [0], [1], [0, 0, 1, 1], [], []>} : vector<128x128xbf16>, vector<128x8xbf16>, vector<128x8xf32> -> vector<128x8xf32>
    %c0_3 = arith.constant 0 : index
    %c0_4 = arith.constant 0 : index
    %4 = vector.load %arg2[%c0_3, %c0_4] : memref<608x128xbf16, #tpu.memory_space<vmem>>, vector<8x16xbf16>
    %5 = arith.truncf %3 : vector<128x8xf32> to vector<128x8xbf16>
    %cst_5 = arith.constant dense<0.000000e+00> : vector<128x16xf32>
    %6 = tpu.matmul %5, %4, %cst_5 {dimension_numbers = #tpu.dot_dimension_numbers<[1], [0], [0], [1], [0, 0, 1, 1], [], []>} : vector<128x8xbf16>, vector<8x16xbf16>, vector<128x16xf32> -> vector<128x16xf32>
    %c0_6 = arith.constant 0 : index
    %c0_7 = arith.constant 0 : index
    %7 = vector.load %arg3[%c0_6, %c0_7] : memref<16x128xf32, #tpu.memory_space<vmem>>, vector<1x16xf32>
    %8 = vector.broadcast %7 : vector<1x16xf32> to vector<128x16xf32>
    %9 = arith.addf %6, %8 : vector<128x16xf32>
    %cst_8 = arith.constant 0.000000e+00 : f32
    %10 = vector.broadcast %cst_8 : f32 to vector<128x16xf32>
    %11 = arith.maximumf %9, %10 : vector<128x16xf32>
    %12 = arith.truncf %11 : vector<128x16xf32> to vector<128x16xbf16>
    %cst_9 = arith.constant dense<0.000000e+00> : vector<128x16xf32>
    %13 = tpu.matmul %0, %12, %cst_9 {dimension_numbers = #tpu.dot_dimension_numbers<[1], [0], [0], [1], [0, 0, 1, 1], [], []>} : vector<128x128xbf16>, vector<128x16xbf16>, vector<128x16xf32> -> vector<128x16xf32>
    %c16 = arith.constant 16 : index
    %c0_10 = arith.constant 0 : index
    %14 = vector.load %arg2[%c16, %c0_10] : memref<608x128xbf16, #tpu.memory_space<vmem>>, vector<16x32xbf16>
    %15 = arith.truncf %13 : vector<128x16xf32> to vector<128x16xbf16>
    %cst_11 = arith.constant dense<0.000000e+00> : vector<128x32xf32>
    %16 = tpu.matmul %15, %14, %cst_11 {dimension_numbers = #tpu.dot_dimension_numbers<[1], [0], [0], [1], [0, 0, 1, 1], [], []>} : vector<128x16xbf16>, vector<16x32xbf16>, vector<128x32xf32> -> vector<128x32xf32>
    %c1 = arith.constant 1 : index
    %c0_12 = arith.constant 0 : index
    %17 = vector.load %arg3[%c1, %c0_12] : memref<16x128xf32, #tpu.memory_space<vmem>>, vector<1x32xf32>
    %18 = vector.broadcast %17 : vector<1x32xf32> to vector<128x32xf32>
    %19 = arith.addf %16, %18 : vector<128x32xf32>
    %cst_13 = arith.constant 0.000000e+00 : f32
    %20 = vector.broadcast %cst_13 : f32 to vector<128x32xf32>
    %21 = arith.maximumf %19, %20 : vector<128x32xf32>
    %c32 = arith.constant 32 : index
    %c0_14 = arith.constant 0 : index
    %22 = vector.load %arg2[%c32, %c0_14] : memref<608x128xbf16, #tpu.memory_space<vmem>>, vector<32x64xbf16>
    %23 = arith.truncf %21 : vector<128x32xf32> to vector<128x32xbf16>
    %cst_15 = arith.constant dense<0.000000e+00> : vector<128x64xf32>
    %24 = tpu.matmul %23, %22, %cst_15 {dimension_numbers = #tpu.dot_dimension_numbers<[1], [0], [0], [1], [0, 0, 1, 1], [], []>} : vector<128x32xbf16>, vector<32x64xbf16>, vector<128x64xf32> -> vector<128x64xf32>
    %c2 = arith.constant 2 : index
    %c0_16 = arith.constant 0 : index
    %25 = vector.load %arg3[%c2, %c0_16] : memref<16x128xf32, #tpu.memory_space<vmem>>, vector<1x64xf32>
    %26 = vector.broadcast %25 : vector<1x64xf32> to vector<128x64xf32>
    %27 = arith.addf %24, %26 : vector<128x64xf32>
    %cst_17 = arith.constant 0.000000e+00 : f32
    %28 = vector.broadcast %cst_17 : f32 to vector<128x64xf32>
    %29 = arith.maximumf %27, %28 : vector<128x64xf32>
    %c64 = arith.constant 64 : index
    %c0_18 = arith.constant 0 : index
    %30 = vector.load %arg2[%c64, %c0_18] : memref<608x128xbf16, #tpu.memory_space<vmem>>, vector<64x128xbf16>
    %31 = arith.truncf %29 : vector<128x64xf32> to vector<128x64xbf16>
    %cst_19 = arith.constant dense<0.000000e+00> : vector<128x128xf32>
    %32 = tpu.matmul %31, %30, %cst_19 {dimension_numbers = #tpu.dot_dimension_numbers<[1], [0], [0], [1], [0, 0, 1, 1], [], []>} : vector<128x64xbf16>, vector<64x128xbf16>, vector<128x128xf32> -> vector<128x128xf32>
    %c3 = arith.constant 3 : index
    %c0_20 = arith.constant 0 : index
    %33 = vector.load %arg3[%c3, %c0_20] : memref<16x128xf32, #tpu.memory_space<vmem>>, vector<1x128xf32>
    %34 = vector.broadcast %33 : vector<1x128xf32> to vector<128x128xf32>
    %35 = arith.addf %32, %34 : vector<128x128xf32>
    %cst_21 = arith.constant 0.000000e+00 : f32
    %36 = vector.broadcast %cst_21 : f32 to vector<128x128xf32>
    %37 = arith.maximumf %35, %36 : vector<128x128xf32>
    %cst_22 = arith.constant dense<0xFF800000> : vector<128xf32>
    %38 = vector.multi_reduction <maximumf>, %37, %cst_22 [0] : vector<128x128xf32> to vector<128xf32>
    %39 = vector.shape_cast %38 : vector<128xf32> to vector<1x128xf32>
    %c128 = arith.constant 128 : index
    %c0_23 = arith.constant 0 : index
    %40 = vector.load %arg2[%c128, %c0_23] : memref<608x128xbf16, #tpu.memory_space<vmem>>, vector<32x128xbf16>
    %41 = arith.truncf %21 : vector<128x32xf32> to vector<128x32xbf16>
    %cst_24 = arith.constant dense<0.000000e+00> : vector<128x128xf32>
    %42 = tpu.matmul %41, %40, %cst_24 {dimension_numbers = #tpu.dot_dimension_numbers<[1], [0], [0], [1], [0, 0, 1, 1], [], []>} : vector<128x32xbf16>, vector<32x128xbf16>, vector<128x128xf32> -> vector<128x128xf32>
    %c160 = arith.constant 160 : index
    %c0_25 = arith.constant 0 : index
    %43 = vector.load %arg2[%c160, %c0_25] : memref<608x128xbf16, #tpu.memory_space<vmem>>, vector<128x128xbf16>
    %44 = arith.truncf %39 : vector<1x128xf32> to vector<1x128xbf16>
    %cst_26 = arith.constant dense<0.000000e+00> : vector<1x128xf32>
    %45 = tpu.matmul %44, %43, %cst_26 {dimension_numbers = #tpu.dot_dimension_numbers<[1], [0], [0], [1], [0, 0, 1, 1], [], []>} : vector<1x128xbf16>, vector<128x128xbf16>, vector<1x128xf32> -> vector<1x128xf32>
    %46 = vector.broadcast %45 : vector<1x128xf32> to vector<128x128xf32>
    %47 = arith.addf %42, %46 : vector<128x128xf32>
    %c4 = arith.constant 4 : index
    %c0_27 = arith.constant 0 : index
    %48 = vector.load %arg3[%c4, %c0_27] : memref<16x128xf32, #tpu.memory_space<vmem>>, vector<1x128xf32>
    %49 = vector.broadcast %48 : vector<1x128xf32> to vector<128x128xf32>
    %50 = arith.addf %47, %49 : vector<128x128xf32>
    %cst_28 = arith.constant 0.000000e+00 : f32
    %51 = vector.broadcast %cst_28 : f32 to vector<128x128xf32>
    %52 = arith.maximumf %50, %51 : vector<128x128xf32>
    %c288 = arith.constant 288 : index
    %c0_29 = arith.constant 0 : index
    %53 = vector.load %arg2[%c288, %c0_29] : memref<608x128xbf16, #tpu.memory_space<vmem>>, vector<128x32xbf16>
    %54 = arith.truncf %52 : vector<128x128xf32> to vector<128x128xbf16>
    %cst_30 = arith.constant dense<0.000000e+00> : vector<128x32xf32>
    %55 = tpu.matmul %54, %53, %cst_30 {dimension_numbers = #tpu.dot_dimension_numbers<[1], [0], [0], [1], [0, 0, 1, 1], [], []>} : vector<128x128xbf16>, vector<128x32xbf16>, vector<128x32xf32> -> vector<128x32xf32>
    %c5 = arith.constant 5 : index
    %c0_31 = arith.constant 0 : index
    %56 = vector.load %arg3[%c5, %c0_31] : memref<16x128xf32, #tpu.memory_space<vmem>>, vector<1x32xf32>
    %57 = vector.broadcast %56 : vector<1x32xf32> to vector<128x32xf32>
    %58 = arith.addf %55, %57 : vector<128x32xf32>
    %cst_32 = arith.constant 0.000000e+00 : f32
    %59 = vector.broadcast %cst_32 : f32 to vector<128x32xf32>
    %60 = arith.maximumf %58, %59 : vector<128x32xf32>
    %61 = arith.subf %21, %60 : vector<128x32xf32>
    %c416 = arith.constant 416 : index
    %c0_33 = arith.constant 0 : index
    %62 = vector.load %arg2[%c416, %c0_33] : memref<608x128xbf16, #tpu.memory_space<vmem>>, vector<32x32xbf16>
    %63 = arith.truncf %61 : vector<128x32xf32> to vector<128x32xbf16>
    %cst_34 = arith.constant dense<0.000000e+00> : vector<128x32xf32>
    %64 = tpu.matmul %63, %62, %cst_34 {dimension_numbers = #tpu.dot_dimension_numbers<[1], [0], [0], [1], [0, 0, 1, 1], [], []>} : vector<128x32xbf16>, vector<32x32xbf16>, vector<128x32xf32> -> vector<128x32xf32>
    %c6 = arith.constant 6 : index
    %c0_35 = arith.constant 0 : index
    %65 = vector.load %arg3[%c6, %c0_35] : memref<16x128xf32, #tpu.memory_space<vmem>>, vector<1x32xf32>
    %66 = vector.broadcast %65 : vector<1x32xf32> to vector<128x32xf32>
    %67 = arith.addf %64, %66 : vector<128x32xf32>
    %cst_36 = arith.constant 0.000000e+00 : f32
    %68 = vector.broadcast %cst_36 : f32 to vector<128x32xf32>
    %69 = arith.maximumf %67, %68 : vector<128x32xf32>
    %c448 = arith.constant 448 : index
    %c0_37 = arith.constant 0 : index
    %70 = vector.load %arg2[%c448, %c0_37] : memref<608x128xbf16, #tpu.memory_space<vmem>>, vector<32x32xbf16>
    %71 = arith.truncf %69 : vector<128x32xf32> to vector<128x32xbf16>
    %cst_38 = arith.constant dense<0.000000e+00> : vector<128x32xf32>
    %72 = tpu.matmul %71, %70, %cst_38 {dimension_numbers = #tpu.dot_dimension_numbers<[1], [0], [0], [1], [0, 0, 1, 1], [], []>} : vector<128x32xbf16>, vector<32x32xbf16>, vector<128x32xf32> -> vector<128x32xf32>
    %c7 = arith.constant 7 : index
    %c0_39 = arith.constant 0 : index
    %73 = vector.load %arg3[%c7, %c0_39] : memref<16x128xf32, #tpu.memory_space<vmem>>, vector<1x32xf32>
    %74 = vector.broadcast %73 : vector<1x32xf32> to vector<128x32xf32>
    %75 = arith.addf %72, %74 : vector<128x32xf32>
    %cst_40 = arith.constant 0.000000e+00 : f32
    %76 = vector.broadcast %cst_40 : f32 to vector<128x32xf32>
    %77 = arith.maximumf %75, %76 : vector<128x32xf32>
    %cst_41 = arith.constant dense<0xFF800000> : vector<128xf32>
    %78 = vector.multi_reduction <maximumf>, %77, %cst_41 [1] : vector<128x32xf32> to vector<128xf32>
    %79 = vector.shape_cast %78 : vector<128xf32> to vector<128x1xf32>
    %cst_42 = arith.constant dense<0.000000e+00> : vector<128xf32>
    %80 = vector.multi_reduction <add>, %77, %cst_42 [1] : vector<128x32xf32> to vector<128xf32>
    %81 = vector.shape_cast %80 : vector<128xf32> to vector<128x1xf32>
    %cst_43 = arith.constant 3.200000e+01 : f32
    %82 = vector.broadcast %cst_43 : f32 to vector<128x1xf32>
    %83 = arith.divf %81, %82 : vector<128x1xf32>
    %c8 = arith.constant 8 : index
    %c0_44 = arith.constant 0 : index
    %84 = vector.load %arg3[%c8, %c0_44] : memref<16x128xf32, #tpu.memory_space<vmem>>, vector<1x32xf32>
    %85 = vector.broadcast %79 : vector<128x1xf32> to vector<128x32xf32>
    %86 = vector.broadcast %84 : vector<1x32xf32> to vector<128x32xf32>
    %87 = arith.mulf %85, %86 : vector<128x32xf32>
    %c9 = arith.constant 9 : index
    %c0_45 = arith.constant 0 : index
    %88 = vector.load %arg3[%c9, %c0_45] : memref<16x128xf32, #tpu.memory_space<vmem>>, vector<1x32xf32>
    %89 = vector.broadcast %83 : vector<128x1xf32> to vector<128x32xf32>
    %90 = vector.broadcast %88 : vector<1x32xf32> to vector<128x32xf32>
    %91 = arith.mulf %89, %90 : vector<128x32xf32>
    %92 = arith.addf %87, %91 : vector<128x32xf32>
    %c10 = arith.constant 10 : index
    %c0_46 = arith.constant 0 : index
    %93 = vector.load %arg3[%c10, %c0_46] : memref<16x128xf32, #tpu.memory_space<vmem>>, vector<1x32xf32>
    %94 = vector.broadcast %93 : vector<1x32xf32> to vector<128x32xf32>
    %95 = arith.addf %92, %94 : vector<128x32xf32>
    %cst_47 = arith.constant 0.000000e+00 : f32
    %96 = vector.broadcast %cst_47 : f32 to vector<128x32xf32>
    %97 = arith.maximumf %95, %96 : vector<128x32xf32>
    %c480 = arith.constant 480 : index
    %c0_48 = arith.constant 0 : index
    %98 = vector.load %arg2[%c480, %c0_48] : memref<608x128xbf16, #tpu.memory_space<vmem>>, vector<32x32xbf16>
    %99 = arith.truncf %97 : vector<128x32xf32> to vector<128x32xbf16>
    %cst_49 = arith.constant dense<0.000000e+00> : vector<128x32xf32>
    %100 = tpu.matmul %99, %98, %cst_49 {dimension_numbers = #tpu.dot_dimension_numbers<[1], [0], [0], [1], [0, 0, 1, 1], [], []>} : vector<128x32xbf16>, vector<32x32xbf16>, vector<128x32xf32> -> vector<128x32xf32>
    %c11 = arith.constant 11 : index
    %c0_50 = arith.constant 0 : index
    %101 = vector.load %arg3[%c11, %c0_50] : memref<16x128xf32, #tpu.memory_space<vmem>>, vector<1x32xf32>
    %102 = vector.broadcast %101 : vector<1x32xf32> to vector<128x32xf32>
    %103 = arith.addf %100, %102 : vector<128x32xf32>
    %cst_51 = arith.constant 0.000000e+00 : f32
    %104 = vector.broadcast %cst_51 : f32 to vector<128x32xf32>
    %105 = arith.maximumf %103, %104 : vector<128x32xf32>
    %c512 = arith.constant 512 : index
    %c0_52 = arith.constant 0 : index
    %106 = vector.load %arg2[%c512, %c0_52] : memref<608x128xbf16, #tpu.memory_space<vmem>>, vector<32x1xbf16>
    %107 = arith.truncf %105 : vector<128x32xf32> to vector<128x32xbf16>
    %cst_53 = arith.constant dense<0.000000e+00> : vector<128x1xf32>
    %108 = tpu.matmul %107, %106, %cst_53 {dimension_numbers = #tpu.dot_dimension_numbers<[1], [0], [0], [1], [0, 0, 1, 1], [], []>} : vector<128x32xbf16>, vector<32x1xbf16>, vector<128x1xf32> -> vector<128x1xf32>
    %c12 = arith.constant 12 : index
    %c0_54 = arith.constant 0 : index
    %109 = vector.load %arg3[%c12, %c0_54] : memref<16x128xf32, #tpu.memory_space<vmem>>, vector<1x1xf32>
    %110 = vector.broadcast %109 : vector<1x1xf32> to vector<128x1xf32>
    %111 = arith.addf %108, %110 : vector<128x1xf32>
    %112 = arith.negf %111 : vector<128x1xf32>
    %113 = math.exp %112 : vector<128x1xf32>
    %cst_55 = arith.constant 1.000000e+00 : f32
    %114 = vector.broadcast %cst_55 : f32 to vector<128x1xf32>
    %115 = arith.addf %114, %113 : vector<128x1xf32>
    %116 = arith.divf %114, %115 : vector<128x1xf32>
    %117 = vector.broadcast %116 : vector<128x1xf32> to vector<128x32xf32>
    %118 = arith.mulf %60, %117 : vector<128x32xf32>
    %c544 = arith.constant 544 : index
    %c0_56 = arith.constant 0 : index
    %119 = vector.load %arg2[%c544, %c0_56] : memref<608x128xbf16, #tpu.memory_space<vmem>>, vector<32x32xbf16>
    %120 = arith.truncf %118 : vector<128x32xf32> to vector<128x32xbf16>
    %cst_57 = arith.constant dense<0.000000e+00> : vector<128x32xf32>
    %121 = tpu.matmul %120, %119, %cst_57 {dimension_numbers = #tpu.dot_dimension_numbers<[1], [0], [0], [1], [0, 0, 1, 1], [], []>} : vector<128x32xbf16>, vector<32x32xbf16>, vector<128x32xf32> -> vector<128x32xf32>
    %122 = arith.truncf %121 : vector<128x32xf32> to vector<128x32xbf16>
    %cst_58 = arith.constant dense<0.000000e+00> : vector<128x32xf32>
    %123 = tpu.matmul %0, %122, %cst_58 {dimension_numbers = #tpu.dot_dimension_numbers<[1], [0], [0], [1], [0, 0, 1, 1], [], []>} : vector<128x128xbf16>, vector<128x32xbf16>, vector<128x32xf32> -> vector<128x32xf32>
    %c13 = arith.constant 13 : index
    %c0_59 = arith.constant 0 : index
    %124 = vector.load %arg3[%c13, %c0_59] : memref<16x128xf32, #tpu.memory_space<vmem>>, vector<1x32xf32>
    %125 = vector.broadcast %124 : vector<1x32xf32> to vector<128x32xf32>
    %126 = arith.addf %123, %125 : vector<128x32xf32>
    %c576 = arith.constant 576 : index
    %c0_60 = arith.constant 0 : index
    %127 = vector.load %arg2[%c576, %c0_60] : memref<608x128xbf16, #tpu.memory_space<vmem>>, vector<32x8xbf16>
    %128 = arith.truncf %126 : vector<128x32xf32> to vector<128x32xbf16>
    %cst_61 = arith.constant dense<0.000000e+00> : vector<128x8xf32>
    %129 = tpu.matmul %128, %127, %cst_61 {dimension_numbers = #tpu.dot_dimension_numbers<[1], [0], [0], [1], [0, 0, 1, 1], [], []>} : vector<128x32xbf16>, vector<32x8xbf16>, vector<128x8xf32> -> vector<128x8xf32>
    %130 = arith.truncf %129 : vector<128x8xf32> to vector<128x8xbf16>
    %cst_62 = arith.constant dense<0.000000e+00> : vector<128x8xf32>
    %131 = tpu.matmul %0, %130, %cst_62 {dimension_numbers = #tpu.dot_dimension_numbers<[1], [0], [0], [1], [0, 0, 1, 1], [], []>} : vector<128x128xbf16>, vector<128x8xbf16>, vector<128x8xf32> -> vector<128x8xf32>
    %c14 = arith.constant 14 : index
    %c0_63 = arith.constant 0 : index
    %132 = vector.load %arg3[%c14, %c0_63] : memref<16x128xf32, #tpu.memory_space<vmem>>, vector<1x8xf32>
    %133 = vector.broadcast %132 : vector<1x8xf32> to vector<128x8xf32>
    %134 = arith.addf %131, %133 : vector<128x8xf32>
    %135 = arith.mulf %134, %134 : vector<128x8xf32>
    %cst_64 = arith.constant dense<0.000000e+00> : vector<128xf32>
    %136 = vector.multi_reduction <add>, %135, %cst_64 [1] : vector<128x8xf32> to vector<128xf32>
    %137 = vector.shape_cast %136 : vector<128xf32> to vector<128x1xf32>
    %138 = math.sqrt %137 : vector<128x1xf32>
    %cst_65 = arith.constant 9.99999996E-13 : f32
    %139 = vector.broadcast %cst_65 : f32 to vector<128x1xf32>
    %140 = arith.maximumf %138, %139 : vector<128x1xf32>
    %141 = vector.broadcast %140 : vector<128x1xf32> to vector<128x8xf32>
    %142 = arith.divf %134, %141 : vector<128x8xf32>
    %c0_66 = arith.constant 0 : index
    %c0_67 = arith.constant 0 : index
    %143 = vector.load %arg4[%c0_66, %c0_67] : memref<128x8xf32, #tpu.memory_space<vmem>>, vector<128x8xf32>
    tpu.vector_store %arg4[%c0_66, %c0_67], %142 {strides = array<i32>} : memref<128x8xf32, #tpu.memory_space<vmem>>, vector<128x8xf32>,
    return
  }
}

</mosaic_0001>

<bundles_post_ra>
// kernel: tpu_custom_call.1
= control target key start
LH: loop header
LB: loop body
LE: loop exit
PB: predicated region body
PF: predicated region fallthrough
CT: control target
= control target key end

     0   :  { %9 = vsyncpa [#allocation3], 0  ;;  %s4255_s15 = smov [#allocation2]   ;;  %s5329_s0 = inlined_call_operand.vmem [shape: bf16[128,128], index: 0, kind: input, shape index: {}]   ;;  %s5330_s1 = inlined_call_operand.vmem [shape: f32[128,8], index: 1, kind: input, shape index: {}]   ;;  %s5331_s2 = inlined_call_operand.hbm [shape: bf16[608,128], index: 2, kind: input, shape index: {}]   ;;  %s5332_s3 = inlined_call_operand.vmem [shape: f32[16,128], index: 3, kind: input, shape index: {}]   ;;  %s5333_s4 = inlined_call_operand.vmem [shape: f32[128,8], index: 4, kind: output, shape index: {}]  }
   0x1   :  { %s19_s16 = sshll.u32 %s4255_s15, 4  ;;  %s4231_s19 = scalar_lea.hbm %s5331_s2, 4864  ;;  %s20_s16 = int_to_ptr.vmem [resolvable:$true] %s19_s16 }
   0x2   :  { %p4232_p0 = scmp.ne.s32.totalorder %s5331_s2, %s4231_s19  ;;  %p4235_p1 = scmp.lt.u32.totalorder %s4231_s19, %s5331_s2 }
   0x4   :  { %p4237_p2 = pnand %p4235_p1, %p4232_p0 }
   0x6   :  { %4240 = shalt.err (!%p4237_p2)
}
   0x7   :  { %s4241_s24 = scalar_lea.vmem %s20_s16, 4864  ;;  %p4246_p4 = scmp.lt.s32.totalorder %s20_s16, %s20_s16 }
   0x8   :  { %p4242_p3 = scmp.ne.s32.totalorder %s20_s16, %s4241_s24  ;;  %p4247_p5 = scmp.lt.s32.totalorder %s4241_s24, %s4241_s24 }
   0xa   :  { %p4248_p6 = por %p4247_p5, %p4246_p4 }
   0xc   :  { %p4249_p7 = pnand %p4248_p6, %p4242_p3 }
   0xe   :  { %4252 = shalt.err (!%p4249_p7)
}
   0xf   :  { %s4256_s25 = smov 64   ;;  %s4257_s26 = smov 4  }
  0x10   :  { %25 = dma.hbm_to_vmem [thread:$0]  %s5331_s2, 4864, %s20_s16, [#allocation3], %s4256_s25, %s4256_s25, %s4257_s26  }
  0x11   :  { %4253 = dma.done.wait [#allocation3], 4864  }
  0x12   :  { %4254 = vsyncadd [#allocation3], 4294962432  ;;  %v48_v0 = vld [vmem:[%s5330_s1] sm:$0xff]  ;;  %v49_v1 = vld [vmem:[%s5330_s1 + $0x8] sm:$0xff]  ;;  %vm256_vm0 = vcmask 1043456   ;;  %vm231_vm1 = vcmask 64512  }
  0x13   :  { %v50_v2 = vld [vmem:[%s5330_s1 + $0x10] sm:$0xff]  ;;  %v64_v3 = vpack.c.bf16 %v49_v1, %v48_v0  ;;  %v51_v4 = vld [vmem:[%s5330_s1 + $0x18] sm:$0xff]  ;;  %v52_v6 = vld [vmem:[%s5330_s1 + $0x20] sm:$0xff]  ;;  %vm499_vm2 = vcmask 130048   ;;  %vm666_vm3 = vcmask 261120   ;;  %vm849_vm4 = vcmask 523264  }
  0x14   :  { %v65_v5 = vpack.c.bf16 %v51_v4, %v50_v2  ;;  %v53_v7 = vld [vmem:[%s5330_s1 + $0x28] sm:$0xff]  ;;  %v54_v8 = vld [vmem:[%s5330_s1 + $0x30] sm:$0xff]  ;;  %v55_v10 = vld [vmem:[%s5330_s1 + $0x38] sm:$0xff]  ;;  %vm4259_vm5 = vmmov 0  }
  0x15   :  { %3639 = vmatprep.subr.bf16.mxu0 %v64_v3  ;;  %v66_v9 = vpack.c.bf16 %v53_v7, %v52_v6  ;;  %v4325_v11 = vld [vmem:[%s5329_s0] sm:$0xff]   ;;  %v67_v12 = vpack.c.bf16 %v55_v10, %v54_v8  ;;  %v57_v14 = vld [vmem:[%s5330_s1 + $0x48] sm:$0xff]  ;;  %v58_v15 = vld [vmem:[%s5330_s1 + $0x50] sm:$0xff] }
  0x16   :  { %3640 = vmatpush3.bf16.msra.mxu0 %v64_v3  ;;  %3655 = vmatprep.mubr.bf16.mxu0 %v4325_v11  ;;  %v56_v13 = vld [vmem:[%s5330_s1 + $0x40] sm:$0xff]  ;;  %v59_v17 = vld [vmem:[%s5330_s1 + $0x58] sm:$0xff]  ;;  %v61_v19 = vld [vmem:[%s5330_s1 + $0x68] sm:$0xff] }
  0x17   :  { %3641 = vmatprep.subr.bf16.mxu0 %v65_v5  ;;  %v68_v16 = vpack.c.bf16 %v57_v14, %v56_v13  ;;  %v60_v18 = vld [vmem:[%s5330_s1 + $0x60] sm:$0xff]  ;;  %v69_v20 = vpack.c.bf16 %v59_v17, %v58_v15  ;;  %v62_v21 = vld [vmem:[%s5330_s1 + $0x70] sm:$0xff]  ;;  %v63_v22 = vld [vmem:[%s5330_s1 + $0x78] sm:$0xff] }
  0x18   :  { %v70_v23 = vpack.c.bf16 %v61_v19, %v60_v18  ;;  %v71_v24 = vpack.c.bf16 %v63_v22, %v62_v21  ;;  %v4355_v25 = vld [vmem:[%s5329_s0 + $0x8] sm:$0xff]   ;;  %v4360_v26 = vld [vmem:[%s5329_s0 + $0x10] sm:$0xff]   ;;  %v4367_v27 = vld [vmem:[%s5329_s0 + $0x18] sm:$0xff]  }
  0x19   :  { %v4372_v28 = vld [vmem:[%s5329_s0 + $0x20] sm:$0xff]   ;;  %v4379_v29 = vld [vmem:[%s5329_s0 + $0x28] sm:$0xff]   ;;  %v4384_v30 = vld [vmem:[%s5329_s0 + $0x30] sm:$0xff]  }
  0x1a   :  { %3642 = vmatpush3.bf16.msra.mxu0 %v65_v5  ;;  %v4391_v31 = vld [vmem:[%s5329_s0 + $0x38] sm:$0xff]   ;;  %v217_v32 = vld [vmem:[#allocation2] sm:$0xf]  ;;  %v4403_v58 = vld [vmem:[#allocation2 + $0x8] sm:$0xff]  }
  0x1b   :  { %3643 = vmatprep.subr.bf16.mxu0 %v66_v9  ;;  %4041 = vmatprep.subr.msk.bf16.mxu1 %vm256_vm0, %v217_v32  ;;  %v258_v33 = vsel %vm256_vm0, %v217_v32, 0  ;;  %v3284_v59 = vld [vmem:[%s5332_s3] ss:$0 sm:$0xff] }
  0x1c   :  { %3672 = vmatpush3.bf16.msra.mxu1 %v258_v33 }
  0x1e   :  { %3644 = vmatpush3.bf16.msra.mxu0 %v66_v9 }
  0x1f   :  { %3645 = vmatprep.subr.bf16.mxu0 %v67_v12 }
  0x22   :  { %3646 = vmatpush3.bf16.msra.mxu0 %v67_v12 }
  0x23   :  { %3647 = vmatprep.subr.bf16.mxu0 %v68_v16 }
  0x26   :  { %3648 = vmatpush3.bf16.msra.mxu0 %v68_v16 }
  0x27   :  { %3649 = vmatprep.subr.bf16.mxu0 %v69_v20 }
  0x2a   :  { %3650 = vmatpush3.bf16.msra.mxu0 %v69_v20 }
  0x2b   :  { %3651 = vmatprep.subr.bf16.mxu0 %v70_v23 }
  0x2e   :  { %3652 = vmatpush3.bf16.msra.mxu0 %v70_v23 }
  0x2f   :  { %3653 = vmatprep.subr.bf16.mxu0 %v71_v24 }
  0x32   :  { %3654 = vmatpush3.bf16.msra.mxu0 %v71_v24 }
  0x33   :  { %3721 = vmatprep.subr.bf16.mxu0 %v4403_v58 }
  0x35   :  { %3656 = vmatmul.mubr.bf16.vlgmr.msra.gmra.mrb[0].mxu0 %v4355_v25 }
  0x36   :  { %3659 = vmatprep.mubr.bf16.mxu0 %v4360_v26  ;;  %3722 = vmatpush3.bf16.msra.mxu0 %v4403_v58 }
  0x3d   :  { %3660 = vmatmul.mubr.bf16.gmra.mrb[4].mxu0 %v4367_v27 }
  0x3e   :  { %3663 = vmatprep.mubr.bf16.mxu0 %v4372_v28 }
  0x45   :  { %3664 = vmatmul.mubr.bf16.gmra.mrb[8].mxu0 %v4379_v29 }
  0x46   :  { %3667 = vmatprep.mubr.bf16.mxu0 %v4384_v30 }
  0x4d   :  { %3668 = vmatmul.mubr.bf16.gmra.mrb[12].mxu0 %v4391_v31 }
 0x108   :  { %v3657_v34 = vpop.f32.mrb[0].mxu0 }
 0x109   :  { %v154_v35 = vpop.f32.mrb[1].mxu0 }
 0x10a   :  { %v3658_v36 = vpop.f32.mrb[2].mxu0 }
 0x10b   :  { %v219_v37 = vpack.c.bf16 %v3658_v36, %v3657_v34  ;;  %v157_v38 = vpop.f32.mrb[3].mxu0 }
 0x10c   :  { %v218_v39 = vpack.c.bf16 %v157_v38, %v154_v35 }
 0x10e   :  { %3673 = vmatprep.mubr.msk.bf16.mxu1 %vm231_vm1, %v218_v39 }
 0x10f   :  { %3674 = vmatmul.mubr.msk.bf16.vlgmr.msra.gmra.mrb[0].mxu1 %vm231_vm1, %v219_v37 }
 0x110   :  { %v3661_v40 = vpop.f32.mrb[4].mxu0 }
 0x111   :  { %v170_v41 = vpop.f32.mrb[5].mxu0 }
 0x112   :  { %v3662_v42 = vpop.f32.mrb[6].mxu0 }
 0x113   :  { %v221_v43 = vpack.c.bf16 %v3662_v42, %v3661_v40  ;;  %v173_v44 = vpop.f32.mrb[7].mxu0 }
 0x114   :  { %v220_v45 = vpack.c.bf16 %v173_v44, %v170_v41 }
 0x116   :  { %3677 = vmatprep.mubr.msk.bf16.mxu1 %vm231_vm1, %v220_v45 }
 0x117   :  { %3678 = vmatmul.mubr.msk.bf16.gmra.mrb[4].mxu1 %vm231_vm1, %v221_v43 }
 0x118   :  { %v3665_v46 = vpop.f32.mrb[8].mxu0 }
 0x119   :  { %v186_v47 = vpop.f32.mrb[9].mxu0 }
 0x11a   :  { %v3666_v48 = vpop.f32.mrb[10].mxu0 }
 0x11b   :  { %v223_v49 = vpack.c.bf16 %v3666_v48, %v3665_v46  ;;  %v189_v50 = vpop.f32.mrb[11].mxu0 }
 0x11c   :  { %v222_v51 = vpack.c.bf16 %v189_v50, %v186_v47 }
 0x11e   :  { %3681 = vmatprep.mubr.msk.bf16.mxu1 %vm231_vm1, %v222_v51 }
 0x11f   :  { %3682 = vmatmul.mubr.msk.bf16.gmra.mrb[8].mxu1 %vm231_vm1, %v223_v49 }
 0x120   :  { %v3669_v52 = vpop.f32.mrb[12].mxu0 }
 0x121   :  { %v202_v53 = vpop.f32.mrb[13].mxu0 }
 0x122   :  { %v3670_v54 = vpop.f32.mrb[14].mxu0 }
 0x123   :  { %v225_v55 = vpack.c.bf16 %v3670_v54, %v3669_v52  ;;  %v205_v56 = vpop.f32.mrb[15].mxu0 }
 0x124   :  { %v224_v57 = vpack.c.bf16 %v205_v56, %v202_v53 }
 0x126   :  { %3685 = vmatprep.mubr.msk.bf16.mxu1 %vm231_vm1, %v224_v57 }
 0x127   :  { %3686 = vmatmul.mubr.msk.bf16.gmra.mrb[12].mxu1 %vm231_vm1, %v225_v55 }
 0x128   :  { %3705 = vmatprep.mubr.bf16.mxu1 %v4325_v11 }
 0x1e2   :  { %v3675_v60 = vpop.f32.mrb[0].mxu1 }
 0x1e3   :  { %v303_v61 = vadd.f32 %v3675_v60, %v3284_v59  ;;  %v294_v62 = vpop.f32.mrb[1].mxu1 }
 0x1e4   :  { %v295_v63 = vadd.f32 %v3284_v59, %v294_v62  ;;  %v3676_v0 = vpop.f32.mrb[2].mxu1 }
 0x1e5   :  { %v306_v1 = vadd.f32 %v3676_v0, %v3284_v59  ;;  %v297_v2 = vpop.f32.mrb[3].mxu1  ;;  %v359_v4 = vmax.f32 %v303_v61, 0.0 }
 0x1e6   :  { %v298_v3 = vadd.f32 %v3284_v59, %v297_v2  ;;  %v357_v6 = vmax.f32 %v295_v63, 0.0 }
 0x1e7   :  { %v360_v5 = vmax.f32 %v306_v1, 0.0 }
 0x1e8   :  { %v358_v7 = vmax.f32 %v298_v3, 0.0 }
 0x1e9   :  { %v374_v8 = vpack.c.bf16 %v360_v5, %v359_v4 }
 0x1ea   :  { %v373_v9 = vpack.c.bf16 %v358_v7, %v357_v6  ;;  %v3679_v10 = vpop.f32.mrb[4].mxu1 }
 0x1eb   :  { %v319_v11 = vadd.f32 %v3679_v10, %v3284_v59  ;;  %v310_v12 = vpop.f32.mrb[5].mxu1 }
 0x1ec   :  { %v311_v13 = vadd.f32 %v3284_v59, %v310_v12  ;;  %v3680_v14 = vpop.f32.mrb[6].mxu1  ;;  %3689 = vmatprep.subr.bf16.mxu1 %v373_v9  ;;  %v4059_v12 = vld [vmem:[#allocation2 + $0x10] sm:$0xff]  }
 0x1ed   :  { %v322_v15 = vadd.f32 %v3680_v14, %v3284_v59  ;;  %v313_v16 = vpop.f32.mrb[7].mxu1  ;;  %3690 = vmatpush3.bf16.msra.mxu1 %v373_v9  ;;  %v363_v18 = vmax.f32 %v319_v11, 0.0  ;;  %v4061_v14 = vld [vmem:[#allocation2 + $0x20] sm:$0xff]  }
 0x1ee   :  { %v314_v17 = vadd.f32 %v3284_v59, %v313_v16  ;;  %3691 = vmatprep.subr.bf16.mxu1 %v374_v8  ;;  %v361_v20 = vmax.f32 %v311_v13, 0.0  ;;  %v4060_v13 = vld [vmem:[#allocation2 + $0x18] sm:$0xff]   ;;  %3759 = vmatprep.subr.bf16.mxu0 %v4061_v14  ;;  %v4063_v16 = vld [vmem:[#allocation2 + $0x30] sm:$0xff]  }
 0x1ef   :  { %v364_v19 = vmax.f32 %v322_v15, 0.0  ;;  %v4062_v15 = vld [vmem:[#allocation2 + $0x28] sm:$0xff]  }
 0x1f0   :  { %v362_v21 = vmax.f32 %v314_v17, 0.0  ;;  %v3293_v17 = vld [vmem:[%s5332_s3 + $0x1] ss:$0 sm:$0xff] }
 0x1f1   :  { %v376_v22 = vpack.c.bf16 %v364_v19, %v363_v18  ;;  %3692 = vmatpush3.bf16.msra.mxu1 %v374_v8 }
 0x1f2   :  { %v375_v23 = vpack.c.bf16 %v362_v21, %v361_v20  ;;  %v3683_v24 = vpop.f32.mrb[8].mxu1 }
 0x1f3   :  { %v335_v32 = vadd.f32 %v3683_v24, %v3284_v59  ;;  %v326_v33 = vpop.f32.mrb[9].mxu1 }
 0x1f4   :  { %v327_v34 = vadd.f32 %v3284_v59, %v326_v33  ;;  %v3684_v35 = vpop.f32.mrb[10].mxu1  ;;  %3693 = vmatprep.subr.bf16.mxu1 %v375_v23 }
 0x1f5   :  { %v338_v36 = vadd.f32 %v3684_v35, %v3284_v59  ;;  %v329_v37 = vpop.f32.mrb[11].mxu1  ;;  %3694 = vmatpush3.bf16.msra.mxu1 %v375_v23  ;;  %v367_v39 = vmax.f32 %v335_v32, 0.0 }
 0x1f6   :  { %v330_v38 = vadd.f32 %v3284_v59, %v329_v37  ;;  %3695 = vmatprep.subr.bf16.mxu1 %v376_v22  ;;  %v365_v41 = vmax.f32 %v327_v34, 0.0 }
 0x1f7   :  { %v368_v40 = vmax.f32 %v338_v36, 0.0 }
 0x1f8   :  { %v366_v42 = vmax.f32 %v330_v38, 0.0 }
 0x1f9   :  { %v378_v43 = vpack.c.bf16 %v368_v40, %v367_v39  ;;  %3696 = vmatpush3.bf16.msra.mxu1 %v376_v22 }
 0x1fa   :  { %v377_v44 = vpack.c.bf16 %v366_v42, %v365_v41  ;;  %v3687_v45 = vpop.f32.mrb[12].mxu1 }
 0x1fb   :  { %v351_v46 = vadd.f32 %v3687_v45, %v3284_v59  ;;  %v342_v47 = vpop.f32.mrb[13].mxu1 }
 0x1fc   :  { %v343_v48 = vadd.f32 %v3284_v59, %v342_v47  ;;  %v3688_v49 = vpop.f32.mrb[14].mxu1  ;;  %3697 = vmatprep.subr.bf16.mxu1 %v377_v44 }
 0x1fd   :  { %v354_v50 = vadd.f32 %v3688_v49, %v3284_v59  ;;  %v345_v51 = vpop.f32.mrb[15].mxu1  ;;  %3698 = vmatpush3.bf16.msra.mxu1 %v377_v44  ;;  %v371_v53 = vmax.f32 %v351_v46, 0.0 }
 0x1fe   :  { %v346_v52 = vadd.f32 %v3284_v59, %v345_v51  ;;  %3699 = vmatprep.subr.bf16.mxu1 %v378_v43  ;;  %v369_v55 = vmax.f32 %v343_v48, 0.0 }
 0x1ff   :  { %v372_v54 = vmax.f32 %v354_v50, 0.0 }
 0x200   :  { %v370_v56 = vmax.f32 %v346_v52, 0.0 }
 0x201   :  { %v380_v57 = vpack.c.bf16 %v372_v54, %v371_v53  ;;  %3700 = vmatpush3.bf16.msra.mxu1 %v378_v43 }
 0x202   :  { %v379_v60 = vpack.c.bf16 %v370_v56, %v369_v55 }
 0x204   :  { %3701 = vmatprep.subr.bf16.mxu1 %v379_v60 }
 0x205   :  { %3702 = vmatpush3.bf16.msra.mxu1 %v379_v60 }
 0x206   :  { %3703 = vmatprep.subr.bf16.mxu1 %v380_v57 }
 0x209   :  { %3704 = vmatpush3.bf16.msra.mxu1 %v380_v57 }
 0x20a   :  { %4039 = vmatprep.subr.bf16.mxu1 %v4403_v58 }
 0x20c   :  { %3706 = vmatmul.mubr.bf16.vlgmr.msra.gmra.mrb[16].mxu1 %v4355_v25 }
 0x20d   :  { %3709 = vmatprep.mubr.bf16.mxu1 %v4360_v26  ;;  %4040 = vmatpush3.bf16.msra.mxu1 %v4403_v58 }
 0x20e   :  { %3739 = vmatprep.subr.bf16.mxu1 %v4059_v12 }
 0x214   :  { %3710 = vmatmul.mubr.bf16.gmra.mrb[20].mxu1 %v4367_v27 }
 0x215   :  { %3713 = vmatprep.mubr.bf16.mxu1 %v4372_v28 }
 0x21c   :  { %3714 = vmatmul.mubr.bf16.gmra.mrb[24].mxu1 %v4379_v29 }
 0x21d   :  { %3717 = vmatprep.mubr.bf16.mxu1 %v4384_v30 }
 0x224   :  { %3718 = vmatmul.mubr.bf16.gmra.mrb[28].mxu1 %v4391_v31 }
 0x2df   :  { %v3707_v59 = vpop.f32.mrb[16].mxu1 }
 0x2e0   :  { %v415_v61 = vpop.f32.mrb[17].mxu1 }
 0x2e1   :  { %v3708_v62 = vpop.f32.mrb[18].mxu1 }
 0x2e2   :  { %v481_v63 = vpack.c.bf16 %v3708_v62, %v3707_v59  ;;  %v418_v0 = vpop.f32.mrb[19].mxu1 }
 0x2e3   :  { %v480_v25 = vpack.c.bf16 %v418_v0, %v415_v61 }
 0x2e5   :  { %3723 = vmatprep.mubr.msk.bf16.mxu0 %vm499_vm2, %v480_v25 }
 0x2e6   :  { %3724 = vmatmul.mubr.msk.bf16.vlgmr.msra.gmra.mrb[16].mxu0 %vm499_vm2, %v481_v63 }
 0x2e7   :  { %v3711_v26 = vpop.f32.mrb[20].mxu1  ;;  %3760 = vmatpush3.bf16.msra.mxu0 %v4061_v14 }
 0x2e8   :  { %v431_v27 = vpop.f32.mrb[21].mxu1  ;;  %3761 = vmatprep.subr.bf16.mxu0 %v4062_v15 }
 0x2e9   :  { %v3712_v28 = vpop.f32.mrb[22].mxu1 }
 0x2ea   :  { %v483_v58 = vpack.c.bf16 %v3712_v28, %v3711_v26  ;;  %v434_v29 = vpop.f32.mrb[23].mxu1 }
 0x2eb   :  { %v482_v1 = vpack.c.bf16 %v434_v29, %v431_v27  ;;  %3762 = vmatpush3.bf16.msra.mxu0 %v4062_v15 }
 0x2ec   :  { %3763 = vmatprep.subr.bf16.mxu0 %v4063_v16 }
 0x2ed   :  { %3727 = vmatprep.mubr.msk.bf16.mxu0 %vm499_vm2, %v482_v1 }
 0x2ee   :  { %3728 = vmatmul.mubr.msk.bf16.gmra.mrb[20].mxu0 %vm499_vm2, %v483_v58 }
 0x2ef   :  { %v3715_v30 = vpop.f32.mrb[24].mxu1  ;;  %3764 = vmatpush3.bf16.msra.mxu0 %v4063_v16 }
 0x2f0   :  { %v447_v31 = vpop.f32.mrb[25].mxu1 }
 0x2f1   :  { %v3716_v2 = vpop.f32.mrb[26].mxu1 }
 0x2f2   :  { %v485_v3 = vpack.c.bf16 %v3716_v2, %v3715_v30  ;;  %v450_v4 = vpop.f32.mrb[27].mxu1 }
 0x2f3   :  { %v484_v5 = vpack.c.bf16 %v450_v4, %v447_v31 }
 0x2f5   :  { %3731 = vmatprep.mubr.msk.bf16.mxu0 %vm499_vm2, %v484_v5 }
 0x2f6   :  { %3732 = vmatmul.mubr.msk.bf16.gmra.mrb[24].mxu0 %vm499_vm2, %v485_v3 }
 0x2f7   :  { %v3719_v6 = vpop.f32.mrb[28].mxu1 }
 0x2f8   :  { %v463_v7 = vpop.f32.mrb[29].mxu1 }
 0x2f9   :  { %v3720_v8 = vpop.f32.mrb[30].mxu1 }
 0x2fa   :  { %v487_v9 = vpack.c.bf16 %v3720_v8, %v3719_v6  ;;  %v466_v10 = vpop.f32.mrb[31].mxu1 }
 0x2fb   :  { %v486_v11 = vpack.c.bf16 %v466_v10, %v463_v7  ;;  %v4064_v10 = vld [vmem:[#allocation2 + $0x38] sm:$0xff]  }
 0x2fc   :  { %3765 = vmatprep.subr.bf16.mxu0 %v4064_v10 }
 0x2fd   :  { %3735 = vmatprep.mubr.msk.bf16.mxu1 %vm499_vm2, %v486_v11  ;;  %3766 = vmatpush3.bf16.msra.mxu0 %v4064_v10  ;;  %v3303_v11 = vld [vmem:[%s5332_s3 + $0x2] ss:$0 sm:$0xff] }
 0x2fe   :  { %3736 = vmatmul.mubr.msk.bf16.vlgmr.msra.gmra.mrb[32].mxu1 %vm499_vm2, %v487_v9 }
 0x2ff   :  { %3740 = vmatpush3.bf16.msra.mxu1 %v4059_v12 }
 0x300   :  { %3741 = vmatprep.subr.bf16.mxu1 %v4060_v13 }
 0x303   :  { %3742 = vmatpush3.bf16.msra.mxu1 %v4060_v13 }
 0x3b9   :  { %v3725_v18 = vpop.f32.mrb[16].mxu0 }
 0x3ba   :  { %v558_v19 = vpop.f32.mrb[17].mxu0  ;;  %v4432_v22 = vadd.f32 %v3725_v18, %v3293_v17 }
 0x3bb   :  { %v4430_v20 = vadd.f32 %v3293_v17, %v558_v19  ;;  %v3726_v21 = vpop.f32.mrb[18].mxu0 }
 0x3bc   :  { %v4434_v23 = vadd.f32 %v3726_v21, %v3293_v17  ;;  %v561_v24 = vpop.f32.mrb[19].mxu0  ;;  %v623_v36 = vmax.f32 %v4432_v22, 0.0 }
 0x3bd   :  { %v4436_v32 = vadd.f32 %v3293_v17, %v561_v24  ;;  %v621_v34 = vmax.f32 %v4430_v20, 0.0 }
 0x3be   :  { %v624_v33 = vmax.f32 %v4434_v23, 0.0 }
 0x3bf   :  { %v622_v35 = vmax.f32 %v4436_v32, 0.0 }
 0x3c0   :  { %v4452_v39 = vpack.c.bf16 %v624_v33, %v623_v36 }
 0x3c1   :  { %v4446_v37 = vpack.c.bf16 %v622_v35, %v621_v34  ;;  %v3729_v38 = vpop.f32.mrb[20].mxu0 }
 0x3c2   :  { %v574_v40 = vpop.f32.mrb[21].mxu0  ;;  %v4458_v43 = vadd.f32 %v3729_v38, %v3293_v17 }
 0x3c3   :  { %v4454_v41 = vadd.f32 %v3293_v17, %v574_v40  ;;  %v3730_v42 = vpop.f32.mrb[22].mxu0  ;;  %3743 = vmatprep.mubr.msk.bf16.mxu1 %vm666_vm3, %v4446_v37 }
 0x3c4   :  { %v4460_v44 = vadd.f32 %v3730_v42, %v3293_v17  ;;  %v577_v45 = vpop.f32.mrb[23].mxu0  ;;  %3744 = vmatmul.mubr.msk.bf16.vlgmr.msra.gmra.mrb[36].mxu1 %vm666_vm3, %v4452_v39  ;;  %v627_v50 = vmax.f32 %v4458_v43, 0.0 }
 0x3c5   :  { %v4464_v46 = vadd.f32 %v3293_v17, %v577_v45  ;;  %v625_v48 = vmax.f32 %v4454_v41, 0.0 }
 0x3c6   :  { %v628_v47 = vmax.f32 %v4460_v44, 0.0 }
 0x3c7   :  { %v626_v49 = vmax.f32 %v4464_v46, 0.0 }
 0x3c8   :  { %v4480_v53 = vpack.c.bf16 %v628_v47, %v627_v50 }
 0x3c9   :  { %v4474_v51 = vpack.c.bf16 %v626_v49, %v625_v48  ;;  %v3733_v52 = vpop.f32.mrb[24].mxu0 }
 0x3ca   :  { %v590_v54 = vpop.f32.mrb[25].mxu0  ;;  %v4486_v57 = vadd.f32 %v3733_v52, %v3293_v17 }
 0x3cb   :  { %v4482_v55 = vadd.f32 %v3293_v17, %v590_v54  ;;  %v3734_v56 = vpop.f32.mrb[26].mxu0  ;;  %3747 = vmatprep.mubr.msk.bf16.mxu1 %vm666_vm3, %v4474_v51 }
 0x3cc   :  { %v4488_v60 = vadd.f32 %v3734_v56, %v3293_v17  ;;  %v593_v59 = vpop.f32.mrb[27].mxu0  ;;  %3748 = vmatmul.mubr.msk.bf16.gmra.mrb[40].mxu1 %vm666_vm3, %v4480_v53  ;;  %v5338_v25 = vmax.f32 %v4486_v57, 0.0 }
 0x3cd   :  { %v4492_v61 = vadd.f32 %v3293_v17, %v593_v59  ;;  %v629_v63 = vmax.f32 %v4482_v55, 0.0 }
 0x3ce   :  { %v632_v62 = vmax.f32 %v4488_v60, 0.0 }
 0x3cf   :  { %v5339_v0 = vmax.f32 %v4492_v61, 0.0 }
 0x3d0   :  { %v4508_v28 = vpack.c.bf16 %v632_v62, %v5338_v25 }
 0x3d1   :  { %v4502_v26 = vpack.c.bf16 %v5339_v0, %v629_v63  ;;  %v3737_v27 = vpop.f32.mrb[32].mxu1 }
 0x3d2   :  { %v606_v58 = vpop.f32.mrb[33].mxu1  ;;  %v4514_v30 = vadd.f32 %v3737_v27, %v3293_v17 }
 0x3d3   :  { %v4510_v29 = vadd.f32 %v3293_v17, %v606_v58  ;;  %v3738_v1 = vpop.f32.mrb[34].mxu1  ;;  %3751 = vmatprep.mubr.msk.bf16.mxu1 %vm666_vm3, %v4502_v26 }
 0x3d4   :  { %v4516_v31 = vadd.f32 %v3738_v1, %v3293_v17  ;;  %v609_v2 = vpop.f32.mrb[35].mxu1  ;;  %3752 = vmatmul.mubr.msk.bf16.gmra.mrb[44].mxu1 %vm666_vm3, %v4508_v28  ;;  %v5334_v7 = vmax.f32 %v4514_v30, 0.0 }
 0x3d5   :  { %v4520_v3 = vadd.f32 %v3293_v17, %v609_v2  ;;  %v5336_v5 = vmax.f32 %v4510_v29, 0.0 }
 0x3d6   :  { %v5337_v4 = vmax.f32 %v4516_v31, 0.0 }
 0x3d7   :  { %v5335_v6 = vmax.f32 %v4520_v3, 0.0 }
 0x3d8   :  { %v4536_v9 = vpack.c.bf16 %v5337_v4, %v5334_v7 }
 0x3d9   :  { %v4530_v8 = vpack.c.bf16 %v5335_v6, %v5336_v5 }
 0x3db   :  { %3755 = vmatprep.mubr.msk.bf16.mxu1 %vm666_vm3, %v4530_v8 }
 0x3dc   :  { %3756 = vmatmul.mubr.msk.bf16.gmra.mrb[48].mxu1 %vm666_vm3, %v4536_v9 }
 0x497   :  { %v3745_v12 = vpop.f32.mrb[36].mxu1 }
 0x498   :  { %v734_v13 = vadd.f32 %v3745_v12, %v3303_v11  ;;  %v725_v14 = vpop.f32.mrb[37].mxu1 }
 0x499   :  { %v726_v15 = vadd.f32 %v3303_v11, %v725_v14  ;;  %v3746_v16 = vpop.f32.mrb[38].mxu1 }
 0x49a   :  { %v737_v17 = vadd.f32 %v3746_v16, %v3303_v11  ;;  %v728_v18 = vpop.f32.mrb[39].mxu1  ;;  %v790_v21 = vmax.f32 %v734_v13, 0.0 }
 0x49b   :  { %v729_v19 = vadd.f32 %v3303_v11, %v728_v18  ;;  %v788_v38 = vmax.f32 %v726_v15, 0.0 }
 0x49c   :  { %v791_v24 = vmax.f32 %v737_v17, 0.0 }
 0x49d   :  { %v789_v40 = vmax.f32 %v729_v19, 0.0 }
 0x49e   :  { %v813_v42 = vpack.c.bf16 %v791_v24, %v790_v21 }
 0x49f   :  { %v812_v45 = vpack.c.bf16 %v789_v40, %v788_v38  ;;  %v3749_v52 = vpop.f32.mrb[40].mxu1 }
 0x4a0   :  { %v750_v54 = vadd.f32 %v3749_v52, %v3303_v11  ;;  %v741_v56 = vpop.f32.mrb[41].mxu1 }
 0x4a1   :  { %v742_v59 = vadd.f32 %v3303_v11, %v741_v56  ;;  %v3750_v27 = vpop.f32.mrb[42].mxu1  ;;  %3767 = vmatprep.mubr.msk.bf16.mxu0 %vm849_vm4, %v812_v45 }
 0x4a2   :  { %v753_v58 = vadd.f32 %v3750_v27, %v3303_v11  ;;  %v744_v1 = vpop.f32.mrb[43].mxu1  ;;  %3768 = vmatmul.mubr.msk.bf16.vlgmr.msra.gmra.mrb[28].mxu0 %vm849_vm4, %v813_v42  ;;  %v794_v10 = vmax.f32 %v750_v54, 0.0 }
 0x4a3   :  { %v745_v2 = vadd.f32 %v3303_v11, %v744_v1  ;;  %v792_v13 = vmax.f32 %v742_v59, 0.0 }
 0x4a4   :  { %v795_v12 = vmax.f32 %v753_v58, 0.0 }
 0x4a5   :  { %v793_v14 = vmax.f32 %v745_v2, 0.0 }
 0x4a6   :  { %v815_v15 = vpack.c.bf16 %v795_v12, %v794_v10 }
 0x4a7   :  { %v814_v16 = vpack.c.bf16 %v793_v14, %v792_v13  ;;  %v3753_v17 = vpop.f32.mrb[44].mxu1 }
 0x4a8   :  { %v766_v18 = vadd.f32 %v3753_v17, %v3303_v11  ;;  %v757_v19 = vpop.f32.mrb[45].mxu1 }
 0x4a9   :  { %v758_v21 = vadd.f32 %v3303_v11, %v757_v19  ;;  %v3754_v24 = vpop.f32.mrb[46].mxu1  ;;  %3771 = vmatprep.mubr.msk.bf16.mxu0 %vm849_vm4, %v814_v16 }
 0x4aa   :  { %v769_v38 = vadd.f32 %v3754_v24, %v3303_v11  ;;  %v760_v40 = vpop.f32.mrb[47].mxu1  ;;  %3772 = vmatmul.mubr.msk.bf16.gmra.mrb[32].mxu0 %vm849_vm4, %v815_v15  ;;  %v798_v42 = vmax.f32 %v766_v18, 0.0 }
 0x4ab   :  { %v761_v45 = vadd.f32 %v3303_v11, %v760_v40  ;;  %v796_v54 = vmax.f32 %v758_v21, 0.0  ;;  %v4258_v40 = vmov 0.0  }
 0x4ac   :  { %v799_v52 = vmax.f32 %v769_v38, 0.0  ;;  %v4065_v38 = vld [vmem:[#allocation2 + $0x50] sm:$0xff]   ;;  %3783 = vmatprep.subr.bf16.mxu1 %v4258_v40  ;;  %3799 = vmatprep.mubr.msk.bf16.mxu1 %vm4259_vm5, %v4258_v40 }
 0x4ad   :  { %v797_v56 = vmax.f32 %v761_v45, 0.0  ;;  %3784 = vmatpush3.bf16.msra.mxu1 %v4065_v38  ;;  %v4066_v45 = vld [vmem:[#allocation2 + $0x58] sm:$0xff]  }
 0x4ae   :  { %v817_v59 = vpack.c.bf16 %v799_v52, %v798_v42  ;;  %3785 = vmatprep.subr.bf16.mxu1 %v4258_v40  ;;  %v4067_v42 = vld [vmem:[#allocation2 + $0x60] sm:$0xff]   ;;  %v4069_v52 = vld [vmem:[#allocation2 + $0x70] sm:$0xff]  }
 0x4af   :  { %v816_v27 = vpack.c.bf16 %v797_v56, %v796_v54  ;;  %v3757_v58 = vpop.f32.mrb[48].mxu1  ;;  %v4070_v54 = vld [vmem:[#allocation2 + $0x78] sm:$0xff]   ;;  %v4071_v56 = vld [vmem:[#allocation2 + $0x80] sm:$0xff]  }
 0x4b0   :  { %v782_v1 = vadd.f32 %v3757_v58, %v3303_v11  ;;  %v773_v2 = vpop.f32.mrb[49].mxu1  ;;  %v4075_v58 = vld [vmem:[#allocation2 + $0x90] sm:$0xff]  }
 0x4b1   :  { %v774_v10 = vadd.f32 %v3303_v11, %v773_v2  ;;  %v3758_v12 = vpop.f32.mrb[50].mxu1  ;;  %3775 = vmatprep.mubr.msk.bf16.mxu0 %vm849_vm4, %v816_v27  ;;  %3786 = vmatpush3.bf16.msra.mxu1 %v4066_v45  ;;  %v4553_v27 = vld [vmem:[#allocation2 + $0x40] sm:$0xff]  }
 0x4b2   :  { %v785_v13 = vadd.f32 %v3758_v12, %v3303_v11  ;;  %v776_v14 = vpop.f32.mrb[51].mxu1  ;;  %3776 = vmatmul.mubr.msk.bf16.gmra.mrb[36].mxu0 %vm849_vm4, %v817_v59  ;;  %v802_v15 = vmax.f32 %v782_v1, 0.0  ;;  %3787 = vmatprep.subr.bf16.mxu1 %v4258_v40  ;;  %v4072_v59 = vld [vmem:[#allocation2 + $0x88] sm:$0xff]   ;;  %v4076_v1 = vld [vmem:[#allocation2 + $0x98] sm:$0xff]   ;;  %v4077_v2 = vld [vmem:[#allocation2 + $0xa0] sm:$0xff]  }
 0x4b3   :  { %v777_v16 = vadd.f32 %v3303_v11, %v776_v14  ;;  %v800_v18 = vmax.f32 %v774_v10, 0.0  ;;  %v4068_v11 = vld [vmem:[#allocation2 + $0x68] sm:$0xff]   ;;  %3823 = vmatprep.subr.bf16.mxu0 %v4075_v58 }
 0x4b4   :  { %v803_v17 = vmax.f32 %v785_v13, 0.0  ;;  %3824 = vmatpush3.bf16.msra.mxu0 %v4075_v58 }
 0x4b5   :  { %v801_v19 = vmax.f32 %v777_v16, 0.0  ;;  %3788 = vmatpush3.bf16.msra.mxu1 %v4067_v42  ;;  %3825 = vmatprep.subr.bf16.mxu0 %v4076_v1  ;;  %v3314_v16 = vld [vmem:[%s5332_s3 + $0x3] ss:$0 sm:$0xff] }
 0x4b6   :  { %v819_v21 = vpack.c.bf16 %v803_v17, %v802_v15  ;;  %3789 = vmatprep.subr.bf16.mxu1 %v4258_v40 }
 0x4b7   :  { %v818_v24 = vpack.c.bf16 %v801_v19, %v800_v18 }
 0x4b8   :  { %3826 = vmatpush3.bf16.msra.mxu0 %v4076_v1 }
 0x4b9   :  { %3779 = vmatprep.mubr.msk.bf16.mxu0 %vm849_vm4, %v818_v24  ;;  %3790 = vmatpush3.bf16.msra.mxu1 %v4068_v11 }
 0x4ba   :  { %3780 = vmatmul.mubr.msk.bf16.gmra.mrb[40].mxu0 %vm849_vm4, %v819_v21  ;;  %3791 = vmatprep.subr.bf16.mxu1 %v4258_v40 }
 0x4bb   :  { %3827 = vmatprep.subr.bf16.mxu0 %v4077_v2 }
 0x4bc   :  { %3828 = vmatpush3.bf16.msra.mxu0 %v4077_v2 }
 0x4bd   :  { %3792 = vmatpush3.bf16.msra.mxu1 %v4069_v52 }
 0x4be   :  { %3793 = vmatprep.subr.bf16.mxu1 %v4258_v40 }
 0x4c1   :  { %3794 = vmatpush3.bf16.msra.mxu1 %v4070_v54 }
 0x4c2   :  { %3795 = vmatprep.subr.bf16.mxu1 %v4258_v40 }
 0x4c5   :  { %3796 = vmatpush3.bf16.msra.mxu1 %v4071_v56 }
 0x4c6   :  { %3797 = vmatprep.subr.bf16.mxu1 %v4258_v40 }
 0x4c9   :  { %3798 = vmatpush3.bf16.msra.mxu1 %v4072_v59 }
 0x4ca   :  { %3803 = vmatprep.subr.bf16.mxu1 %v4553_v27 }
 0x575   :  { %v3769_v10 = vpop.f32.mrb[28].mxu0 }
 0x576   :  { %v908_v12 = vpop.f32.mrb[29].mxu0  ;;  %v917_v15 = vadd.f32 %v3769_v10, %v3314_v16 }
 0x577   :  { %v3770_v13 = vpop.f32.mrb[30].mxu0  ;;  %v909_v17 = vadd.f32 %v3314_v16, %v908_v12 }
 0x578   :  { %v911_v14 = vpop.f32.mrb[31].mxu0  ;;  %v920_v19 = vadd.f32 %v3770_v13, %v3314_v16  ;;  %v973_v42 = vmax.f32 %v917_v15, 0.0 }
 0x579   :  { %v912_v38 = vadd.f32 %v3314_v16, %v911_v14  ;;  %v971_v56 = vmax.f32 %v909_v17, 0.0 }
 0x57a   :  { %v974_v1 = vmax.f32 %v920_v19, 0.0 }
 0x57b   :  { %v972_v6 = vmax.f32 %v912_v38, 0.0 }
 0x57d   :  { %v3773_v18 = vpop.f32.mrb[32].mxu0 }
 0x57e   :  { %v933_v21 = vadd.f32 %v3773_v18, %v3314_v16  ;;  %v924_v24 = vpop.f32.mrb[33].mxu0 }
 0x57f   :  { %v925_v40 = vadd.f32 %v3314_v16, %v924_v24  ;;  %v3774_v45 = vpop.f32.mrb[34].mxu0 }
 0x580   :  { %v977_v11 = vmax.f32 %v933_v21, 0.0  ;;  %v936_v52 = vadd.f32 %v3774_v45, %v3314_v16  ;;  %v927_v54 = vpop.f32.mrb[35].mxu0 }
 0x581   :  { %v975_v59 = vmax.f32 %v925_v40, 0.0  ;;  %v928_v58 = vadd.f32 %v3314_v16, %v927_v54 }
 0x582   :  { %v989_v2 = vmax.f32 %v973_v42, %v977_v11  ;;  %v978_v7 = vmax.f32 %v936_v52, 0.0 }
 0x583   :  { %v987_v10 = vmax.f32 %v971_v56, %v975_v59  ;;  %v976_v12 = vmax.f32 %v928_v58, 0.0 }
 0x584   :  { %v990_v5 = vmax.f32 %v974_v1, %v978_v7 }
 0x585   :  { %v988_v13 = vmax.f32 %v972_v6, %v976_v12  ;;  %v3777_v18 = vpop.f32.mrb[36].mxu0 }
 0x586   :  { %v949_v4 = vadd.f32 %v3777_v18, %v3314_v16  ;;  %v940_v14 = vpop.f32.mrb[37].mxu0 }
 0x587   :  { %v941_v24 = vadd.f32 %v3314_v16, %v940_v14  ;;  %v3778_v25 = vpop.f32.mrb[38].mxu0 }
 0x588   :  { %v981_v15 = vmax.f32 %v949_v4, 0.0  ;;  %v952_v21 = vadd.f32 %v3778_v25, %v3314_v16  ;;  %v943_v45 = vpop.f32.mrb[39].mxu0 }
 0x589   :  { %v979_v0 = vmax.f32 %v941_v24, 0.0  ;;  %v944_v17 = vadd.f32 %v3314_v16, %v943_v45 }
 0x58a   :  { %v993_v40 = vmax.f32 %v989_v2, %v981_v15  ;;  %v982_v54 = vmax.f32 %v952_v21, 0.0 }
 0x58b   :  { %v991_v19 = vmax.f32 %v987_v10, %v979_v0  ;;  %v980_v42 = vmax.f32 %v944_v17, 0.0 }
 0x58c   :  { %v994_v11 = vmax.f32 %v990_v5, %v982_v54 }
 0x58d   :  { %v992_v38 = vmax.f32 %v988_v13, %v980_v42  ;;  %v3781_v52 = vpop.f32.mrb[40].mxu0 }
 0x58e   :  { %v965_v56 = vadd.f32 %v3781_v52, %v3314_v16  ;;  %v956_v7 = vpop.f32.mrb[41].mxu0 }
 0x58f   :  { %v957_v6 = vadd.f32 %v3314_v16, %v956_v7  ;;  %v3782_v59 = vpop.f32.mrb[42].mxu0  ;;  %v4074_v7 = vld [vmem:[#allocation2 + $0x48] sm:$0xff]  }
 0x590   :  { %v985_v58 = vmax.f32 %v965_v56, 0.0  ;;  %v968_v1 = vadd.f32 %v3782_v59, %v3314_v16  ;;  %v959_v12 = vpop.f32.mrb[43].mxu0 }
 0x591   :  { %v983_v18 = vmax.f32 %v957_v6, 0.0  ;;  %v960_v4 = vadd.f32 %v3314_v16, %v959_v12 }
 0x592   :  { %v997_v25 = vmax.f32 %v993_v40, %v985_v58  ;;  %v986_v14 = vmax.f32 %v968_v1, 0.0  ;;  %v4581_v58 = vld [vmem:[%s5332_s3 + $0x4] ss:$0 sm:$0xff] }
 0x593   :  { %v995_v24 = vmax.f32 %v991_v19, %v983_v18  ;;  %v984_v45 = vmax.f32 %v960_v4, 0.0 }
 0x594   :  { %v998_v2 = vmax.f32 %v994_v11, %v986_v14 }
 0x595   :  { %v996_v15 = vmax.f32 %v992_v38, %v984_v45 }
 0x596   :  { %v1000_v0 = vmax.f32 %v997_v25, %v998_v2 }
 0x597   :  { %v999_v10 = vmax.f32 %v995_v24, %v996_v15 }
 0x599   :  { %v1001_v5 = vmax.f32 %v999_v10, %v1000_v0 }
 0x59b   :  { %v1002_v13 = vrot.slane %v1001_v5, 4 }
 0x59d   :  { %v1003_v21 = vmax.f32 %v1001_v5, %v1002_v13 }
 0x59f   :  { %v1004_v17 = vrot.slane %v1003_v21, 2 }
 0x5a1   :  { %v1005_v54 = vmax.f32 %v1003_v21, %v1004_v17 }
 0x5a3   :  { %v1006_v42 = vrot.slane %v1005_v54, 1 }
 0x5a5   :  { %v1007_v52 = vmax.f32 %v1005_v54, %v1006_v42 }
 0x5a7   :  { %v1028_v56 = vpack.c.bf16 %v1007_v52, %v1007_v52 }
 0x5a9   :  { %3800 = vmatmul.mubr.bf16.vlgmr.msra.gmra.mrb[52].mxu1 %v1028_v56 }
 0x5aa   :  { %3804 = vmatpush3.bf16.msra.mxu1 %v4553_v27  ;;  %3807 = vmatprep.mubr.msk.bf16.mxu1 %vm666_vm3, %v4446_v37  ;;  %v4078_v37 = vld [vmem:[#allocation2 + $0xa8] sm:$0xff]  }
 0x5ab   :  { %3805 = vmatprep.subr.bf16.mxu1 %v4074_v7  ;;  %3829 = vmatprep.subr.bf16.mxu0 %v4078_v37 }
 0x5ac   :  { %3830 = vmatpush3.bf16.msra.mxu0 %v4078_v37 }
 0x5ae   :  { %3806 = vmatpush3.bf16.msra.mxu1 %v4074_v7 }
 0x5b1   :  { %3808 = vmatmul.mubr.msk.bf16.vlgmr.msra.gmra.mrb[56].mxu1 %vm666_vm3, %v4452_v39  ;;  %v4079_v39 = vld [vmem:[#allocation2 + $0xb0] sm:$0xff]  }
 0x5b2   :  { %3811 = vmatprep.mubr.msk.bf16.mxu1 %vm666_vm3, %v4474_v51  ;;  %3831 = vmatprep.subr.bf16.mxu0 %v4079_v39  ;;  %v4080_v51 = vld [vmem:[#allocation2 + $0xb8] sm:$0xff]  }
 0x5b3   :  { %3832 = vmatpush3.bf16.msra.mxu0 %v4079_v39 }
 0x5b4   :  { %3833 = vmatprep.subr.bf16.mxu0 %v4080_v51 }
 0x5b7   :  { %3834 = vmatpush3.bf16.msra.mxu0 %v4080_v51 }
 0x5b9   :  { %3812 = vmatmul.mubr.msk.bf16.gmra.mrb[60].mxu1 %vm666_vm3, %v4480_v53  ;;  %v4081_v53 = vld [vmem:[#allocation2 + $0xc0] sm:$0xff]  }
 0x5ba   :  { %3815 = vmatprep.mubr.msk.bf16.mxu1 %vm666_vm3, %v4502_v26  ;;  %3835 = vmatprep.subr.bf16.mxu0 %v4081_v53  ;;  %v4082_v26 = vld [vmem:[#allocation2 + $0xc8] sm:$0xff]  }
 0x5bb   :  { %3836 = vmatpush3.bf16.msra.mxu0 %v4081_v53 }
 0x5bc   :  { %3837 = vmatprep.subr.bf16.mxu0 %v4082_v26 }
 0x5bf   :  { %3838 = vmatpush3.bf16.msra.mxu0 %v4082_v26 }
 0x5c1   :  { %3816 = vmatmul.mubr.msk.bf16.gmra.mrb[64].mxu1 %vm666_vm3, %v4508_v28  ;;  %v4083_v28 = vld [vmem:[#allocation2 + $0xd0] sm:$0xff]  }
 0x5c2   :  { %3819 = vmatprep.mubr.msk.bf16.mxu1 %vm666_vm3, %v4530_v8  ;;  %v4084_v8 = vld [vmem:[#allocation2 + $0xd8] sm:$0xff]   ;;  %3855 = vmatprep.subr.bf16.mxu1 %v4083_v28 }
 0x5c3   :  { %3856 = vmatpush3.bf16.msra.mxu1 %v4083_v28 }
 0x5c4   :  { %3857 = vmatprep.subr.bf16.mxu1 %v4084_v8 }
 0x5c7   :  { %3858 = vmatpush3.bf16.msra.mxu1 %v4084_v8 }
 0x5c9   :  { %3820 = vmatmul.mubr.msk.bf16.gmra.mrb[68].mxu1 %vm666_vm3, %v4536_v9  ;;  %v1117_v9 = vlaneseq }
 0x5cb   :  { %v1118_v27 = vshrl.u32 %v1117_v9, 7 }
 0x5cd   :  { %v1119_v11 = vsub.s32 0, %v1118_v27 }
 0x67c   :  { %v1111_v16 = vpop.f32.mrb[52].mxu1 }
 0x67d   :  { %v3801_v40 = vpop.f32.mrb[53].mxu1  ;;  %v4576_v6 = vrot.slane %v1111_v16, %v1119_v11 }
 0x67e   :  { %v1114_v19 = vpop.f32.mrb[54].mxu1 }
 0x67f   :  { %v3802_v38 = vpop.f32.mrb[55].mxu1 }
 0x684   :  { %v3809_v59 = vpop.f32.mrb[56].mxu1 }
 0x685   :  { %v1176_v1 = vadd.f32 %v3809_v59, %v4576_v6  ;;  %v1167_v12 = vpop.f32.mrb[57].mxu1 }
 0x686   :  { %v1168_v18 = vadd.f32 %v1167_v12, %v4576_v6  ;;  %v3810_v4 = vpop.f32.mrb[58].mxu1 }
 0x687   :  { %v1237_v25 = vadd.f32 %v4581_v58, %v1176_v1  ;;  %v1179_v14 = vadd.f32 %v3810_v4, %v4576_v6  ;;  %v1170_v24 = vpop.f32.mrb[59].mxu1 }
 0x688   :  { %v1235_v45 = vadd.f32 %v4581_v58, %v1168_v18  ;;  %v1171_v2 = vadd.f32 %v1170_v24, %v4576_v6 }
 0x689   :  { %v1238_v15 = vadd.f32 %v4581_v58, %v1179_v14  ;;  %v1253_v10 = vmax.f32 %v1237_v25, 0.0 }
 0x68a   :  { %v1236_v0 = vadd.f32 %v4581_v58, %v1171_v2  ;;  %v1251_v13 = vmax.f32 %v1235_v45, 0.0 }
 0x68b   :  { %v1254_v5 = vmax.f32 %v1238_v15, 0.0 }
 0x68c   :  { %v1252_v21 = vmax.f32 %v1236_v0, 0.0  ;;  %v3813_v17 = vpop.f32.mrb[60].mxu1 }
 0x68d   :  { %v1284_v54 = vpack.c.bf16 %v1254_v5, %v1253_v10  ;;  %v1192_v42 = vadd.f32 %v3813_v17, %v4576_v6  ;;  %v1183_v52 = vpop.f32.mrb[61].mxu1 }
 0x68e   :  { %v1184_v56 = vadd.f32 %v1183_v52, %v4576_v6  ;;  %v3814_v7 = vpop.f32.mrb[62].mxu1  ;;  %v1283_v37 = vpack.c.bf16 %v1252_v21, %v1251_v13 }
 0x68f   :  { %v1241_v39 = vadd.f32 %v4581_v58, %v1192_v42  ;;  %v1195_v51 = vadd.f32 %v3814_v7, %v4576_v6  ;;  %v1186_v53 = vpop.f32.mrb[63].mxu1 }
 0x690   :  { %v1239_v26 = vadd.f32 %v4581_v58, %v1184_v56  ;;  %v1187_v28 = vadd.f32 %v1186_v53, %v4576_v6  ;;  %3839 = vmatprep.mubr.bf16.mxu0 %v1283_v37 }
 0x691   :  { %v1242_v8 = vadd.f32 %v4581_v58, %v1195_v51  ;;  %3840 = vmatmul.mubr.bf16.vlgmr.msra.gmra.mrb[44].mxu0 %v1284_v54  ;;  %v1257_v27 = vmax.f32 %v1241_v39, 0.0 }
 0x692   :  { %v1240_v9 = vadd.f32 %v4581_v58, %v1187_v28  ;;  %v1255_v40 = vmax.f32 %v1239_v26, 0.0 }
 0x693   :  { %v1258_v16 = vmax.f32 %v1242_v8, 0.0 }
 0x694   :  { %v1256_v19 = vmax.f32 %v1240_v9, 0.0  ;;  %v3817_v11 = vpop.f32.mrb[64].mxu1 }
 0x695   :  { %v1208_v38 = vadd.f32 %v3817_v11, %v4576_v6  ;;  %v1199_v59 = vpop.f32.mrb[65].mxu1  ;;  %v1286_v1 = vpack.c.bf16 %v1258_v16, %v1257_v27 }
 0x696   :  { %v1200_v12 = vadd.f32 %v1199_v59, %v4576_v6  ;;  %v3818_v18 = vpop.f32.mrb[66].mxu1  ;;  %v1285_v4 = vpack.c.bf16 %v1256_v19, %v1255_v40  ;;  %v4085_v59 = vld [vmem:[#allocation2 + $0xe0] sm:$0xff]  }
 0x697   :  { %v1245_v25 = vadd.f32 %v4581_v58, %v1208_v38  ;;  %v1211_v14 = vadd.f32 %v3818_v18, %v4576_v6  ;;  %v1202_v24 = vpop.f32.mrb[67].mxu1  ;;  %3875 = vmatprep.subr.bf16.mxu0 %v4085_v59 }
 0x698   :  { %v1243_v45 = vadd.f32 %v4581_v58, %v1200_v12  ;;  %v1203_v2 = vadd.f32 %v1202_v24, %v4576_v6  ;;  %3843 = vmatprep.mubr.bf16.mxu0 %v1285_v4  ;;  %3876 = vmatpush3.bf16.msra.mxu0 %v4085_v59 }
 0x699   :  { %v1246_v15 = vadd.f32 %v4581_v58, %v1211_v14  ;;  %3844 = vmatmul.mubr.bf16.gmra.mrb[48].mxu0 %v1286_v1  ;;  %v1261_v10 = vmax.f32 %v1245_v25, 0.0  ;;  %v4086_v1 = vld [vmem:[#allocation2 + $0xe8] sm:$0xff]  }
 0x69a   :  { %v1244_v0 = vadd.f32 %v4581_v58, %v1203_v2  ;;  %v1259_v13 = vmax.f32 %v1243_v45, 0.0  ;;  %3877 = vmatprep.subr.bf16.mxu0 %v4086_v1 }
 0x69b   :  { %v1262_v5 = vmax.f32 %v1246_v15, 0.0 }
 0x69c   :  { %v1260_v21 = vmax.f32 %v1244_v0, 0.0  ;;  %v3821_v17 = vpop.f32.mrb[68].mxu1  ;;  %3878 = vmatpush3.bf16.msra.mxu0 %v4086_v1 }
 0x69d   :  { %v1224_v54 = vadd.f32 %v3821_v17, %v4576_v6  ;;  %v1215_v42 = vpop.f32.mrb[69].mxu1  ;;  %v1288_v52 = vpack.c.bf16 %v1262_v5, %v1261_v10 }
 0x69e   :  { %v1216_v56 = vadd.f32 %v1215_v42, %v4576_v6  ;;  %v3822_v7 = vpop.f32.mrb[70].mxu1  ;;  %v1287_v37 = vpack.c.bf16 %v1260_v21, %v1259_v13 }
 0x69f   :  { %v1249_v39 = vadd.f32 %v4581_v58, %v1224_v54  ;;  %v1227_v51 = vadd.f32 %v3822_v7, %v4576_v6  ;;  %v1218_v53 = vpop.f32.mrb[71].mxu1 }
 0x6a0   :  { %v1247_v26 = vadd.f32 %v4581_v58, %v1216_v56  ;;  %v1219_v28 = vadd.f32 %v1218_v53, %v4576_v6  ;;  %3847 = vmatprep.mubr.bf16.mxu0 %v1287_v37  ;;  %v4618_v6 = vld [vmem:[%s5332_s3 + $0x5] ss:$0 sm:$0xff] }
 0x6a1   :  { %v1250_v8 = vadd.f32 %v4581_v58, %v1227_v51  ;;  %3848 = vmatmul.mubr.bf16.gmra.mrb[52].mxu0 %v1288_v52  ;;  %v1265_v27 = vmax.f32 %v1249_v39, 0.0 }
 0x6a2   :  { %v1248_v9 = vadd.f32 %v4581_v58, %v1219_v28  ;;  %v1263_v40 = vmax.f32 %v1247_v26, 0.0 }
 0x6a3   :  { %v1266_v16 = vmax.f32 %v1250_v8, 0.0 }
 0x6a4   :  { %v1264_v19 = vmax.f32 %v1248_v9, 0.0 }
 0x6a5   :  { %v1290_v11 = vpack.c.bf16 %v1266_v16, %v1265_v27 }
 0x6a6   :  { %v1289_v38 = vpack.c.bf16 %v1264_v19, %v1263_v40 }
 0x6a8   :  { %3851 = vmatprep.mubr.bf16.mxu0 %v1289_v38  ;;  %v5340_v38 = vmax.f32 %v4492_v61, 0.0 }
 0x6a9   :  { %3852 = vmatmul.mubr.bf16.gmra.mrb[56].mxu0 %v1290_v11 }
 0x764   :  { %v3841_v58 = vpop.f32.mrb[44].mxu0 }
 0x765   :  { %v4621_v12 = vadd.f32 %v3841_v58, %v4618_v6  ;;  %v1378_v18 = vpop.f32.mrb[45].mxu0  ;;  %v5341_v58 = vmax.f32 %v4486_v57, 0.0 }
 0x766   :  { %v4624_v4 = vadd.f32 %v4618_v6, %v1378_v18  ;;  %v3842_v25 = vpop.f32.mrb[46].mxu0 }
 0x767   :  { %v4627_v14 = vadd.f32 %v3842_v25, %v4618_v6  ;;  %v1381_v24 = vpop.f32.mrb[47].mxu0  ;;  %v1443_v15 = vmax.f32 %v4621_v12, 0.0 }
 0x768   :  { %v1441_v45 = vmax.f32 %v4624_v4, 0.0  ;;  %v4631_v2 = vadd.f32 %v4618_v6, %v1381_v24 }
 0x769   :  { %v1444_v0 = vmax.f32 %v4627_v14, 0.0  ;;  %v1459_v54 = vsub.f32 %v623_v36, %v1443_v15 }
 0x76a   :  { %v1442_v10 = vmax.f32 %v4631_v2, 0.0  ;;  %v1457_v13 = vsub.f32 %v621_v34, %v1441_v45 }
 0x76b   :  { %v1460_v5 = vsub.f32 %v624_v33, %v1444_v0 }
 0x76c   :  { %v1458_v21 = vsub.f32 %v622_v35, %v1442_v10  ;;  %v3845_v17 = vpop.f32.mrb[48].mxu0 }
 0x76d   :  { %v4653_v42 = vadd.f32 %v3845_v17, %v4618_v6  ;;  %v1394_v23 = vpop.f32.mrb[49].mxu0  ;;  %v1478_v34 = vpack.c.bf16 %v1460_v5, %v1459_v54 }
 0x76e   :  { %v1477_v33 = vpack.c.bf16 %v1458_v21, %v1457_v13  ;;  %v4656_v52 = vadd.f32 %v4618_v6, %v1394_v23  ;;  %v3846_v20 = vpop.f32.mrb[50].mxu0  ;;  %v5342_v23 = vmax.f32 %v4516_v31, 0.0 }
 0x76f   :  { %v4659_v56 = vadd.f32 %v3846_v20, %v4618_v6  ;;  %v1397_v32 = vpop.f32.mrb[51].mxu0  ;;  %v1447_v22 = vmax.f32 %v4653_v42, 0.0 }
 0x770   :  { %v1445_v35 = vmax.f32 %v4656_v52, 0.0  ;;  %v4663_v7 = vadd.f32 %v4618_v6, %v1397_v32  ;;  %3859 = vmatprep.mubr.msk.bf16.mxu1 %vm666_vm3, %v1477_v33 }
 0x771   :  { %v1448_v36 = vmax.f32 %v4659_v56, 0.0  ;;  %3860 = vmatmul.mubr.msk.bf16.vlgmr.msra.gmra.mrb[72].mxu1 %vm666_vm3, %v1478_v34  ;;  %v1463_v28 = vsub.f32 %v627_v50, %v1447_v22  ;;  %v5344_v34 = vmax.f32 %v4520_v3, 0.0 }
 0x772   :  { %v1446_v37 = vmax.f32 %v4663_v7, 0.0  ;;  %v1461_v51 = vsub.f32 %v625_v48, %v1445_v35 }
 0x773   :  { %v1464_v39 = vsub.f32 %v628_v47, %v1448_v36 }
 0x774   :  { %v1462_v53 = vsub.f32 %v626_v49, %v1446_v37  ;;  %v3849_v26 = vpop.f32.mrb[52].mxu0 }
 0x775   :  { %v4687_v8 = vadd.f32 %v3849_v26, %v4618_v6  ;;  %v1410_v44 = vpop.f32.mrb[53].mxu0  ;;  %v1480_v48 = vpack.c.bf16 %v1464_v39, %v1463_v28  ;;  %v5345_v39 = vmax.f32 %v4514_v30, 0.0 }
 0x776   :  { %v1479_v47 = vpack.c.bf16 %v1462_v53, %v1461_v51  ;;  %v4690_v9 = vadd.f32 %v4618_v6, %v1410_v44  ;;  %v3850_v41 = vpop.f32.mrb[54].mxu0 }
 0x777   :  { %v4693_v27 = vadd.f32 %v3850_v41, %v4618_v6  ;;  %v1413_v46 = vpop.f32.mrb[55].mxu0  ;;  %v1451_v43 = vmax.f32 %v4687_v8, 0.0 }
 0x778   :  { %v1449_v49 = vmax.f32 %v4690_v9, 0.0  ;;  %v4697_v16 = vadd.f32 %v4618_v6, %v1413_v46  ;;  %3863 = vmatprep.mubr.msk.bf16.mxu1 %vm666_vm3, %v1479_v47 }
 0x779   :  { %v1452_v50 = vmax.f32 %v4693_v27, 0.0  ;;  %3864 = vmatmul.mubr.msk.bf16.gmra.mrb[76].mxu1 %vm666_vm3, %v1480_v48  ;;  %v1467_v18 = vsub.f32 %v5341_v58, %v1451_v43 }
 0x77a   :  { %v1450_v40 = vmax.f32 %v4697_v16, 0.0  ;;  %v1465_v11 = vsub.f32 %v629_v63, %v1449_v49 }
 0x77b   :  { %v1468_v19 = vsub.f32 %v632_v62, %v1452_v50 }
 0x77c   :  { %v1466_v59 = vsub.f32 %v5340_v38, %v1450_v40  ;;  %v3853_v1 = vpop.f32.mrb[56].mxu0 }
 0x77d   :  { %v4721_v25 = vadd.f32 %v3853_v1, %v4618_v6  ;;  %v1426_v60 = vpop.f32.mrb[57].mxu0  ;;  %v1482_v63 = vpack.c.bf16 %v1468_v19, %v1467_v18 }
 0x77e   :  { %v1481_v62 = vpack.c.bf16 %v1466_v59, %v1465_v11  ;;  %v4724_v24 = vadd.f32 %v4618_v6, %v1426_v60  ;;  %v3854_v55 = vpop.f32.mrb[58].mxu0 }
 0x77f   :  { %v4727_v5 = vadd.f32 %v3854_v55, %v4618_v6  ;;  %v1429_v61 = vpop.f32.mrb[59].mxu0  ;;  %v1455_v57 = vmax.f32 %v4721_v25, 0.0 }
 0x780   :  { %v1453_v13 = vmax.f32 %v4724_v24, 0.0  ;;  %v4731_v21 = vadd.f32 %v4618_v6, %v1429_v61  ;;  %3867 = vmatprep.mubr.msk.bf16.mxu1 %vm666_vm3, %v1481_v62  ;;  %v5343_v6 = vmax.f32 %v4510_v29, 0.0  ;;  %v3355_v29 = vld [vmem:[%s5332_s3 + $0x6] ss:$0 sm:$0xff]  ;;  %v4094_v24 = vld [vmem:[#allocation2 + $0x128] sm:$0xff]  }
 0x781   :  { %v1456_v17 = vmax.f32 %v4727_v5, 0.0  ;;  %3868 = vmatmul.mubr.msk.bf16.gmra.mrb[80].mxu1 %vm666_vm3, %v1482_v63  ;;  %v1471_v51 = vsub.f32 %v5345_v39, %v1455_v57 }
 0x782   :  { %v1454_v54 = vmax.f32 %v4731_v21, 0.0  ;;  %v1469_v20 = vsub.f32 %v5343_v6, %v1453_v13 }
 0x783   :  { %v1472_v33 = vsub.f32 %v5342_v23, %v1456_v17 }
 0x784   :  { %v1470_v32 = vsub.f32 %v5344_v34, %v1454_v54 }
 0x785   :  { %v1484_v26 = vpack.c.bf16 %v1472_v33, %v1471_v51 }
 0x786   :  { %v1483_v53 = vpack.c.bf16 %v1470_v32, %v1469_v20 }
 0x788   :  { %3871 = vmatprep.mubr.msk.bf16.mxu1 %vm666_vm3, %v1483_v53 }
 0x789   :  { %3872 = vmatmul.mubr.msk.bf16.gmra.mrb[84].mxu1 %vm666_vm3, %v1484_v26 }
 0x844   :  { %v3861_v31 = vpop.f32.mrb[72].mxu1 }
 0x845   :  { %v1569_v28 = vadd.f32 %v3861_v31, %v3355_v29  ;;  %v1560_v44 = vpop.f32.mrb[73].mxu1 }
 0x846   :  { %v1561_v3 = vadd.f32 %v3355_v29, %v1560_v44  ;;  %v3862_v47 = vpop.f32.mrb[74].mxu1 }
 0x847   :  { %v1572_v41 = vadd.f32 %v3862_v47, %v3355_v29  ;;  %v1563_v48 = vpop.f32.mrb[75].mxu1  ;;  %v1625_v30 = vmax.f32 %v1569_v28, 0.0 }
 0x848   :  { %v1564_v46 = vadd.f32 %v3355_v29, %v1563_v48  ;;  %v1623_v11 = vmax.f32 %v1561_v3, 0.0 }
 0x849   :  { %v1626_v19 = vmax.f32 %v1572_v41, 0.0 }
 0x84a   :  { %v1624_v38 = vmax.f32 %v1564_v46, 0.0 }
 0x84b   :  { %v1644_v59 = vpack.c.bf16 %v1626_v19, %v1625_v30 }
 0x84c   :  { %v1643_v1 = vpack.c.bf16 %v1624_v38, %v1623_v11  ;;  %v3865_v58 = vpop.f32.mrb[76].mxu1 }
 0x84d   :  { %v1585_v18 = vadd.f32 %v3865_v58, %v3355_v29  ;;  %v1576_v60 = vpop.f32.mrb[77].mxu1 }
 0x84e   :  { %v1577_v62 = vadd.f32 %v3355_v29, %v1576_v60  ;;  %v3866_v55 = vpop.f32.mrb[78].mxu1  ;;  %3879 = vmatprep.mubr.msk.bf16.mxu0 %vm666_vm3, %v1643_v1 }
 0x84f   :  { %v1588_v63 = vadd.f32 %v3866_v55, %v3355_v29  ;;  %v1579_v61 = vpop.f32.mrb[79].mxu1  ;;  %3880 = vmatmul.mubr.msk.bf16.vlgmr.msra.gmra.mrb[60].mxu0 %vm666_vm3, %v1644_v59  ;;  %v1629_v33 = vmax.f32 %v1585_v18, 0.0 }
 0x850   :  { %v1580_v23 = vadd.f32 %v3355_v29, %v1579_v61  ;;  %v1627_v20 = vmax.f32 %v1577_v62, 0.0 }
 0x851   :  { %v1630_v6 = vmax.f32 %v1588_v63, 0.0 }
 0x852   :  { %v1628_v34 = vmax.f32 %v1580_v23, 0.0 }
 0x853   :  { %v1646_v32 = vpack.c.bf16 %v1630_v6, %v1629_v33 }
 0x854   :  { %v1645_v39 = vpack.c.bf16 %v1628_v34, %v1627_v20  ;;  %v3869_v51 = vpop.f32.mrb[80].mxu1  ;;  %v4770_v34 = vld [vmem:[%s5332_s3 + $0x7] ss:$0 sm:$0xff] }
 0x855   :  { %v1601_v53 = vadd.f32 %v3869_v51, %v3355_v29  ;;  %v1592_v26 = vpop.f32.mrb[81].mxu1 }
 0x856   :  { %v1593_v31 = vadd.f32 %v3355_v29, %v1592_v26  ;;  %v3870_v28 = vpop.f32.mrb[82].mxu1  ;;  %3883 = vmatprep.mubr.msk.bf16.mxu0 %vm666_vm3, %v1645_v39 }
 0x857   :  { %v1604_v44 = vadd.f32 %v3870_v28, %v3355_v29  ;;  %v1595_v3 = vpop.f32.mrb[83].mxu1  ;;  %3884 = vmatmul.mubr.msk.bf16.gmra.mrb[64].mxu0 %vm666_vm3, %v1646_v32  ;;  %v1633_v41 = vmax.f32 %v1601_v53, 0.0 }
 0x858   :  { %v1596_v47 = vadd.f32 %v3355_v29, %v1595_v3  ;;  %v1631_v46 = vmax.f32 %v1593_v31, 0.0 }
 0x859   :  { %v1634_v48 = vmax.f32 %v1604_v44, 0.0 }
 0x85a   :  { %v1632_v30 = vmax.f32 %v1596_v47, 0.0 }
 0x85b   :  { %v1648_v19 = vpack.c.bf16 %v1634_v48, %v1633_v41 }
 0x85c   :  { %v1647_v11 = vpack.c.bf16 %v1632_v30, %v1631_v46  ;;  %v3873_v38 = vpop.f32.mrb[84].mxu1 }
 0x85d   :  { %v1617_v59 = vadd.f32 %v3873_v38, %v3355_v29  ;;  %v1608_v1 = vpop.f32.mrb[85].mxu1 }
 0x85e   :  { %v1609_v58 = vadd.f32 %v3355_v29, %v1608_v1  ;;  %v3874_v18 = vpop.f32.mrb[86].mxu1  ;;  %3887 = vmatprep.mubr.msk.bf16.mxu0 %vm666_vm3, %v1647_v11 }
 0x85f   :  { %v1620_v60 = vadd.f32 %v3874_v18, %v3355_v29  ;;  %v1611_v62 = vpop.f32.mrb[87].mxu1  ;;  %3888 = vmatmul.mubr.msk.bf16.gmra.mrb[68].mxu0 %vm666_vm3, %v1648_v19  ;;  %v1637_v63 = vmax.f32 %v1617_v59, 0.0 }
 0x860   :  { %v1612_v55 = vadd.f32 %v3355_v29, %v1611_v62  ;;  %v1635_v23 = vmax.f32 %v1609_v58, 0.0 }
 0x861   :  { %v1638_v61 = vmax.f32 %v1620_v60, 0.0 }
 0x862   :  { %v1636_v33 = vmax.f32 %v1612_v55, 0.0 }
 0x863   :  { %v1650_v6 = vpack.c.bf16 %v1638_v61, %v1637_v63 }
 0x864   :  { %v1649_v20 = vpack.c.bf16 %v1636_v33, %v1635_v23 }
 0x866   :  { %3891 = vmatprep.mubr.msk.bf16.mxu0 %vm666_vm3, %v1649_v20 }
 0x867   :  { %3892 = vmatmul.mubr.msk.bf16.gmra.mrb[72].mxu0 %vm666_vm3, %v1650_v6 }
 0x922   :  { %v3881_v32 = vpop.f32.mrb[60].mxu0 }
 0x923   :  { %v1735_v39 = vadd.f32 %v3881_v32, %v4770_v34  ;;  %v1726_v51 = vpop.f32.mrb[61].mxu0 }
 0x924   :  { %v1727_v29 = vadd.f32 %v4770_v34, %v1726_v51  ;;  %v3882_v53 = vpop.f32.mrb[62].mxu0 }
 0x925   :  { %v1791_v26 = vmax.f32 %v1735_v39, 0.0  ;;  %v1738_v31 = vadd.f32 %v3882_v53, %v4770_v34  ;;  %v1729_v28 = vpop.f32.mrb[63].mxu0 }
 0x926   :  { %v1789_v44 = vmax.f32 %v1727_v29, 0.0  ;;  %v1730_v48 = vadd.f32 %v4770_v34, %v1729_v28 }
 0x927   :  { %v1792_v3 = vmax.f32 %v1738_v31, 0.0  ;;  %v1859_v47 = vsel %vm666_vm3, %v1791_v26, 0.0  ;;  %v1811_v41 = vsel %vm666_vm3, %v1791_v26, -inf }
 0x928   :  { %1860 = vadd.xlane.f32.xlu1 %v1859_v47  ;;  %1812 = vmax.xlane.f32.xlu0 %v1811_v41  ;;  %v1853_v11 = vsel %vm666_vm3, %v1789_v44, 0.0  ;;  %v1790_v1 = vmax.f32 %v1730_v48, 0.0  ;;  %v1805_v62 = vsel %vm666_vm3, %v1789_v44, -inf }
 0x929   :  { %v1862_v19 = vsel %vm666_vm3, %v1792_v3, 0.0  ;;  %v1814_v60 = vsel %vm666_vm3, %v1792_v3, -inf }
 0x92a   :  { %v3885_v46 = vpop.f32.mrb[64].mxu0  ;;  %v1808_v33 = vsel %vm666_vm3, %v1790_v1, -inf  ;;  %v1856_v6 = vsel %vm666_vm3, %v1790_v1, 0.0 }
 0x92b   :  { %v1742_v30 = vpop.f32.mrb[65].mxu0  ;;  %v1751_v58 = vadd.f32 %v3885_v46, %v4770_v34  ;;  %v4087_v46 = vld [vmem:[#allocation2 + $0xf0] sm:$0xff]  }
 0x92c   :  { %1863 = vadd.xlane.f32.xlu1 %v1862_v19  ;;  %v3886_v38 = vpop.f32.mrb[66].mxu0  ;;  %1854 = vadd.xlane.f32.xlu0 %v1853_v11  ;;  %v1743_v39 = vadd.f32 %v4770_v34, %v1742_v30 }
 0x92d   :  { %v1745_v59 = vpop.f32.mrb[67].mxu0  ;;  %v1754_v18 = vadd.f32 %v3886_v38, %v4770_v34  ;;  %v1795_v63 = vmax.f32 %v1751_v58, 0.0  ;;  %3895 = vmatprep.subr.bf16.mxu1 %v4087_v46 }
 0x92e   :  { %v1746_v51 = vadd.f32 %v4770_v34, %v1745_v59  ;;  %v1793_v31 = vmax.f32 %v1743_v39, 0.0  ;;  %3896 = vmatpush3.bf16.msra.mxu1 %v4087_v46 }
 0x92f   :  { %v1796_v61 = vmax.f32 %v1754_v18, 0.0  ;;  %v1871_v53 = vsel %vm666_vm3, %v1795_v63, 0.0  ;;  %v1823_v47 = vsel %vm666_vm3, %v1795_v63, -inf }
 0x930   :  { %1815 = vmax.xlane.f32.xlu1 %v1814_v60  ;;  %1806 = vmax.xlane.f32.xlu0 %v1805_v62  ;;  %v1794_v28 = vmax.f32 %v1746_v51, 0.0  ;;  %v1865_v38 = vsel %vm666_vm3, %v1793_v31, 0.0  ;;  %v1817_v18 = vsel %vm666_vm3, %v1793_v31, -inf }
 0x931   :  { %v1874_v29 = vsel %vm666_vm3, %v1796_v61, 0.0  ;;  %v1826_v3 = vsel %vm666_vm3, %v1796_v61, -inf  ;;  %v4088_v61 = vld [vmem:[#allocation2 + $0xf8] sm:$0xff]  }
 0x932   :  { %v3889_v55 = vpop.f32.mrb[68].mxu0  ;;  %v1868_v11 = vsel %vm666_vm3, %v1794_v28, 0.0  ;;  %v1820_v58 = vsel %vm666_vm3, %v1794_v28, -inf  ;;  %3897 = vmatprep.subr.bf16.mxu1 %v4088_v61 }
 0x933   :  { %v1758_v23 = vpop.f32.mrb[69].mxu0  ;;  %v1767_v30 = vadd.f32 %v3889_v55, %v4770_v34  ;;  %3898 = vmatpush3.bf16.msra.mxu1 %v4088_v61  ;;  %v4823_v61 = vld [vmem:[%s5332_s3 + $0x9] ss:$0 sm:$0xff] }
 0x934   :  { %v3890_v20 = vpop.f32.mrb[70].mxu0  ;;  %1809 = vmax.xlane.f32.xlu1 %v1808_v33  ;;  %1857 = vadd.xlane.f32.xlu0 %v1856_v6  ;;  %v1759_v60 = vadd.f32 %v4770_v34, %v1758_v23 }
 0x935   :  { %v1761_v32 = vpop.f32.mrb[71].mxu0  ;;  %v1770_v19 = vadd.f32 %v3890_v20, %v4770_v34  ;;  %v1799_v59 = vmax.f32 %v1767_v30, 0.0 }
 0x936   :  { %v1762_v62 = vadd.f32 %v4770_v34, %v1761_v32  ;;  %v1797_v33 = vmax.f32 %v1759_v60, 0.0 }
 0x937   :  { %v1800_v1 = vmax.f32 %v1770_v19, 0.0  ;;  %v1883_v63 = vsel %vm666_vm3, %v1799_v59, 0.0  ;;  %v1835_v39 = vsel %vm666_vm3, %v1799_v59, -inf }
 0x938   :  { %1875 = vadd.xlane.f32.xlu1 %v1874_v29  ;;  %1872 = vadd.xlane.f32.xlu0 %v1871_v53  ;;  %v1798_v6 = vmax.f32 %v1762_v62, 0.0  ;;  %v1877_v29 = vsel %vm666_vm3, %v1797_v33, 0.0  ;;  %v1829_v31 = vsel %vm666_vm3, %v1797_v33, -inf }
 0x939   :  { %v1886_v55 = vsel %vm666_vm3, %v1800_v1, 0.0  ;;  %v1838_v20 = vsel %vm666_vm3, %v1800_v1, -inf  ;;  %v4089_v1 = vld [vmem:[#allocation2 + $0x100] sm:$0xff]  }
 0x93a   :  { %v3893_v26 = vpop.f32.mrb[72].mxu0  ;;  %v1880_v51 = vsel %vm666_vm3, %v1798_v6, 0.0  ;;  %v1832_v53 = vsel %vm666_vm3, %v1798_v6, -inf  ;;  %3915 = vmatprep.subr.bf16.mxu0 %v4089_v1  ;;  %v4828_v6 = vld [vmem:[%s5332_s3 + $0x8] ss:$0 sm:$0xff] }
 0x93b   :  { %v1774_v44 = vpop.f32.mrb[73].mxu0  ;;  %v1783_v23 = vadd.f32 %v3893_v26, %v4770_v34  ;;  %3916 = vmatpush3.bf16.msra.mxu0 %v4089_v1 }
 0x93c   :  { %v3894_v41 = vpop.f32.mrb[74].mxu0  ;;  %1827 = vmax.xlane.f32.xlu1 %v1826_v3  ;;  %1824 = vmax.xlane.f32.xlu0 %v1823_v47  ;;  %v1775_v3 = vadd.f32 %v4770_v34, %v1774_v44 }
 0x93d   :  { %v1777_v48 = vpop.f32.mrb[75].mxu0  ;;  %v1786_v32 = vadd.f32 %v3894_v41, %v4770_v34  ;;  %v1803_v28 = vmax.f32 %v1783_v23, 0.0 }
 0x93e   :  { %v1778_v46 = vadd.f32 %v4770_v34, %v1777_v48  ;;  %v1801_v26 = vmax.f32 %v1775_v3, 0.0 }
 0x93f   :  { %v1804_v47 = vmax.f32 %v1786_v32, 0.0  ;;  %v1895_v19 = vsel %vm666_vm3, %v1803_v28, 0.0  ;;  %v1847_v59 = vsel %vm666_vm3, %v1803_v28, -inf }
 0x940   :  { %1869 = vadd.xlane.f32.xlu1 %v1868_v11  ;;  %1866 = vadd.xlane.f32.xlu0 %v1865_v38  ;;  %v1802_v41 = vmax.f32 %v1778_v46, 0.0  ;;  %v1889_v38 = vsel %vm666_vm3, %v1801_v26, 0.0  ;;  %v1841_v34 = vsel %vm666_vm3, %v1801_v26, -inf }
 0x941   :  { %v1898_v30 = vsel %vm666_vm3, %v1804_v47, 0.0  ;;  %v1850_v48 = vsel %vm666_vm3, %v1804_v47, -inf }
 0x942   :  { %v1892_v11 = vsel %vm666_vm3, %v1802_v41, 0.0  ;;  %v1844_v44 = vsel %vm666_vm3, %v1802_v41, -inf }
 0x944   :  { %1821 = vmax.xlane.f32.xlu1 %v1820_v58  ;;  %1818 = vmax.xlane.f32.xlu0 %v1817_v18 }
 0x948   :  { %1887 = vadd.xlane.f32.xlu1 %v1886_v55  ;;  %1884 = vadd.xlane.f32.xlu0 %v1883_v63 }
 0x94c   :  { %1839 = vmax.xlane.f32.xlu1 %v1838_v20  ;;  %1836 = vmax.xlane.f32.xlu0 %v1835_v39 }
 0x950   :  { %1881 = vadd.xlane.f32.xlu1 %v1880_v51  ;;  %1878 = vadd.xlane.f32.xlu0 %v1877_v29 }
 0x954   :  { %1833 = vmax.xlane.f32.xlu1 %v1832_v53  ;;  %1830 = vmax.xlane.f32.xlu0 %v1829_v31 }
 0x958   :  { %1899 = vadd.xlane.f32.xlu1 %v1898_v30  ;;  %1896 = vadd.xlane.f32.xlu0 %v1895_v19  ;;  %v4839_v30 = vld [vmem:[%s5332_s3 + $0xa] ss:$0 sm:$0xff] }
 0x95c   :  { %1893 = vadd.xlane.f32.xlu1 %v1892_v11  ;;  %1890 = vadd.xlane.f32.xlu0 %v1889_v38 }
 0x960   :  { %1845 = vmax.xlane.f32.xlu1 %v1844_v44  ;;  %1842 = vmax.xlane.f32.xlu0 %v1841_v34 }
 0x964   :  { %1851 = vmax.xlane.f32.xlu1 %v1850_v48  ;;  %1848 = vmax.xlane.f32.xlu0 %v1847_v59 }
 0x9b5   :  { %v1861_v58 = vpop.xlane.xlu1 %1860  ;;  %v1813_v18 = vpop.xlane.xlu0 %1812 }
 0x9b6   :  { %v1904_v55 = vmul.f32 0.03125, %v1861_v58  ;;  %v1925_v31 = vmul.f32 %v4828_v6, %v1813_v18 }
 0x9b8   :  { %v1946_v51 = vmul.f32 %v4823_v61, %v1904_v55 }
 0x9b9   :  { %v1864_v60 = vpop.xlane.xlu1 %1863  ;;  %v1855_v62 = vpop.xlane.xlu0 %1854 }
 0x9ba   :  { %v1905_v63 = vmul.f32 0.03125, %v1864_v60  ;;  %v1902_v33 = vmul.f32 0.03125, %v1855_v62  ;;  %v1962_v41 = vadd.f32 %v1946_v51, %v1925_v31 }
 0x9bc   :  { %v1947_v29 = vmul.f32 %v4823_v61, %v1905_v63  ;;  %v1944_v53 = vmul.f32 %v4823_v61, %v1902_v33  ;;  %v1983_v1 = vadd.f32 %v4839_v30, %v1962_v41 }
 0x9bd   :  { %v1816_v20 = vpop.xlane.xlu1 %1815  ;;  %v1807_v39 = vpop.xlane.xlu0 %1806 }
 0x9be   :  { %v1926_v23 = vmul.f32 %v4828_v6, %v1816_v20  ;;  %v1923_v32 = vmul.f32 %v4828_v6, %v1807_v39  ;;  %v1999_v39 = vmax.f32 %v1983_v1, 0.0 }
 0x9c0   :  { %v1963_v28 = vadd.f32 %v1947_v29, %v1926_v23  ;;  %v1960_v46 = vadd.f32 %v1944_v53, %v1923_v32 }
 0x9c1   :  { %v1810_v3 = vpop.xlane.xlu1 %1809  ;;  %v1858_v47 = vpop.xlane.xlu0 %1857 }
 0x9c2   :  { %v1903_v26 = vmul.f32 0.03125, %v1858_v47  ;;  %v1924_v19 = vmul.f32 %v4828_v6, %v1810_v3  ;;  %v1984_v38 = vadd.f32 %v4839_v30, %v1963_v28  ;;  %v1981_v48 = vadd.f32 %v4839_v30, %v1960_v46 }
 0x9c4   :  { %v1945_v11 = vmul.f32 %v4823_v61, %v1903_v26  ;;  %v2000_v18 = vmax.f32 %v1984_v38, 0.0  ;;  %v1997_v33 = vmax.f32 %v1981_v48, 0.0 }
 0x9c5   :  { %v1876_v44 = vpop.xlane.xlu1 %1875  ;;  %v1873_v34 = vpop.xlane.xlu0 %1872 }
 0x9c6   :  { %v1961_v59 = vadd.f32 %v1945_v11, %v1924_v19  ;;  %v1909_v60 = vmul.f32 0.03125, %v1876_v44  ;;  %v1908_v62 = vmul.f32 0.03125, %v1873_v34  ;;  %v2018_v29 = vpack.c.bf16 %v2000_v18, %v1999_v39 }
 0x9c8   :  { %v1982_v58 = vadd.f32 %v4839_v30, %v1961_v59  ;;  %v1951_v53 = vmul.f32 %v4823_v61, %v1909_v60  ;;  %v1950_v31 = vmul.f32 %v4823_v61, %v1908_v62 }
 0x9c9   :  { %v1828_v55 = vpop.xlane.xlu1 %1827  ;;  %v1825_v63 = vpop.xlane.xlu0 %1824 }
 0x9ca   :  { %v1998_v20 = vmax.f32 %v1982_v58, 0.0  ;;  %v1930_v23 = vmul.f32 %v4828_v6, %v1828_v55  ;;  %v1929_v32 = vmul.f32 %v4828_v6, %v1825_v63 }
 0x9cc   :  { %v2017_v51 = vpack.c.bf16 %v1998_v20, %v1997_v33  ;;  %v1967_v26 = vadd.f32 %v1951_v53, %v1930_v23  ;;  %v1966_v41 = vadd.f32 %v1950_v31, %v1929_v32 }
 0x9cd   :  { %v1870_v28 = vpop.xlane.xlu1 %1869  ;;  %v1867_v3 = vpop.xlane.xlu0 %1866 }
 0x9ce   :  { %v1907_v47 = vmul.f32 0.03125, %v1870_v28  ;;  %v1906_v46 = vmul.f32 0.03125, %v1867_v3  ;;  %3899 = vmatprep.mubr.msk.bf16.mxu1 %vm666_vm3, %v2017_v51  ;;  %v1988_v59 = vadd.f32 %v4839_v30, %v1967_v26  ;;  %v1987_v1 = vadd.f32 %v4839_v30, %v1966_v41 }
 0x9cf   :  { %3900 = vmatmul.mubr.msk.bf16.vlgmr.msra.gmra.mrb[88].mxu1 %vm666_vm3, %v2018_v29 }
 0x9d0   :  { %v1949_v38 = vmul.f32 %v4823_v61, %v1907_v47  ;;  %v1948_v44 = vmul.f32 %v4823_v61, %v1906_v46  ;;  %v2004_v33 = vmax.f32 %v1988_v59, 0.0  ;;  %v2003_v20 = vmax.f32 %v1987_v1, 0.0 }
 0x9d1   :  { %v1822_v19 = vpop.xlane.xlu1 %1821  ;;  %v1819_v11 = vpop.xlane.xlu0 %1818 }
 0x9d2   :  { %v1928_v34 = vmul.f32 %v4828_v6, %v1822_v19  ;;  %v1927_v48 = vmul.f32 %v4828_v6, %v1819_v11  ;;  %v2020_v28 = vpack.c.bf16 %v2004_v33, %v2003_v20 }
 0x9d4   :  { %v1965_v58 = vadd.f32 %v1949_v38, %v1928_v34  ;;  %v1964_v18 = vadd.f32 %v1948_v44, %v1927_v48 }
 0x9d5   :  { %v1888_v60 = vpop.xlane.xlu1 %1887  ;;  %v1885_v62 = vpop.xlane.xlu0 %1884 }
 0x9d6   :  { %v1986_v55 = vadd.f32 %v4839_v30, %v1965_v58  ;;  %v1985_v63 = vadd.f32 %v4839_v30, %v1964_v18  ;;  %v1913_v32 = vmul.f32 0.03125, %v1888_v60  ;;  %v1912_v51 = vmul.f32 0.03125, %v1885_v62 }
 0x9d8   :  { %v2002_v39 = vmax.f32 %v1986_v55, 0.0  ;;  %v2001_v23 = vmax.f32 %v1985_v63, 0.0  ;;  %v1955_v46 = vmul.f32 %v4823_v61, %v1913_v32  ;;  %v1954_v26 = vmul.f32 %v4823_v61, %v1912_v51 }
 0x9d9   :  { %v1840_v29 = vpop.xlane.xlu1 %1839  ;;  %v1837_v53 = vpop.xlane.xlu0 %1836 }
 0x9da   :  { %v2019_v31 = vpack.c.bf16 %v2002_v39, %v2001_v23  ;;  %v1934_v3 = vmul.f32 %v4828_v6, %v1840_v29  ;;  %v1933_v47 = vmul.f32 %v4828_v6, %v1837_v53 }
 0x9dc   :  { %3903 = vmatprep.mubr.msk.bf16.mxu1 %vm666_vm3, %v2019_v31  ;;  %v1971_v44 = vadd.f32 %v1955_v46, %v1934_v3  ;;  %v1970_v34 = vadd.f32 %v1954_v26, %v1933_v47 }
 0x9dd   :  { %v1882_v41 = vpop.xlane.xlu1 %1881  ;;  %3904 = vmatmul.mubr.msk.bf16.gmra.mrb[92].mxu1 %vm666_vm3, %v2020_v28  ;;  %v1879_v19 = vpop.xlane.xlu0 %1878 }
 0x9de   :  { %v1911_v11 = vmul.f32 0.03125, %v1882_v41  ;;  %v1910_v38 = vmul.f32 0.03125, %v1879_v19  ;;  %v1992_v62 = vadd.f32 %v4839_v30, %v1971_v44  ;;  %v1991_v55 = vadd.f32 %v4839_v30, %v1970_v34 }
 0x9e0   :  { %v1953_v1 = vmul.f32 %v4823_v61, %v1911_v11  ;;  %v1952_v58 = vmul.f32 %v4823_v61, %v1910_v38  ;;  %v2008_v51 = vmax.f32 %v1992_v62, 0.0  ;;  %v2007_v29 = vmax.f32 %v1991_v55, 0.0 }
 0x9e1   :  { %v1834_v48 = vpop.xlane.xlu1 %1833  ;;  %v1831_v59 = vpop.xlane.xlu0 %1830 }
 0x9e2   :  { %v1932_v18 = vmul.f32 %v4828_v6, %v1834_v48  ;;  %v1931_v60 = vmul.f32 %v4828_v6, %v1831_v59  ;;  %v2022_v41 = vpack.c.bf16 %v2008_v51, %v2007_v29 }
 0x9e4   :  { %v1969_v63 = vadd.f32 %v1953_v1, %v1932_v18  ;;  %v1968_v33 = vadd.f32 %v1952_v58, %v1931_v60 }
 0x9e5   :  { %v1900_v20 = vpop.xlane.xlu1 %1899  ;;  %v1897_v39 = vpop.xlane.xlu0 %1896 }
 0x9e6   :  { %v1990_v23 = vadd.f32 %v4839_v30, %v1969_v63  ;;  %v1989_v32 = vadd.f32 %v4839_v30, %v1968_v33  ;;  %v1917_v19 = vmul.f32 0.03125, %v1900_v20  ;;  %v1916_v11 = vmul.f32 0.03125, %v1897_v39 }
 0x9e8   :  { %v2006_v53 = vmax.f32 %v1990_v23, 0.0  ;;  %v2005_v31 = vmax.f32 %v1989_v32, 0.0  ;;  %v1959_v60 = vmul.f32 %v4823_v61, %v1917_v19  ;;  %v1958_v62 = vmul.f32 %v4823_v61, %v1916_v11 }
 0x9e9   :  { %v1894_v28 = vpop.xlane.xlu1 %1893  ;;  %v1891_v3 = vpop.xlane.xlu0 %1890 }
 0x9ea   :  { %v2021_v47 = vpack.c.bf16 %v2006_v53, %v2005_v31  ;;  %v1915_v46 = vmul.f32 0.03125, %v1894_v28  ;;  %v1914_v26 = vmul.f32 0.03125, %v1891_v3 }
 0x9ec   :  { %3907 = vmatprep.mubr.msk.bf16.mxu1 %vm666_vm3, %v2021_v47  ;;  %v1957_v34 = vmul.f32 %v4823_v61, %v1915_v46  ;;  %v1956_v48 = vmul.f32 %v4823_v61, %v1914_v26  ;;  %v4090_v26 = vld [vmem:[#allocation2 + $0x108] sm:$0xff]  }
 0x9ed   :  { %v1846_v38 = vpop.xlane.xlu1 %1845  ;;  %3908 = vmatmul.mubr.msk.bf16.gmra.mrb[96].mxu1 %vm666_vm3, %v2022_v41  ;;  %v1843_v44 = vpop.xlane.xlu0 %1842  ;;  %3917 = vmatprep.subr.bf16.mxu0 %v4090_v26 }
 0x9ee   :  { %v1936_v59 = vmul.f32 %v4828_v6, %v1846_v38  ;;  %v1935_v1 = vmul.f32 %v4828_v6, %v1843_v44  ;;  %3918 = vmatpush3.bf16.msra.mxu0 %v4090_v26 }
 0x9f0   :  { %v1973_v58 = vadd.f32 %v1957_v34, %v1936_v59  ;;  %v1972_v18 = vadd.f32 %v1956_v48, %v1935_v1 }
 0x9f1   :  { %v1852_v55 = vpop.xlane.xlu1 %1851  ;;  %v1849_v63 = vpop.xlane.xlu0 %1848 }
 0x9f2   :  { %v1994_v33 = vadd.f32 %v4839_v30, %v1973_v58  ;;  %v1993_v20 = vadd.f32 %v4839_v30, %v1972_v18  ;;  %v1938_v39 = vmul.f32 %v4828_v6, %v1852_v55  ;;  %v1937_v23 = vmul.f32 %v4828_v6, %v1849_v63  ;;  %v3380_v6 = vld [vmem:[%s5332_s3 + $0xb] ss:$0 sm:$0xff] }
 0x9f4   :  { %v2010_v32 = vmax.f32 %v1994_v33, 0.0  ;;  %v2009_v51 = vmax.f32 %v1993_v20, 0.0  ;;  %v1975_v29 = vadd.f32 %v1959_v60, %v1938_v39  ;;  %v1974_v53 = vadd.f32 %v1958_v62, %v1937_v23 }
 0x9f6   :  { %v2023_v31 = vpack.c.bf16 %v2010_v32, %v2009_v51  ;;  %v1996_v28 = vadd.f32 %v4839_v30, %v1975_v29  ;;  %v1995_v3 = vadd.f32 %v4839_v30, %v1974_v53 }
 0x9f8   :  { %v2012_v61 = vmax.f32 %v1996_v28, 0.0  ;;  %v2011_v47 = vmax.f32 %v1995_v3, 0.0  ;;  %3911 = vmatprep.mubr.msk.bf16.mxu1 %vm666_vm3, %v2023_v31 }
 0x9fa   :  { %v2024_v46 = vpack.c.bf16 %v2012_v61, %v2011_v47 }
 0x9fc   :  { %3912 = vmatmul.mubr.msk.bf16.gmra.mrb[100].mxu1 %vm666_vm3, %v2024_v46 }
 0xaa2   :  { %v3901_v41 = vpop.f32.mrb[88].mxu1 }
 0xaa3   :  { %v2109_v19 = vadd.f32 %v3901_v41, %v3380_v6  ;;  %v2100_v11 = vpop.f32.mrb[89].mxu1 }
 0xaa4   :  { %v2101_v38 = vadd.f32 %v3380_v6, %v2100_v11  ;;  %v3902_v44 = vpop.f32.mrb[90].mxu1 }
 0xaa5   :  { %v2112_v30 = vadd.f32 %v3902_v44, %v3380_v6  ;;  %v2103_v34 = vpop.f32.mrb[91].mxu1  ;;  %v2165_v59 = vmax.f32 %v2109_v19, 0.0 }
 0xaa6   :  { %v2104_v48 = vadd.f32 %v3380_v6, %v2103_v34  ;;  %v2163_v58 = vmax.f32 %v2101_v38, 0.0 }
 0xaa7   :  { %v2166_v1 = vmax.f32 %v2112_v30, 0.0 }
 0xaa8   :  { %v2164_v18 = vmax.f32 %v2104_v48, 0.0 }
 0xaa9   :  { %v2184_v60 = vpack.c.bf16 %v2166_v1, %v2165_v59 }
 0xaaa   :  { %v2183_v62 = vpack.c.bf16 %v2164_v18, %v2163_v58 }
 0xaac   :  { %3919 = vmatprep.mubr.msk.bf16.mxu0 %vm666_vm3, %v2183_v62 }
 0xaad   :  { %3920 = vmatmul.mubr.msk.bf16.vlgmr.msra.gmra.mrb[76].mxu0 %vm666_vm3, %v2184_v60 }
 0xab0   :  { %v3905_v55 = vpop.f32.mrb[92].mxu1 }
 0xab1   :  { %v2125_v63 = vadd.f32 %v3905_v55, %v3380_v6  ;;  %v2116_v33 = vpop.f32.mrb[93].mxu1 }
 0xab2   :  { %v2117_v20 = vadd.f32 %v3380_v6, %v2116_v33  ;;  %v3906_v39 = vpop.f32.mrb[94].mxu1 }
 0xab3   :  { %v2128_v23 = vadd.f32 %v3906_v39, %v3380_v6  ;;  %v2119_v32 = vpop.f32.mrb[95].mxu1  ;;  %v2169_v29 = vmax.f32 %v2125_v63, 0.0 }
 0xab4   :  { %v2120_v51 = vadd.f32 %v3380_v6, %v2119_v32  ;;  %v2167_v31 = vmax.f32 %v2117_v20, 0.0 }
 0xab5   :  { %v2170_v53 = vmax.f32 %v2128_v23, 0.0 }
 0xab6   :  { %v2168_v28 = vmax.f32 %v2120_v51, 0.0 }
 0xab7   :  { %v2186_v3 = vpack.c.bf16 %v2170_v53, %v2169_v29 }
 0xab8   :  { %v2185_v61 = vpack.c.bf16 %v2168_v28, %v2167_v31  ;;  %v4905_v28 = vld [vmem:[%s5329_s0] sm:$0xff]  }
 0xaba   :  { %3923 = vmatprep.mubr.msk.bf16.mxu0 %vm666_vm3, %v2185_v61 }
 0xabb   :  { %3924 = vmatmul.mubr.msk.bf16.gmra.mrb[80].mxu0 %vm666_vm3, %v2186_v3  ;;  %v4260_v3 = vmov 0  }
 0xabc   :  { %4049 = vset.pattern.permute.xlu1 %v4260_v3  ;;  %4048 = vset.pattern.permute.xlu0 %v4260_v3 }
 0xac0   :  { %v3909_v47 = vpop.f32.mrb[96].mxu1 }
 0xac1   :  { %v2141_v46 = vadd.f32 %v3909_v47, %v3380_v6  ;;  %v2132_v26 = vpop.f32.mrb[97].mxu1 }
 0xac2   :  { %v2133_v41 = vadd.f32 %v3380_v6, %v2132_v26  ;;  %v3910_v19 = vpop.f32.mrb[98].mxu1 }
 0xac3   :  { %v2144_v11 = vadd.f32 %v3910_v19, %v3380_v6  ;;  %v2135_v38 = vpop.f32.mrb[99].mxu1  ;;  %v2173_v30 = vmax.f32 %v2141_v46, 0.0 }
 0xac4   :  { %v2136_v44 = vadd.f32 %v3380_v6, %v2135_v38  ;;  %v2171_v48 = vmax.f32 %v2133_v41, 0.0 }
 0xac5   :  { %v2174_v34 = vmax.f32 %v2144_v11, 0.0 }
 0xac6   :  { %v2172_v59 = vmax.f32 %v2136_v44, 0.0 }
 0xac7   :  { %v2188_v1 = vpack.c.bf16 %v2174_v34, %v2173_v30 }
 0xac8   :  { %v2187_v58 = vpack.c.bf16 %v2172_v59, %v2171_v48 }
 0xaca   :  { %3927 = vmatprep.mubr.msk.bf16.mxu0 %vm666_vm3, %v2187_v58 }
 0xacb   :  { %3928 = vmatmul.mubr.msk.bf16.gmra.mrb[84].mxu0 %vm666_vm3, %v2188_v1 }
 0xacf   :  { %v3913_v18 = vpop.f32.mrb[100].mxu1 }
 0xad0   :  { %v2157_v60 = vadd.f32 %v3913_v18, %v3380_v6  ;;  %v2148_v62 = vpop.f32.mrb[101].mxu1 }
 0xad1   :  { %v2149_v55 = vadd.f32 %v3380_v6, %v2148_v62  ;;  %v3914_v63 = vpop.f32.mrb[102].mxu1 }
 0xad2   :  { %v2160_v33 = vadd.f32 %v3914_v63, %v3380_v6  ;;  %v2151_v20 = vpop.f32.mrb[103].mxu1  ;;  %v2177_v23 = vmax.f32 %v2157_v60, 0.0 }
 0xad3   :  { %v2152_v39 = vadd.f32 %v3380_v6, %v2151_v20  ;;  %v2175_v51 = vmax.f32 %v2149_v55, 0.0  ;;  %v4911_v6 = vld [vmem:[%s5332_s3 + $0xc] ss:$0 sm:$0xff] }
 0xad4   :  { %v2178_v32 = vmax.f32 %v2160_v33, 0.0 }
 0xad5   :  { %v2176_v29 = vmax.f32 %v2152_v39, 0.0 }
 0xad6   :  { %v2190_v53 = vpack.c.bf16 %v2178_v32, %v2177_v23 }
 0xad7   :  { %v2189_v31 = vpack.c.bf16 %v2176_v29, %v2175_v51 }
 0xad9   :  { %3931 = vmatprep.mubr.msk.bf16.mxu0 %vm666_vm3, %v2189_v31 }
 0xada   :  { %3932 = vmatmul.mubr.msk.bf16.gmra.mrb[88].mxu0 %vm666_vm3, %v2190_v53 }
 0xadb   :  { %3971 = vmatprep.mubr.bf16.mxu0 %v4905_v28 }
 0xb80   :  { %v3921_v61 = vpop.f32.mrb[76].mxu0 }
 0xb81   :  { %v2275_v47 = vadd.f32 %v3921_v61, %v4911_v6  ;;  %v2266_v46 = vpop.f32.mrb[77].mxu0 }
 0xb82   :  { %v2267_v26 = vadd.f32 %v4911_v6, %v2266_v46  ;;  %v3922_v41 = vpop.f32.mrb[78].mxu0 }
 0xb83   :  { %v3404_v19 = vmul.f32 -1.442695, %v2275_v47  ;;  %v2278_v11 = vadd.f32 %v3922_v41, %v4911_v6  ;;  %v2269_v38 = vpop.f32.mrb[79].mxu0  ;;  %v4091_v41 = vld [vmem:[#allocation2 + $0x110] sm:$0xff]  }
 0xb84   :  { %v3402_v44 = vmul.f32 -1.442695, %v2267_v26  ;;  %v2270_v30 = vadd.f32 %v4911_v6, %v2269_v38  ;;  %3935 = vmatprep.subr.bf16.mxu1 %v4091_v41 }
 0xb85   :  { %4095 = vpow2.f32 %v3404_v19  ;;  %v3405_v34 = vmul.f32 -1.442695, %v2278_v11  ;;  %3936 = vmatpush3.bf16.msra.mxu1 %v4091_v41 }
 0xb86   :  { %4097 = vpow2.f32 %v3402_v44  ;;  %v3403_v48 = vmul.f32 -1.442695, %v2270_v30 }
 0xb87   :  { %4099 = vpow2.f32 %v3405_v34 }
 0xb88   :  { %4101 = vpow2.f32 %v3403_v48 }
 0xb8e   :  { %v3925_v59 = vpop.f32.mrb[80].mxu0 }
 0xb8f   :  { %v4096_v1 = vpop.eup %4095  ;;  %v2291_v58 = vadd.f32 %v3925_v59, %v4911_v6  ;;  %v2282_v18 = vpop.f32.mrb[81].mxu0 }
 0xb90   :  { %v4098_v60 = vpop.eup %4097  ;;  %v2379_v62 = vadd.f32 1.0, %v4096_v1  ;;  %v2283_v55 = vadd.f32 %v4911_v6, %v2282_v18  ;;  %v3926_v63 = vpop.f32.mrb[82].mxu0 }
 0xb91   :  { %v4100_v33 = vpop.eup %4099  ;;  %v2377_v20 = vadd.f32 1.0, %v4098_v60  ;;  %v2285_v39 = vpop.f32.mrb[83].mxu0  ;;  %v3408_v51 = vmul.f32 -1.442695, %v2291_v58  ;;  %v2294_v3 = vadd.f32 %v3926_v63, %v4911_v6 }
 0xb92   :  { %v4102_v23 = vpop.eup %4101  ;;  %4103 = vrcp.f32 %v2379_v62  ;;  %v2380_v32 = vadd.f32 1.0, %v4100_v33  ;;  %v2286_v29 = vadd.f32 %v4911_v6, %v2285_v39  ;;  %v3406_v53 = vmul.f32 -1.442695, %v2283_v55 }
 0xb93   :  { %4105 = vrcp.f32 %v2377_v20  ;;  %v2378_v31 = vadd.f32 1.0, %v4102_v23  ;;  %v3409_v47 = vmul.f32 -1.442695, %v2294_v3 }
 0xb94   :  { %4107 = vrcp.f32 %v2380_v32  ;;  %v3407_v61 = vmul.f32 -1.442695, %v2286_v29 }
 0xb95   :  { %4109 = vpow2.f32 %v3408_v51  ;;  %v4092_v51 = vld [vmem:[#allocation2 + $0x118] sm:$0xff]  }
 0xb96   :  { %4111 = vpow2.f32 %v3406_v53  ;;  %3937 = vmatprep.subr.bf16.mxu1 %v4092_v51 }
 0xb97   :  { %4113 = vrcp.f32 %v2378_v31  ;;  %3938 = vmatpush3.bf16.msra.mxu1 %v4092_v51 }
 0xb98   :  { %4115 = vpow2.f32 %v3407_v61 }
 0xb99   :  { %4117 = vpow2.f32 %v3409_v47 }
 0xb9c   :  { %v4104_v46 = vpop.eup %4103 }
 0xb9d   :  { %v4106_v26 = vpop.eup %4105  ;;  %2437 = vperm.xlu1 %4049, %v4104_v46  }
 0xb9e   :  { %2427 = vperm.xlu0 %4048, %v4106_v26   ;;  %v3929_v19 = vpop.f32.mrb[84].mxu0  ;;  %v4108_v11 = vpop.eup %4107 }
 0xb9f   :  { %v2307_v38 = vadd.f32 %v3929_v19, %v4911_v6  ;;  %v2298_v44 = vpop.f32.mrb[85].mxu0  ;;  %v4110_v30 = vpop.eup %4109 }
 0xba0   :  { %v2299_v34 = vadd.f32 %v4911_v6, %v2298_v44  ;;  %v3930_v48 = vpop.f32.mrb[86].mxu0  ;;  %v4112_v59 = vpop.eup %4111  ;;  %v2383_v1 = vadd.f32 1.0, %v4110_v30 }
 0xba1   :  { %v2310_v58 = vadd.f32 %v3930_v48, %v4911_v6  ;;  %2442 = vperm.xlu1 %4049, %v4108_v11   ;;  %v2301_v18 = vpop.f32.mrb[87].mxu0  ;;  %v2381_v60 = vadd.f32 1.0, %v4112_v59  ;;  %v4114_v55 = vpop.eup %4113  ;;  %v3412_v63 = vmul.f32 -1.442695, %v2307_v38 }
 0xba2   :  { %v2302_v62 = vadd.f32 %v4911_v6, %v2301_v18  ;;  %4119 = vrcp.f32 %v2383_v1  ;;  %v4116_v33 = vpop.eup %4115  ;;  %v3410_v20 = vmul.f32 -1.442695, %v2299_v34 }
 0xba3   :  { %v3413_v39 = vmul.f32 -1.442695, %v2310_v58  ;;  %4121 = vrcp.f32 %v2381_v60  ;;  %v2382_v32 = vadd.f32 1.0, %v4116_v33  ;;  %v4118_v29 = vpop.eup %4117 }
 0xba4   :  { %v3411_v23 = vmul.f32 -1.442695, %v2302_v62  ;;  %4123 = vpow2.f32 %v3412_v63  ;;  %v2384_v53 = vadd.f32 1.0, %v4118_v29 }
 0xba5   :  { %2432 = vperm.xlu1 %4049, %v4114_v55   ;;  %4125 = vpow2.f32 %v3410_v20 }
 0xba6   :  { %4127 = vpow2.f32 %v3413_v39 }
 0xba7   :  { %4129 = vpow2.f32 %v3411_v23 }
 0xba8   :  { %4131 = vrcp.f32 %v2382_v32 }
 0xba9   :  { %4133 = vrcp.f32 %v2384_v53 }
 0xbac   :  { %v4120_v31 = vpop.eup %4119 }
 0xbad   :  { %v3933_v3 = vpop.f32.mrb[88].mxu0  ;;  %2457 = vperm.xlu1 %4049, %v4120_v31   ;;  %v4122_v41 = vpop.eup %4121 }
 0xbae   :  { %v2323_v61 = vadd.f32 %v3933_v3, %v4911_v6  ;;  %v2314_v47 = vpop.f32.mrb[89].mxu0  ;;  %v4124_v44 = vpop.eup %4123 }
 0xbaf   :  { %v2315_v46 = vadd.f32 %v4911_v6, %v2314_v47  ;;  %v3934_v26 = vpop.f32.mrb[90].mxu0  ;;  %v4126_v48 = vpop.eup %4125  ;;  %v2387_v59 = vadd.f32 1.0, %v4124_v44 }
 0xbb0   :  { %v3416_v19 = vmul.f32 -1.442695, %v2323_v61  ;;  %v2326_v11 = vadd.f32 %v3934_v26, %v4911_v6  ;;  %v2317_v38 = vpop.f32.mrb[91].mxu0  ;;  %v4128_v1 = vpop.eup %4127  ;;  %v2385_v58 = vadd.f32 1.0, %v4126_v48 }
 0xbb1   :  { %v3414_v30 = vmul.f32 -1.442695, %v2315_v46  ;;  %v2318_v34 = vadd.f32 %v4911_v6, %v2317_v38  ;;  %2447 = vperm.xlu1 %4049, %v4122_v41   ;;  %v4130_v18 = vpop.eup %4129  ;;  %v2388_v33 = vadd.f32 1.0, %v4128_v1 }
 0xbb2   :  { %4135 = vpow2.f32 %v3416_v19  ;;  %v3417_v60 = vmul.f32 -1.442695, %v2326_v11  ;;  %v4132_v62 = vpop.eup %4131  ;;  %v2386_v55 = vadd.f32 1.0, %v4130_v18 }
 0xbb3   :  { %4137 = vpow2.f32 %v3414_v30  ;;  %v3415_v63 = vmul.f32 -1.442695, %v2318_v34  ;;  %v4134_v20 = vpop.eup %4133 }
 0xbb4   :  { %4139 = vrcp.f32 %v2385_v58 }
 0xbb5   :  { %4141 = vrcp.f32 %v2387_v59  ;;  %2452 = vperm.xlu1 %4049, %v4132_v62  }
 0xbb6   :  { %4143 = vrcp.f32 %v2386_v55 }
 0xbb7   :  { %4145 = vpow2.f32 %v3417_v60 }
 0xbb8   :  { %4147 = vpow2.f32 %v3415_v63 }
 0xbb9   :  { %2462 = vperm.xlu1 %4049, %v4134_v20   ;;  %4149 = vrcp.f32 %v2388_v33 }
 0xbbc   :  { %v4136_v6 = vpop.eup %4135 }
 0xbbd   :  { %v4138_v39 = vpop.eup %4137  ;;  %v2391_v29 = vadd.f32 1.0, %v4136_v6 }
 0xbbe   :  { %v2389_v23 = vadd.f32 1.0, %v4138_v39  ;;  %v4140_v32 = vpop.eup %4139  ;;  %v4093_v39 = vld [vmem:[#allocation2 + $0x120] sm:$0xff]  }
 0xbbf   :  { %v4142_v51 = vpop.eup %4141  ;;  %2467 = vperm.xlu1 %4049, %v4140_v32   ;;  %3987 = vmatprep.subr.bf16.mxu1 %v4093_v39 }
 0xbc0   :  { %4151 = vrcp.f32 %v2389_v23  ;;  %v4144_v53 = vpop.eup %4143 }
 0xbc1   :  { %v4146_v31 = vpop.eup %4145  ;;  %2472 = vperm.xlu0 %4048, %v4144_v53   ;;  %4153 = vrcp.f32 %v2391_v29 }
 0xbc2   :  { %v4148_v3 = vpop.eup %4147  ;;  %v2392_v46 = vadd.f32 1.0, %v4146_v31 }
 0xbc3   :  { %v2390_v61 = vadd.f32 1.0, %v4148_v3  ;;  %2477 = vperm.xlu1 %4049, %v4142_v51   ;;  %v4150_v47 = vpop.eup %4149 }
 0xbc5   :  { %4155 = vrcp.f32 %v2390_v61  ;;  %2482 = vperm.xlu0 %4048, %v4150_v47  }
 0xbc6   :  { %4157 = vrcp.f32 %v2392_v46 }
 0xbca   :  { %v4152_v26 = vpop.eup %4151 }
 0xbcb   :  { %2487 = vperm.xlu1 %4049, %v4152_v26   ;;  %v4154_v41 = vpop.eup %4153 }
 0xbcf   :  { %2497 = vperm.xlu1 %4049, %v4154_v41   ;;  %v4156_v19 = vpop.eup %4155 }
 0xbd0   :  { %2492 = vperm.xlu0 %4048, %v4156_v19   ;;  %v4158_v11 = vpop.eup %4157 }
 0xbd4   :  { %2502 = vperm.xlu0 %4048, %v4158_v11  }
 0xc1c   :  { %v2438_v38 = vpop.permute.xlu1 %2437 }
 0xc1d   :  { %v2428_v30 = vpop.permute.xlu0 %2427  ;;  %v2507_v58 = vmul.f32 %v2438_v38, %v1443_v15 }
 0xc1e   :  { %v2505_v59 = vmul.f32 %v2428_v30, %v1441_v45 }
 0xc20   :  { %v2443_v44 = vpop.permute.xlu1 %2442 }
 0xc21   :  { %v2508_v34 = vmul.f32 %v2443_v44, %v1444_v0 }
 0xc23   :  { %v2526_v60 = vpack.c.bf16 %v2508_v34, %v2507_v58  ;;  %v4972_v34 = vld [vmem:[%s5329_s0 + $0x8] sm:$0xff]  }
 0xc24   :  { %v2433_v48 = vpop.permute.xlu1 %2432  ;;  %v4996_v58 = vld [vmem:[%s5329_s0 + $0x28] sm:$0xff]  }
 0xc25   :  { %v2506_v1 = vmul.f32 %v2433_v48, %v1442_v10  ;;  %v4978_v48 = vld [vmem:[%s5329_s0 + $0x10] sm:$0xff]  }
 0xc27   :  { %v2525_v18 = vpack.c.bf16 %v2506_v1, %v2505_v59  ;;  %v4984_v59 = vld [vmem:[%s5329_s0 + $0x18] sm:$0xff]   ;;  %v4990_v1 = vld [vmem:[%s5329_s0 + $0x20] sm:$0xff]  }
 0xc29   :  { %3939 = vmatprep.mubr.msk.bf16.mxu1 %vm666_vm3, %v2525_v18  ;;  %v5002_v18 = vld [vmem:[%s5329_s0 + $0x30] sm:$0xff]  }
 0xc2a   :  { %3940 = vmatmul.mubr.msk.bf16.vlgmr.msra.gmra.mrb[104].mxu1 %vm666_vm3, %v2526_v60  ;;  %v5008_v60 = vld [vmem:[%s5329_s0 + $0x38] sm:$0xff]  }
 0xc2b   :  { %3988 = vmatpush3.bf16.msra.mxu1 %v4093_v39 }
 0xc2c   :  { %v2458_v62 = vpop.permute.xlu1 %2457  ;;  %3989 = vmatprep.subr.bf16.mxu1 %v4094_v24 }
 0xc2d   :  { %v2511_v12 = vmul.f32 %v2458_v62, %v1447_v22 }
 0xc2f   :  { %3990 = vmatpush3.bf16.msra.mxu1 %v4094_v24 }
 0xc30   :  { %v2448_v55 = vpop.permute.xlu1 %2447 }
 0xc31   :  { %v2509_v0 = vmul.f32 %v2448_v55, %v1445_v35  ;;  %v3428_v55 = vld [vmem:[%s5332_s3 + $0xd] ss:$0 sm:$0xff] }
 0xc34   :  { %v2453_v14 = vpop.permute.xlu1 %2452 }
 0xc35   :  { %v2510_v4 = vmul.f32 %v2453_v14, %v1446_v37 }
 0xc37   :  { %v2527_v45 = vpack.c.bf16 %v2510_v4, %v2509_v0 }
 0xc38   :  { %v2463_v2 = vpop.permute.xlu1 %2462 }
 0xc39   :  { %v2512_v15 = vmul.f32 %v2463_v2, %v1448_v36  ;;  %3943 = vmatprep.mubr.msk.bf16.mxu1 %vm666_vm3, %v2527_v45 }
 0xc3b   :  { %v2528_v10 = vpack.c.bf16 %v2512_v15, %v2511_v12 }
 0xc3d   :  { %3944 = vmatmul.mubr.msk.bf16.gmra.mrb[108].mxu1 %vm666_vm3, %v2528_v10 }
 0xc3e   :  { %v2468_v63 = vpop.permute.xlu1 %2467 }
 0xc3f   :  { %v2513_v52 = vmul.f32 %v2468_v63, %v1449_v49 }
 0xc40   :  { %v2473_v33 = vpop.permute.xlu0 %2472 }
 0xc41   :  { %v2514_v35 = vmul.f32 %v2473_v33, %v1450_v40 }
 0xc42   :  { %v2478_v7 = vpop.permute.xlu1 %2477 }
 0xc43   :  { %v2529_v37 = vpack.c.bf16 %v2514_v35, %v2513_v52  ;;  %v2515_v56 = vmul.f32 %v2478_v7, %v1451_v43 }
 0xc44   :  { %v2483_v42 = vpop.permute.xlu0 %2482 }
 0xc45   :  { %v2516_v22 = vmul.f32 %v2483_v42, %v1452_v50  ;;  %3947 = vmatprep.mubr.msk.bf16.mxu1 %vm666_vm3, %v2529_v37 }
 0xc47   :  { %v2530_v36 = vpack.c.bf16 %v2516_v22, %v2515_v56 }
 0xc49   :  { %3948 = vmatmul.mubr.msk.bf16.gmra.mrb[112].mxu1 %vm666_vm3, %v2530_v36 }
 0xc4a   :  { %v2488_v20 = vpop.permute.xlu1 %2487 }
 0xc4b   :  { %v2517_v49 = vmul.f32 %v2488_v20, %v1453_v13 }
 0xc4e   :  { %v2498_v40 = vpop.permute.xlu1 %2497 }
 0xc4f   :  { %v2493_v9 = vpop.permute.xlu0 %2492  ;;  %v2519_v27 = vmul.f32 %v2498_v40, %v1455_v57 }
 0xc50   :  { %v2518_v16 = vmul.f32 %v2493_v9, %v1454_v54 }
 0xc52   :  { %v2531_v6 = vpack.c.bf16 %v2518_v16, %v2517_v49 }
 0xc53   :  { %v2503_v8 = vpop.permute.xlu0 %2502 }
 0xc54   :  { %v2520_v43 = vmul.f32 %v2503_v8, %v1456_v17  ;;  %3951 = vmatprep.mubr.msk.bf16.mxu1 %vm666_vm3, %v2531_v6 }
 0xc56   :  { %v2532_v50 = vpack.c.bf16 %v2520_v43, %v2519_v27 }
 0xc58   :  { %3952 = vmatmul.mubr.msk.bf16.gmra.mrb[116].mxu1 %vm666_vm3, %v2532_v50 }
 0xcfd   :  { %v3941_v13 = vpop.f32.mrb[104].mxu1 }
 0xcfe   :  { %v2603_v21 = vpop.f32.mrb[105].mxu1 }
 0xcff   :  { %v3942_v54 = vpop.f32.mrb[106].mxu1 }
 0xd00   :  { %v2667_v23 = vpack.c.bf16 %v3942_v54, %v3941_v13  ;;  %v2606_v25 = vpop.f32.mrb[107].mxu1 }
 0xd01   :  { %v2666_v57 = vpack.c.bf16 %v2606_v25, %v2603_v21 }
 0xd03   :  { %3955 = vmatprep.subr.bf16.mxu0 %v2666_v57 }
 0xd04   :  { %3956 = vmatpush3.bf16.msra.mxu0 %v2666_v57 }
 0xd05   :  { %3957 = vmatprep.subr.bf16.mxu0 %v2667_v23 }
 0xd08   :  { %3958 = vmatpush3.bf16.msra.mxu0 %v2667_v23 }
 0xd10   :  { %v3945_v5 = vpop.f32.mrb[108].mxu1 }
 0xd11   :  { %v2619_v17 = vpop.f32.mrb[109].mxu1 }
 0xd12   :  { %v3946_v32 = vpop.f32.mrb[110].mxu1 }
 0xd13   :  { %v2669_v51 = vpack.c.bf16 %v3946_v32, %v3945_v5  ;;  %v2622_v29 = vpop.f32.mrb[111].mxu1 }
 0xd14   :  { %v2668_v53 = vpack.c.bf16 %v2622_v29, %v2619_v17 }
 0xd16   :  { %3959 = vmatprep.subr.bf16.mxu0 %v2668_v53 }
 0xd17   :  { %3960 = vmatpush3.bf16.msra.mxu0 %v2668_v53 }
 0xd18   :  { %3961 = vmatprep.subr.bf16.mxu0 %v2669_v51 }
 0xd1b   :  { %3962 = vmatpush3.bf16.msra.mxu0 %v2669_v51 }
 0xd1c   :  { %v3949_v31 = vpop.f32.mrb[112].mxu1 }
 0xd1d   :  { %v2635_v3 = vpop.f32.mrb[113].mxu1 }
 0xd1e   :  { %v3950_v61 = vpop.f32.mrb[114].mxu1 }
 0xd1f   :  { %v2671_v47 = vpack.c.bf16 %v3950_v61, %v3949_v31  ;;  %v2638_v46 = vpop.f32.mrb[115].mxu1 }
 0xd20   :  { %v2670_v26 = vpack.c.bf16 %v2638_v46, %v2635_v3 }
 0xd22   :  { %3963 = vmatprep.subr.bf16.mxu0 %v2670_v26 }
 0xd23   :  { %3964 = vmatpush3.bf16.msra.mxu0 %v2670_v26 }
 0xd24   :  { %3965 = vmatprep.subr.bf16.mxu0 %v2671_v47 }
 0xd27   :  { %3966 = vmatpush3.bf16.msra.mxu0 %v2671_v47 }
 0xd2b   :  { %v3953_v41 = vpop.f32.mrb[116].mxu1 }
 0xd2c   :  { %v2651_v19 = vpop.f32.mrb[117].mxu1 }
 0xd2d   :  { %v3954_v11 = vpop.f32.mrb[118].mxu1 }
 0xd2e   :  { %v2673_v38 = vpack.c.bf16 %v3954_v11, %v3953_v41  ;;  %v2654_v44 = vpop.f32.mrb[119].mxu1 }
 0xd2f   :  { %v2672_v30 = vpack.c.bf16 %v2654_v44, %v2651_v19 }
 0xd31   :  { %3967 = vmatprep.subr.bf16.mxu0 %v2672_v30 }
 0xd32   :  { %3968 = vmatpush3.bf16.msra.mxu0 %v2672_v30 }
 0xd33   :  { %3969 = vmatprep.subr.bf16.mxu0 %v2673_v38 }
 0xd36   :  { %3970 = vmatpush3.bf16.msra.mxu0 %v2673_v38 }
 0xd39   :  { %3972 = vmatmul.mubr.bf16.vlgmr.msra.gmra.mrb[92].mxu0 %v4972_v34 }
 0xd3a   :  { %3975 = vmatprep.mubr.bf16.mxu0 %v4978_v48 }
 0xd41   :  { %3976 = vmatmul.mubr.bf16.gmra.mrb[96].mxu0 %v4984_v59 }
 0xd42   :  { %3979 = vmatprep.mubr.bf16.mxu0 %v4990_v1 }
 0xd49   :  { %3980 = vmatmul.mubr.bf16.gmra.mrb[100].mxu0 %v4996_v58 }
 0xd4a   :  { %3983 = vmatprep.mubr.bf16.mxu0 %v5002_v18 }
 0xd51   :  { %3984 = vmatmul.mubr.bf16.gmra.mrb[104].mxu0 %v5008_v60 }
 0xd52   :  { %4023 = vmatprep.mubr.bf16.mxu0 %v4905_v28 }
 0xe0c   :  { %v3973_v62 = vpop.f32.mrb[92].mxu0 }
 0xe0d   :  { %v2713_v14 = vpop.f32.mrb[93].mxu0  ;;  %v2722_v4 = vadd.f32 %v3973_v62, %v3428_v55 }
 0xe0e   :  { %v3974_v0 = vpop.f32.mrb[94].mxu0  ;;  %v2714_v12 = vadd.f32 %v3428_v55, %v2713_v14 }
 0xe0f   :  { %v2725_v45 = vadd.f32 %v3974_v0, %v3428_v55  ;;  %v2716_v2 = vpop.f32.mrb[95].mxu0 }
 0xe10   :  { %v2717_v15 = vadd.f32 %v3428_v55, %v2716_v2 }
 0xe11   :  { %v2781_v10 = vpack.c.bf16 %v2725_v45, %v2722_v4 }
 0xe12   :  { %v2780_v63 = vpack.c.bf16 %v2717_v15, %v2714_v12  ;;  %v5033_v15 = vld [vmem:[%s5332_s3 + $0xe] ss:$0 sm:$0xff] }
 0xe14   :  { %v3977_v33 = vpop.f32.mrb[96].mxu0  ;;  %3991 = vmatprep.mubr.msk.bf16.mxu1 %vm666_vm3, %v2780_v63 }
 0xe15   :  { %v2729_v52 = vpop.f32.mrb[97].mxu0  ;;  %3992 = vmatmul.mubr.msk.bf16.vlgmr.msra.gmra.mrb[120].mxu1 %vm666_vm3, %v2781_v10  ;;  %v2738_v35 = vadd.f32 %v3977_v33, %v3428_v55 }
 0xe16   :  { %v3978_v28 = vpop.f32.mrb[98].mxu0  ;;  %v2730_v42 = vadd.f32 %v3428_v55, %v2729_v52 }
 0xe17   :  { %v2741_v7 = vadd.f32 %v3978_v28, %v3428_v55  ;;  %v2732_v37 = vpop.f32.mrb[99].mxu0 }
 0xe18   :  { %v2733_v56 = vadd.f32 %v3428_v55, %v2732_v37 }
 0xe19   :  { %v2783_v22 = vpack.c.bf16 %v2741_v7, %v2738_v35 }
 0xe1a   :  { %v2782_v36 = vpack.c.bf16 %v2733_v56, %v2730_v42 }
 0xe1c   :  { %v3981_v20 = vpop.f32.mrb[100].mxu0  ;;  %3995 = vmatprep.mubr.msk.bf16.mxu1 %vm666_vm3, %v2782_v36 }
 0xe1d   :  { %v2745_v9 = vpop.f32.mrb[101].mxu0  ;;  %3996 = vmatmul.mubr.msk.bf16.gmra.mrb[124].mxu1 %vm666_vm3, %v2783_v22  ;;  %v2754_v16 = vadd.f32 %v3981_v20, %v3428_v55 }
 0xe1e   :  { %v3982_v49 = vpop.f32.mrb[102].mxu0  ;;  %v2746_v8 = vadd.f32 %v3428_v55, %v2745_v9 }
 0xe1f   :  { %v2757_v40 = vadd.f32 %v3982_v49, %v3428_v55  ;;  %v2748_v6 = vpop.f32.mrb[103].mxu0 }
 0xe20   :  { %v2749_v27 = vadd.f32 %v3428_v55, %v2748_v6 }
 0xe21   :  { %v2785_v43 = vpack.c.bf16 %v2757_v40, %v2754_v16 }
 0xe22   :  { %v2784_v50 = vpack.c.bf16 %v2749_v27, %v2746_v8 }
 0xe24   :  { %v3985_v39 = vpop.f32.mrb[104].mxu0  ;;  %3999 = vmatprep.mubr.msk.bf16.mxu1 %vm666_vm3, %v2784_v50 }
 0xe25   :  { %v2761_v24 = vpop.f32.mrb[105].mxu0  ;;  %4000 = vmatmul.mubr.msk.bf16.gmra.mrb[128].mxu1 %vm666_vm3, %v2785_v43  ;;  %v2770_v21 = vadd.f32 %v3985_v39, %v3428_v55 }
 0xe26   :  { %v3986_v13 = vpop.f32.mrb[106].mxu0  ;;  %v2762_v25 = vadd.f32 %v3428_v55, %v2761_v24 }
 0xe27   :  { %v2773_v54 = vadd.f32 %v3986_v13, %v3428_v55  ;;  %v2764_v23 = vpop.f32.mrb[107].mxu0 }
 0xe28   :  { %v2765_v57 = vadd.f32 %v3428_v55, %v2764_v23 }
 0xe29   :  { %v2787_v5 = vpack.c.bf16 %v2773_v54, %v2770_v21 }
 0xe2a   :  { %v2786_v17 = vpack.c.bf16 %v2765_v57, %v2762_v25 }
 0xe2c   :  { %4003 = vmatprep.mubr.msk.bf16.mxu1 %vm666_vm3, %v2786_v17 }
 0xe2d   :  { %4004 = vmatmul.mubr.msk.bf16.gmra.mrb[132].mxu1 %vm666_vm3, %v2787_v5 }
 0xee8   :  { %v3993_v32 = vpop.f32.mrb[120].mxu1 }
 0xee9   :  { %v2858_v51 = vpop.f32.mrb[121].mxu1 }
 0xeea   :  { %v3994_v29 = vpop.f32.mrb[122].mxu1 }
 0xeeb   :  { %v2922_v53 = vpack.c.bf16 %v3994_v29, %v3993_v32  ;;  %v2861_v31 = vpop.f32.mrb[123].mxu1 }
 0xeec   :  { %v2921_v3 = vpack.c.bf16 %v2861_v31, %v2858_v51 }
 0xeee   :  { %4007 = vmatprep.subr.bf16.mxu0 %v2921_v3 }
 0xeef   :  { %4008 = vmatpush3.bf16.msra.mxu0 %v2921_v3 }
 0xef0   :  { %v3997_v61 = vpop.f32.mrb[124].mxu1  ;;  %4009 = vmatprep.subr.bf16.mxu0 %v2922_v53 }
 0xef1   :  { %v2874_v47 = vpop.f32.mrb[125].mxu1 }
 0xef2   :  { %v3998_v46 = vpop.f32.mrb[126].mxu1 }
 0xef3   :  { %v2924_v26 = vpack.c.bf16 %v3998_v46, %v3997_v61  ;;  %v2877_v41 = vpop.f32.mrb[127].mxu1  ;;  %4010 = vmatpush3.bf16.msra.mxu0 %v2922_v53 }
 0xef4   :  { %v2923_v19 = vpack.c.bf16 %v2877_v41, %v2874_v47 }
 0xef6   :  { %4011 = vmatprep.subr.bf16.mxu0 %v2923_v19 }
 0xef7   :  { %4012 = vmatpush3.bf16.msra.mxu0 %v2923_v19 }
 0xef8   :  { %v4001_v11 = vpop.f32.mrb[128].mxu1  ;;  %4013 = vmatprep.subr.bf16.mxu0 %v2924_v26 }
 0xef9   :  { %v2890_v38 = vpop.f32.mrb[129].mxu1 }
 0xefa   :  { %v4002_v44 = vpop.f32.mrb[130].mxu1 }
 0xefb   :  { %v2926_v30 = vpack.c.bf16 %v4002_v44, %v4001_v11  ;;  %v2893_v62 = vpop.f32.mrb[131].mxu1  ;;  %4014 = vmatpush3.bf16.msra.mxu0 %v2924_v26 }
 0xefc   :  { %v2925_v55 = vpack.c.bf16 %v2893_v62, %v2890_v38 }
 0xefe   :  { %4015 = vmatprep.subr.bf16.mxu0 %v2925_v55 }
 0xeff   :  { %4016 = vmatpush3.bf16.msra.mxu0 %v2925_v55 }
 0xf00   :  { %v4005_v14 = vpop.f32.mrb[132].mxu1  ;;  %4017 = vmatprep.subr.bf16.mxu0 %v2926_v30 }
 0xf01   :  { %v2906_v0 = vpop.f32.mrb[133].mxu1 }
 0xf02   :  { %v4006_v4 = vpop.f32.mrb[134].mxu1 }
 0xf03   :  { %v2928_v45 = vpack.c.bf16 %v4006_v4, %v4005_v14  ;;  %v2909_v2 = vpop.f32.mrb[135].mxu1  ;;  %4018 = vmatpush3.bf16.msra.mxu0 %v2926_v30 }
 0xf04   :  { %v2927_v12 = vpack.c.bf16 %v2909_v2, %v2906_v0 }
 0xf06   :  { %4019 = vmatprep.subr.bf16.mxu0 %v2927_v12 }
 0xf07   :  { %4020 = vmatpush3.bf16.msra.mxu0 %v2927_v12 }
 0xf08   :  { %4021 = vmatprep.subr.bf16.mxu0 %v2928_v45 }
 0xf0b   :  { %4022 = vmatpush3.bf16.msra.mxu0 %v2928_v45 }
 0xf0e   :  { %4024 = vmatmul.mubr.bf16.vlgmr.msra.gmra.mrb[108].mxu0 %v4972_v34 }
 0xf0f   :  { %4027 = vmatprep.mubr.bf16.mxu0 %v4978_v48 }
 0xf16   :  { %4028 = vmatmul.mubr.bf16.gmra.mrb[112].mxu0 %v4984_v59 }
 0xf17   :  { %4031 = vmatprep.mubr.bf16.mxu0 %v4990_v1 }
 0xf1e   :  { %4032 = vmatmul.mubr.bf16.gmra.mrb[116].mxu0 %v4996_v58 }
 0xf1f   :  { %4035 = vmatprep.mubr.bf16.mxu0 %v5002_v18 }
 0xf26   :  { %4036 = vmatmul.mubr.bf16.gmra.mrb[120].mxu0 %v5008_v60 }
 0xfe1   :  { %v4025_v10 = vpop.f32.mrb[108].mxu0 }
 0xfe2   :  { %v5036_v34 = vadd.f32 %v4025_v10, %v5033_v15  ;;  %v2968_v48 = vpop.f32.mrb[109].mxu0 }
 0xfe3   :  { %v5039_v59 = vadd.f32 %v5033_v15, %v2968_v48  ;;  %v4026_v1 = vpop.f32.mrb[110].mxu0 }
 0xfe4   :  { %v5042_v58 = vadd.f32 %v4026_v1, %v5033_v15  ;;  %v2971_v18 = vpop.f32.mrb[111].mxu0  ;;  %v3033_v60 = vmul.f32 %v5036_v34, %v5036_v34 }
 0xfe5   :  { %v5047_v63 = vadd.f32 %v5033_v15, %v2971_v18  ;;  %v3031_v33 = vmul.f32 %v5039_v59, %v5039_v59 }
 0xfe6   :  { %v3053_v52 = vsel %vm231_vm1, %v3033_v60, 0.0  ;;  %v3034_v7 = vmul.f32 %v5042_v58, %v5042_v58 }
 0xfe7   :  { %3054 = vadd.xlane.f32.xlu0 %v3053_v52  ;;  %v3047_v28 = vsel %vm231_vm1, %v3031_v33, 0.0  ;;  %v3032_v35 = vmul.f32 %v5047_v63, %v5047_v63 }
 0xfe8   :  { %3048 = vadd.xlane.f32.xlu1 %v3047_v28  ;;  %v3056_v9 = vsel %vm231_vm1, %v3034_v7, 0.0 }
 0xfe9   :  { %v4029_v37 = vpop.f32.mrb[112].mxu0  ;;  %v3050_v42 = vsel %vm231_vm1, %v3032_v35, 0.0 }
 0xfea   :  { %v5059_v56 = vadd.f32 %v4029_v37, %v5033_v15  ;;  %v2984_v22 = vpop.f32.mrb[113].mxu0 }
 0xfeb   :  { %v5062_v36 = vadd.f32 %v5033_v15, %v2984_v22  ;;  %v4030_v20 = vpop.f32.mrb[114].mxu0  ;;  %3051 = vadd.xlane.f32.xlu0 %v3050_v42 }
 0xfec   :  { %v5066_v49 = vadd.f32 %v4030_v20, %v5033_v15  ;;  %v2987_v16 = vpop.f32.mrb[115].mxu0  ;;  %3057 = vadd.xlane.f32.xlu1 %v3056_v9  ;;  %v3037_v40 = vmul.f32 %v5059_v56, %v5059_v56 }
 0xfed   :  { %v5071_v6 = vadd.f32 %v5033_v15, %v2987_v16  ;;  %v3035_v43 = vmul.f32 %v5062_v36, %v5062_v36 }
 0xfee   :  { %v3065_v8 = vsel %vm231_vm1, %v3037_v40, 0.0  ;;  %v3038_v27 = vmul.f32 %v5066_v49, %v5066_v49 }
 0xfef   :  { %3066 = vadd.xlane.f32.xlu0 %v3065_v8  ;;  %v3036_v39 = vmul.f32 %v5071_v6, %v5071_v6  ;;  %v3059_v54 = vsel %vm231_vm1, %v3035_v43, 0.0 }
 0xff0   :  { %v3068_v50 = vsel %vm231_vm1, %v3038_v27, 0.0 }
 0xff1   :  { %v4033_v24 = vpop.f32.mrb[116].mxu0  ;;  %3069 = vadd.xlane.f32.xlu1 %v3068_v50  ;;  %v3062_v17 = vsel %vm231_vm1, %v3036_v39, 0.0 }
 0xff2   :  { %v5082_v13 = vadd.f32 %v4033_v24, %v5033_v15  ;;  %v3000_v21 = vpop.f32.mrb[117].mxu0 }
 0xff3   :  { %v5086_v23 = vadd.f32 %v5033_v15, %v3000_v21  ;;  %v4034_v25 = vpop.f32.mrb[118].mxu0  ;;  %3060 = vadd.xlane.f32.xlu0 %v3059_v54 }
 0xff4   :  { %v5089_v57 = vadd.f32 %v4034_v25, %v5033_v15  ;;  %v3003_v5 = vpop.f32.mrb[119].mxu0  ;;  %v3041_v32 = vmul.f32 %v5082_v13, %v5082_v13 }
 0xff5   :  { %v5095_v51 = vadd.f32 %v5033_v15, %v3003_v5  ;;  %3063 = vadd.xlane.f32.xlu1 %v3062_v17  ;;  %v3039_v31 = vmul.f32 %v5086_v23, %v5086_v23 }
 0xff6   :  { %v3077_v29 = vsel %vm231_vm1, %v3041_v32, 0.0  ;;  %v3042_v53 = vmul.f32 %v5089_v57, %v5089_v57 }
 0xff7   :  { %3078 = vadd.xlane.f32.xlu0 %v3077_v29  ;;  %v3040_v61 = vmul.f32 %v5095_v51, %v5095_v51  ;;  %v3071_v26 = vsel %vm231_vm1, %v3039_v31, 0.0 }
 0xff8   :  { %v3080_v3 = vsel %vm231_vm1, %v3042_v53, 0.0 }
 0xff9   :  { %v4037_v47 = vpop.f32.mrb[120].mxu0  ;;  %3081 = vadd.xlane.f32.xlu1 %v3080_v3  ;;  %v3074_v44 = vsel %vm231_vm1, %v3040_v61, 0.0 }
 0xffa   :  { %v3016_v46 = vpop.f32.mrb[121].mxu0  ;;  %v5107_v41 = vadd.f32 %v4037_v47, %v5033_v15 }
 0xffb   :  { %v5110_v19 = vadd.f32 %v5033_v15, %v3016_v46  ;;  %v4038_v11 = vpop.f32.mrb[122].mxu0  ;;  %3072 = vadd.xlane.f32.xlu0 %v3071_v26 }
 0xffc   :  { %v3019_v38 = vpop.f32.mrb[123].mxu0  ;;  %v5114_v30 = vadd.f32 %v4038_v11, %v5033_v15  ;;  %v3045_v4 = vmul.f32 %v5107_v41, %v5107_v41 }
 0xffd   :  { %v5117_v62 = vadd.f32 %v5033_v15, %v3019_v38  ;;  %3075 = vadd.xlane.f32.xlu1 %v3074_v44  ;;  %v3043_v55 = vmul.f32 %v5110_v19, %v5110_v19 }
 0xffe   :  { %v3046_v2 = vmul.f32 %v5114_v30, %v5114_v30  ;;  %v3089_v12 = vsel %vm231_vm1, %v3045_v4, 0.0 }
 0xfff   :  { %v3083_v14 = vsel %vm231_vm1, %v3043_v55, 0.0  ;;  %v3044_v0 = vmul.f32 %v5117_v62, %v5117_v62 }
0x1000   :  { %3084 = vadd.xlane.f32.xlu0 %v3083_v14  ;;  %v3092_v15 = vsel %vm231_vm1, %v3046_v2, 0.0 }
0x1001   :  { %v3086_v45 = vsel %vm231_vm1, %v3044_v0, 0.0 }
0x1002   :  { %3087 = vadd.xlane.f32.xlu1 %v3086_v45 }
0x1004   :  { %3090 = vadd.xlane.f32.xlu0 %v3089_v12 }
0x1006   :  { %3093 = vadd.xlane.f32.xlu1 %v3092_v15 }
0x1074   :  { %v3055_v10 = vpop.xlane.xlu0 %3054 }
0x1075   :  { %4159 = vrsqrt.f32 %v3055_v10  ;;  %v3049_v48 = vpop.xlane.xlu1 %3048  ;;  %vm3111_vm6 = vcmp.eq.f32.partialorder %v3055_v10, inf  ;;  %vm3113_vm7 = vcmp.eq.f32.partialorder %v3055_v10, 0.0  ;;  %v3114_v7 = vand.u32 2147483648, %v3055_v10 }
0x1076   :  { %4161 = vrsqrt.f32 %v3049_v48  ;;  %vm3097_vm8 = vcmp.eq.f32.partialorder %v3049_v48, inf  ;;  %vm3099_vm9 = vcmp.eq.f32.partialorder %v3049_v48, 0.0  ;;  %v3100_v22 = vand.u32 2147483648, %v3049_v48 }
0x1078   :  { %v3052_v1 = vpop.xlane.xlu0 %3051 }
0x1079   :  { %4163 = vrsqrt.f32 %v3052_v1  ;;  %v3058_v18 = vpop.xlane.xlu1 %3057  ;;  %vm3104_vm10 = vcmp.eq.f32.partialorder %v3052_v1, inf  ;;  %vm3106_vm11 = vcmp.eq.f32.partialorder %v3052_v1, 0.0  ;;  %v3107_v9 = vand.u32 2147483648, %v3052_v1 }
0x107a   :  { %4165 = vrsqrt.f32 %v3058_v18  ;;  %vm3118_vm12 = vcmp.eq.f32.partialorder %v3058_v18, inf  ;;  %vm3120_vm13 = vcmp.eq.f32.partialorder %v3058_v18, 0.0  ;;  %v3121_v5 = vand.u32 2147483648, %v3058_v18 }
0x107c   :  { %v5131_v60 = vpop.xlane.xlu0 %3066 }
0x107d   :  { %4167 = vrsqrt.f32 %v5131_v60  ;;  %vm3139_vm14 = vcmp.eq.f32.partialorder %v5131_v60, inf  ;;  %vm3141_vm15 = vcmp.eq.f32.partialorder %v5131_v60, 0.0  ;;  %v3142_v3 = vand.u32 2147483648, %v5131_v60 }
0x107e   :  { %v5134_v33 = vpop.xlane.xlu1 %3069 }
0x107f   :  { %v4160_v52 = vpop.eup %4159  ;;  %4169 = vrsqrt.f32 %v5134_v33  ;;  %vm3146_vm0 = vcmp.eq.f32.partialorder %v5134_v33, inf  ;;  %vm3148_vm2 = vcmp.eq.f32.partialorder %v5134_v33, 0.0  ;;  %v3149_v44 = vand.u32 2147483648, %v5134_v33 }
0x1080   :  { %v4162_v28 = vpop.eup %4161  ;;  %v3110_v35 = vmul.f32 %v4160_v52, %v3055_v10  ;;  %v5137_v37 = vpop.xlane.xlu0 %3060 }
0x1081   :  { %v3096_v42 = vmul.f32 %v4162_v28, %v3049_v48  ;;  %4171 = vrsqrt.f32 %v5137_v37  ;;  %vm3125_vm3 = vcmp.eq.f32.partialorder %v5137_v37, inf  ;;  %vm3127_vm4 = vcmp.eq.f32.partialorder %v5137_v37, 0.0 }
0x1082   :  { %v3112_v20 = vsel %vm3111_vm6, %v3055_v10, %v3110_v35  ;;  %v5140_v16 = vpop.xlane.xlu1 %3063  ;;  %v3128_v2 = vand.u32 2147483648, %v5137_v37 }
0x1083   :  { %v4164_v40 = vpop.eup %4163  ;;  %v3115_v8 = vsel %vm3113_vm7, %v3114_v7, %v3112_v20  ;;  %v3098_v27 = vsel %vm3097_vm8, %v3049_v48, %v3096_v42  ;;  %4173 = vrsqrt.f32 %v5140_v16  ;;  %vm3132_vm5 = vcmp.eq.f32.partialorder %v5140_v16, inf }
0x1084   :  { %v4166_v43 = vpop.eup %4165  ;;  %v3209_v50 = vmax.f32 %v3115_v8, 1e-12  ;;  %v3101_v39 = vsel %vm3099_vm9, %v3100_v22, %v3098_v27  ;;  %v3103_v24 = vmul.f32 %v4164_v40, %v3052_v1  ;;  %v5143_v21 = vpop.xlane.xlu0 %3078  ;;  %vm3134_vm6 = vcmp.eq.f32.partialorder %v5140_v16, 0.0 }
0x1085   :  { %v3207_v54 = vmax.f32 %v3101_v39, 1e-12  ;;  %v3117_v25 = vmul.f32 %v4166_v43, %v3058_v18  ;;  %4175 = vrsqrt.f32 %v5143_v21  ;;  %v3135_v7 = vand.u32 2147483648, %v5140_v16 }
0x1086   :  { %4177 = vrcp.f32 %v3209_v50  ;;  %v3105_v17 = vsel %vm3104_vm10, %v3052_v1, %v3103_v24  ;;  %v5149_v32 = vpop.xlane.xlu1 %3081  ;;  %vm3167_vm7 = vcmp.eq.f32.partialorder %v5143_v21, inf  ;;  %vm3169_vm8 = vcmp.eq.f32.partialorder %v5143_v21, 0.0 }
0x1087   :  { %v4168_v29 = vpop.eup %4167  ;;  %4179 = vrcp.f32 %v3207_v54  ;;  %v3108_v53 = vsel %vm3106_vm11, %v3107_v9, %v3105_v17  ;;  %v3119_v31 = vsel %vm3118_vm12, %v3058_v18, %v3117_v25  ;;  %v3170_v43 = vand.u32 2147483648, %v5143_v21 }
0x1088   :  { %v3208_v61 = vmax.f32 %v3108_v53, 1e-12  ;;  %v3122_v47 = vsel %vm3120_vm13, %v3121_v5, %v3119_v31  ;;  %v3138_v46 = vmul.f32 %v4168_v29, %v5131_v60  ;;  %4181 = vrsqrt.f32 %v5149_v32  ;;  %v5157_v26 = vpop.xlane.xlu0 %3072 }
0x1089   :  { %v4170_v11 = vpop.eup %4169  ;;  %v3210_v38 = vmax.f32 %v3122_v47, 1e-12  ;;  %vm3174_vm9 = vcmp.eq.f32.partialorder %v5149_v32, inf  ;;  %vm3176_vm10 = vcmp.eq.f32.partialorder %v5149_v32, 0.0  ;;  %vm3153_vm11 = vcmp.eq.f32.partialorder %v5157_v26, inf }
0x108a   :  { %4183 = vrcp.f32 %v3208_v61  ;;  %v3140_v55 = vsel %vm3139_vm14, %v5131_v60, %v3138_v46  ;;  %v3145_v14 = vmul.f32 %v4170_v11, %v5134_v33  ;;  %v5167_v0 = vpop.xlane.xlu1 %3075  ;;  %vm3155_vm12 = vcmp.eq.f32.partialorder %v5157_v26, 0.0 }
0x108b   :  { %v4172_v4 = vpop.eup %4171  ;;  %4185 = vrcp.f32 %v3210_v38  ;;  %v3143_v45 = vsel %vm3141_vm15, %v3142_v3, %v3140_v55  ;;  %vm3160_vm13 = vcmp.eq.f32.partialorder %v5167_v0, inf  ;;  %vm3162_vm14 = vcmp.eq.f32.partialorder %v5167_v0, 0.0 }
0x108c   :  { %v3213_v12 = vmax.f32 %v3143_v45, 1e-12  ;;  %v3147_v15 = vsel %vm3146_vm0, %v5134_v33, %v3145_v14  ;;  %v3124_v10 = vmul.f32 %v4172_v4, %v5137_v37  ;;  %4187 = vrsqrt.f32 %v5157_v26 }
0x108d   :  { %v4174_v48 = vpop.eup %4173  ;;  %v3150_v1 = vsel %vm3148_vm2, %v3149_v44, %v3147_v15  ;;  %4189 = vrsqrt.f32 %v5167_v0  ;;  %v5181_v18 = vpop.xlane.xlu0 %3084  ;;  %v3163_v4 = vand.u32 2147483648, %v5167_v0 }
0x108e   :  { %4191 = vrcp.f32 %v3213_v12  ;;  %v3214_v60 = vmax.f32 %v3150_v1, 1e-12  ;;  %v3126_v52 = vsel %vm3125_vm3, %v5137_v37, %v3124_v10  ;;  %v3131_v28 = vmul.f32 %v4174_v48, %v5140_v16 }
0x108f   :  { %v4176_v35 = vpop.eup %4175  ;;  %v3129_v33 = vsel %vm3127_vm4, %v3128_v2, %v3126_v52  ;;  %4193 = vrsqrt.f32 %v5181_v18  ;;  %v5192_v42 = vpop.xlane.xlu1 %3087  ;;  %vm3181_vm15 = vcmp.eq.f32.partialorder %v5181_v18, inf  ;;  %vm3183_vm0 = vcmp.eq.f32.partialorder %v5181_v18, 0.0 }
0x1090   :  { %v4178_v22 = vpop.eup %4177  ;;  %4195 = vrcp.f32 %v3214_v60  ;;  %v3211_v20 = vmax.f32 %v3129_v33, 1e-12  ;;  %v3133_v9 = vsel %vm3132_vm5, %v5140_v16, %v3131_v28  ;;  %v3166_v40 = vmul.f32 %v4176_v35, %v5143_v21 }
0x1091   :  { %v4180_v8 = vpop.eup %4179  ;;  %v3228_v37 = vmul.f32 %v4178_v22, %v5036_v34  ;;  %v3136_v27 = vsel %vm3134_vm6, %v3135_v7, %v3133_v9  ;;  %v5207_v25 = vpop.xlane.xlu0 %3090  ;;  %vm3188_vm2 = vcmp.eq.f32.partialorder %v5192_v42, inf  ;;  %vm3190_vm3 = vcmp.eq.f32.partialorder %v5192_v42, 0.0 }
0x1092   :  { %v4182_v50 = vpop.eup %4181  ;;  %v3224_v39 = vmul.f32 %v4180_v8, %v5039_v59  ;;  %4197 = vrcp.f32 %v3211_v20  ;;  %v3212_v24 = vmax.f32 %v3136_v27, 1e-12  ;;  %v3168_v54 = vsel %vm3167_vm7, %v5143_v21, %v3166_v40 }
0x1093   :  { %3257 = vst.msk [vmem:[%s5333_s4 + $0x10] sm:$0xff] %vm231_vm1, %v3228_v37  ;;  %v3171_v34 = vsel %vm3169_vm8, %v3170_v43, %v3168_v54  ;;  %v3173_v16 = vmul.f32 %v4182_v50, %v5149_v32  ;;  %4199 = vrsqrt.f32 %v5192_v42  ;;  %v3177_v21 = vand.u32 2147483648, %v5149_v32  ;;  %v5221_v17 = vpop.xlane.xlu1 %3093 }
0x1094   :  { %v4184_v5 = vpop.eup %4183  ;;  %3255 = vst.msk [vmem:[%s5333_s4] sm:$0xff] %vm231_vm1, %v3224_v39  ;;  %4201 = vrcp.f32 %v3212_v24  ;;  %v3217_v59 = vmax.f32 %v3171_v34, 1e-12  ;;  %v3191_v20 = vand.u32 2147483648, %v5192_v42  ;;  %vm3195_vm4 = vcmp.eq.f32.partialorder %v5207_v25, inf }
0x1095   :  { %v4186_v29 = vpop.eup %4185  ;;  %v3226_v53 = vmul.f32 %v4184_v5, %v5047_v63  ;;  %v3175_v31 = vsel %vm3174_vm9, %v5149_v32, %v3173_v16  ;;  %4203 = vrsqrt.f32 %v5207_v25  ;;  %v3198_v27 = vand.u32 2147483648, %v5207_v25 }
0x1096   :  { %v4188_v3 = vpop.eup %4187  ;;  %v3230_v61 = vmul.f32 %v4186_v29, %v5042_v58  ;;  %4205 = vrcp.f32 %v3217_v59  ;;  %v3178_v47 = vsel %vm3176_vm10, %v3177_v21, %v3175_v31  ;;  %v3156_v58 = vand.u32 2147483648, %v5157_v26 }
0x1097   :  { %v4190_v46 = vpop.eup %4189  ;;  %3256 = vst.msk [vmem:[%s5333_s4 + $0x8] sm:$0xff] %vm231_vm1, %v3226_v53  ;;  %v3218_v63 = vmax.f32 %v3178_v47, 1e-12  ;;  %v3152_v11 = vmul.f32 %v4188_v3, %v5157_v26  ;;  %4207 = vrsqrt.f32 %v5221_v17  ;;  %vm3197_vm5 = vcmp.eq.f32.partialorder %v5207_v25, 0.0 }
0x1098   :  { %v4192_v32 = vpop.eup %4191  ;;  %3258 = vst.msk [vmem:[%s5333_s4 + $0x18] sm:$0xff] %vm231_vm1, %v3230_v61  ;;  %v3159_v38 = vmul.f32 %v4190_v46, %v5167_v0  ;;  %vm3202_vm6 = vcmp.eq.f32.partialorder %v5221_v17, inf  ;;  %vm3204_vm7 = vcmp.eq.f32.partialorder %v5221_v17, 0.0 }
0x1099   :  { %v4194_v44 = vpop.eup %4193  ;;  %v3236_v55 = vmul.f32 %v4192_v32, %v5059_v56  ;;  %4209 = vrcp.f32 %v3218_v63  ;;  %v3154_v14 = vsel %vm3153_vm11, %v5157_v26, %v3152_v11  ;;  %v3184_v26 = vand.u32 2147483648, %v5181_v18 }
0x109a   :  { %v4196_v45 = vpop.eup %4195  ;;  %v3157_v2 = vsel %vm3155_vm12, %v3156_v58, %v3154_v14  ;;  %v3161_v12 = vsel %vm3160_vm13, %v5167_v0, %v3159_v38  ;;  %v3180_v15 = vmul.f32 %v4194_v44, %v5181_v18 }
0x109b   :  { %3261 = vst.msk [vmem:[%s5333_s4 + $0x30] sm:$0xff] %vm231_vm1, %v3236_v55  ;;  %v3238_v56 = vmul.f32 %v4196_v45, %v5066_v49  ;;  %v3215_v10 = vmax.f32 %v3157_v2, 1e-12  ;;  %v3164_v48 = vsel %vm3162_vm14, %v3163_v4, %v3161_v12 }
0x109c   :  { %v4198_v1 = vpop.eup %4197  ;;  %v3216_v60 = vmax.f32 %v3164_v48, 1e-12  ;;  %v3182_v52 = vsel %vm3181_vm15, %v5181_v18, %v3180_v15 }
0x109d   :  { %v4200_v0 = vpop.eup %4199  ;;  %3262 = vst.msk [vmem:[%s5333_s4 + $0x38] sm:$0xff] %vm231_vm1, %v3238_v56  ;;  %v3232_v28 = vmul.f32 %v4198_v1, %v5062_v36  ;;  %4211 = vrcp.f32 %v3215_v10  ;;  %v3185_v49 = vsel %vm3183_vm0, %v3184_v26, %v3182_v52 }
0x109e   :  { %v4202_v35 = vpop.eup %4201  ;;  %4213 = vrcp.f32 %v3216_v60  ;;  %v3219_v33 = vmax.f32 %v3185_v49, 1e-12  ;;  %v3187_v7 = vmul.f32 %v4200_v0, %v5192_v42 }
0x109f   :  { %v4204_v22 = vpop.eup %4203  ;;  %3259 = vst.msk [vmem:[%s5333_s4 + $0x20] sm:$0xff] %vm231_vm1, %v3232_v28  ;;  %v3234_v18 = vmul.f32 %v4202_v35, %v5071_v6 }
0x10a0   :  { %v4206_v36 = vpop.eup %4205  ;;  %4215 = vrcp.f32 %v3219_v33  ;;  %v3189_v9 = vsel %vm3188_vm2, %v5192_v42, %v3187_v7  ;;  %v3194_v40 = vmul.f32 %v4204_v22, %v5207_v25 }
0x10a1   :  { %v4208_v8 = vpop.eup %4207  ;;  %3260 = vst.msk [vmem:[%s5333_s4 + $0x28] sm:$0xff] %vm231_vm1, %v3234_v18  ;;  %v3244_v6 = vmul.f32 %v4206_v36, %v5082_v13  ;;  %v3192_v37 = vsel %vm3190_vm3, %v3191_v20, %v3189_v9  ;;  %v3205_v13 = vand.u32 2147483648, %v5221_v17 }
0x10a2   :  { %v3220_v43 = vmax.f32 %v3192_v37, 1e-12  ;;  %v3196_v50 = vsel %vm3195_vm4, %v5207_v25, %v3194_v40  ;;  %v3201_v42 = vmul.f32 %v4208_v8, %v5221_v17 }
0x10a3   :  { %v4210_v39 = vpop.eup %4209  ;;  %3265 = vst.msk [vmem:[%s5333_s4 + $0x50] sm:$0xff] %vm231_vm1, %v3244_v6  ;;  %v3199_v24 = vsel %vm3197_vm5, %v3198_v27, %v3196_v50 }
0x10a4   :  { %v3246_v54 = vmul.f32 %v4210_v39, %v5089_v57  ;;  %4217 = vrcp.f32 %v3220_v43  ;;  %v3221_v34 = vmax.f32 %v3199_v24, 1e-12  ;;  %v3203_v25 = vsel %vm3202_vm6, %v5221_v17, %v3201_v42 }
0x10a5   :  { %v3206_v16 = vsel %vm3204_vm7, %v3205_v13, %v3203_v25 }
0x10a6   :  { %3266 = vst.msk [vmem:[%s5333_s4 + $0x58] sm:$0xff] %vm231_vm1, %v3246_v54  ;;  %4219 = vrcp.f32 %v3221_v34  ;;  %v3222_v5 = vmax.f32 %v3206_v16, 1e-12 }
0x10a7   :  { %v4212_v59 = vpop.eup %4211 }
0x10a8   :  { %v4214_v21 = vpop.eup %4213  ;;  %v3240_v29 = vmul.f32 %v4212_v59, %v5086_v23  ;;  %4221 = vrcp.f32 %v3222_v5 }
0x10a9   :  { %v3242_v53 = vmul.f32 %v4214_v21, %v5095_v51 }
0x10aa   :  { %v4216_v57 = vpop.eup %4215  ;;  %3263 = vst.msk [vmem:[%s5333_s4 + $0x40] sm:$0xff] %vm231_vm1, %v3240_v29 }
0x10ab   :  { %3264 = vst.msk [vmem:[%s5333_s4 + $0x48] sm:$0xff] %vm231_vm1, %v3242_v53  ;;  %v3248_v17 = vmul.f32 %v4216_v57, %v5110_v19 }
0x10ad   :  { %3267 = vst.msk [vmem:[%s5333_s4 + $0x60] sm:$0xff] %vm231_vm1, %v3248_v17 }
0x10ae   :  { %v4218_v23 = vpop.eup %4217 }
0x10af   :  { %v3250_v51 = vmul.f32 %v4218_v23, %v5117_v62 }
0x10b0   :  { %v4220_v31 = vpop.eup %4219 }
0x10b1   :  { %3268 = vst.msk [vmem:[%s5333_s4 + $0x68] sm:$0xff] %vm231_vm1, %v3250_v51  ;;  %v3252_v3 = vmul.f32 %v4220_v31, %v5107_v41 }
0x10b2   :  { %v4222_v61 = vpop.eup %4221 }
0x10b3   :  { %3269 = vst.msk [vmem:[%s5333_s4 + $0x70] sm:$0xff] %vm231_vm1, %v3252_v3  ;;  %v3254_v19 = vmul.f32 %v4222_v61, %v5114_v30 }
0x10b5   :  { %3270 = vst.msk [vmem:[%s5333_s4 + $0x78] sm:$0xff] %vm231_vm1, %v3254_v19 }
0x10b6   :  { %3275 = vsyncpa [#allocation3], 1 }

</bundles_post_ra>
